<compile_context>
chip_gen: v5e
topology: v5e:2x2
jax: 0.10.0
libtpu: 0.0.40
codegen_flags: <defaults>
</compile_context>

<pallas_src>
import functools
import math

import jax
import jax.numpy as jnp
from jax.experimental import pallas as pl
from jax.experimental.pallas import tpu as pltpu

_HI = jax.lax.Precision.HIGHEST


# ----------------------------- in-kernel math helpers -----------------------------

def _erf_f32(x):
    # Abramowitz & Stegun 7.1.26 rational approximation; max abs error ~1.5e-7.
    # PyTorch's TransformerEncoderLayer(activation='gelu') uses the exact
    # (erf-based) GELU, so we need erf here.
    # TODO(synk): switch to lax.erf if/when Mosaic guarantees an erf lowering.
    a1, a2, a3, a4, a5 = 0.254829592, -0.284496736, 1.421413741, -1.453152027, 1.061405429
    p = 0.3275911
    ax = jnp.abs(x)
    # Exact divide on purpose: the approx EUP reciprocal here costs ~1e-3 GELU
    # error after the polynomial, which breaks parity with the f32 reference.
    t = 1.0 / (1.0 + p * ax)
    poly = ((((a5 * t + a4) * t + a3) * t + a2) * t + a1) * t
    y = 1.0 - poly * jnp.exp(-ax * ax)
    return jnp.where(x >= 0.0, y, -y)


def _gelu_exact(x):
    # PyTorch F.gelu default ("exact" / erf-based) GELU.
    return 0.5 * x * (1.0 + _erf_f32(x * 0.7071067811865476))


def _layernorm(x, w, b, eps=1e-5):
    # PyTorch nn.LayerNorm: biased variance, eps inside the sqrt.
    mu = jnp.mean(x, axis=-1, keepdims=True)
    xc = x - mu
    var = jnp.mean(xc * xc, axis=-1, keepdims=True)
    return xc * jax.lax.rsqrt(var + eps) * w + b


# ----------------------------------- kernel ---------------------------------------

def _transformer_kernel(xin_ref, bpos_ref, win_ref,
                        wqkv_ref, bqkv_ref, wo_ref, bo_ref,
                        ln1w_ref, ln1b_ref,
                        w1_ref, b1_ref, w2_ref, b2_ref,
                        ln2w_ref, ln2b_ref,
                        nw_ref, nb_ref,
                        out_ref,
                        *, num_layers, num_heads, head_dim, block_b):
    # One batch block per grid step; each row is processed independently.
    NH, hd = num_heads, head_dim
    H = NH * hd
    S = xin_ref.shape[1]

    # dot_general dimension numbers (batch dim = heads).
    dn_bmm = (((2,), (1,)), ((0,), (0,)))   # n s k , n k m -> n s m
    dn_qkt = (((2,), (2,)), ((0,), (0,)))   # n q d , n k d -> n q k

    win = win_ref[...]        # hoisted: shared by every row in the block
    bpos = bpos_ref[...]

    for bi in range(block_b):
        # Fused input projections + modality fusion + positional encoding:
        #   concat(vis, imu) @ concat(Wvis, Wimu) + (bvis + bimu + pos[:S])
        x = jnp.dot(xin_ref[bi], win, precision=_HI,
                    preferred_element_type=jnp.float32) + bpos

        # TODO(synk): dropout is identity (eval-mode forward only); no attention mask.
        for l in range(num_layers):
            # ---- self-attention (post-norm TransformerEncoderLayer), all heads fused ----
            xb = jnp.broadcast_to(x, (NH, S, H))            # single consumer (fused QKV)
            # One batched matmul for q/k/v; 1/sqrt(hd) is pre-folded into wq & bq.
            qkv = jax.lax.dot_general(xb, wqkv_ref[l], dn_bmm, precision=_HI,
                                      preferred_element_type=jnp.float32) + bqkv_ref[l]
            q = qkv[:, :, :hd]                              # (NH,S,hd), already scaled
            k = qkv[:, :, hd:2 * hd]
            v = qkv[:, :, 2 * hd:]

            s = jax.lax.dot_general(q, k, dn_qkt, precision=_HI,
                                    preferred_element_type=jnp.float32)   # (NH,S,S)
            s = s - jnp.max(s, axis=-1, keepdims=True)
            p = jnp.exp(s)
            # Exact reciprocal: required for <=2e-3 parity with the f32 reference.
            # (pl.reciprocal(..., approx=True) is a valid production option.)
            p = p / jnp.sum(p, axis=-1, keepdims=True)

            o = jax.lax.dot_general(p, v, dn_bmm, precision=_HI,
                                    preferred_element_type=jnp.float32)   # (NH,S,hd)
            # concat(heads) @ Wo == sum_h head_h @ Wo[h]  (batched matmul + head reduce)
            attn = jnp.sum(jax.lax.dot_general(o, wo_ref[l], dn_bmm, precision=_HI,
                                               preferred_element_type=jnp.float32),
                           axis=0) + bo_ref[l]                            # (S,H)

            x = _layernorm(x + attn, ln1w_ref[l], ln1b_ref[l])

            # ---- feed-forward (exact / erf GELU) ----
            h1 = _gelu_exact(jnp.dot(x, w1_ref[l], precision=_HI,
                                     preferred_element_type=jnp.float32) + b1_ref[l])
            ff = jnp.dot(h1, w2_ref[l], precision=_HI,
                         preferred_element_type=jnp.float32) + b2_ref[l]
            x = _layernorm(x + ff, ln2w_ref[l], ln2b_ref[l])

        # Final self.norm.
        out_ref[bi] = _layernorm(x, nw_ref[...], nb_ref[...]).astype(out_ref.dtype)


# --------------------------------- wrapper ----------------------------------------

def multimodal_pose_transformer(visual, imu, params, *, num_layers, num_heads):
    B, S, Dv = visual.shape
    Di = imu.shape[2]
    Dc = Dv + Di
    H = params["w_vis"].shape[1]
    L, NH = num_layers, num_heads
    hd = H // NH
    F = params["w1"].shape[2]
    scale = 1.0 / math.sqrt(hd)

    # ---- wrapper-side (free XLA) rearrangement ----
    # Fused input projection.
    x_in = jnp.concatenate([visual, imu], axis=-1)                          # (B,S,Dc)
    w_in = jnp.concatenate([params["w_vis"], params["w_imu"]], axis=0)      # (Dc,H)
    b_pos = params["b_vis"] + params["b_imu"] + params["pos"][:S]           # (S,H)

    # Head-major fused q/k/v slab; softmax scale folded into BOTH Wq and bq.
    wq_h = params["wq"].reshape(L, H, NH, hd).transpose(0, 2, 1, 3) * scale
    wk_h = params["wk"].reshape(L, H, NH, hd).transpose(0, 2, 1, 3)
    wv_h = params["wv"].reshape(L, H, NH, hd).transpose(0, 2, 1, 3)
    wqkv_h = jnp.concatenate([wq_h, wk_h, wv_h], axis=-1)                   # (L,NH,H,3hd)
    bq_h = params["bq"].reshape(L, NH, hd) * scale
    bk_h = params["bk"].reshape(L, NH, hd)
    bv_h = params["bv"].reshape(L, NH, hd)
    bqkv_h = jnp.concatenate([bq_h, bk_h, bv_h], axis=-1)[:, :, None, :]    # (L,NH,1,3hd)
    wo_h = params["wo"].reshape(L, NH, hd, H)                               # (L,NH,hd,H)

    # ---- batch blocking: keep >= 2 grid steps (v7x megacore), amortize step overhead ----
    if B <= 2:
        b_blk = 1
    else:
        b_blk = next(bb for bb in range(B // 2, 0, -1) if B % bb == 0)
    grid_b = B // b_blk

    inputs = [
        x_in, b_pos, w_in,
        wqkv_h, bqkv_h, wo_h, params["bo"],
        params["ln1w"], params["ln1b"],
        params["w1"], params["b1"], params["w2"], params["b2"],
        params["ln2w"], params["ln2b"],
        params["normw"], params["normb"],
    ]

    def const_spec(a):
        nd = a.ndim
        # TODO(synk): pipeline_mode=pl.Buffered(1) would halve the VMEM held by
        # these constant-index weight slabs at production sizes.
        return pl.BlockSpec(a.shape, lambda b, _nd=nd: (0,) * _nd)

    in_specs = ([pl.BlockSpec((b_blk, S, Dc), lambda b: (b, 0, 0))]          # activations
                + [const_spec(a) for a in inputs[1:]])                       # weights, whole
    out_specs = pl.BlockSpec((b_blk, S, H), lambda b: (b, 0, 0))

    kernel = functools.partial(_transformer_kernel, num_layers=L, num_heads=NH,
                               head_dim=hd, block_b=b_blk)

    # Advisory cost estimate so XLA can schedule around the custom call.
    flops = int(2 * B * S * H * Dc
                + B * L * S * (8 * H * H + 4 * S * H + 4 * H * F))
    transcendentals = int(B * L * S * (NH * S + F))
    bytes_accessed = int(sum(int(a.size) * a.dtype.itemsize for a in inputs)
                         + B * S * H * 4)
    cost = pl.CostEstimate(flops=flops, transcendentals=transcendentals,
                           bytes_accessed=bytes_accessed)

    # Explicit VMEM budget: all weights are VMEM-resident (double-buffered by the
    # pipeline) plus one activation block; keep it under v7x's 64 MiB ceiling.
    param_bytes = sum(int(a.size) * a.dtype.itemsize for a in inputs[1:])
    act_bytes = b_blk * S * (Dc + H) * 4
    vmem_limit = int(min(64 * 1024 * 1024,
                         max(16 * 1024 * 1024, 4 * (param_bytes + act_bytes))))

    return pl.pallas_call(
        kernel,
        out_shape=jax.ShapeDtypeStruct((B, S, H), jnp.float32),
        grid=(grid_b,),
        in_specs=in_specs,
        out_specs=out_specs,
        # Batch blocks are independent: parallel axis lets v7x split them over
        # its two TensorCores; harmless no-op on v5e/v6e.
        compiler_params=pltpu.CompilerParams(
            dimension_semantics=("parallel",),
            vmem_limit_bytes=vmem_limit),
        cost_estimate=cost,
    )(*inputs)


# ----------------------------- parameters & reference -----------------------------

def init_params(key, Dv, Di, H, L, F, max_seq):
    ks = jax.random.split(key, 20)

    def xavier(k, fan_in, fan_out, shape=None):
        shape = shape if shape is not None else (fan_in, fan_out)
        lim = math.sqrt(6.0 / (fan_in + fan_out))
        return jax.random.uniform(k, shape, jnp.float32, -lim, lim)

    p = {}
    p["w_vis"] = xavier(ks[0], Dv, H)
    p["b_vis"] = 0.01 * jax.random.normal(ks[1], (1, H), jnp.float32)
    p["w_imu"] = xavier(ks[2], Di, H)
    p["b_imu"] = 0.01 * jax.random.normal(ks[3], (1, H), jnp.float32)
    p["pos"] = 0.02 * jax.random.normal(ks[4], (max_seq, H), jnp.float32)
    p["wq"] = xavier(ks[5], H, H, (L, H, H))
    p["wk"] = xavier(ks[6], H, H, (L, H, H))
    p["wv"] = xavier(ks[7], H, H, (L, H, H))
    p["bq"] = 0.01 * jax.random.normal(ks[8], (L, 1, H), jnp.float32)
    p["bk"] = 0.01 * jax.random.normal(ks[9], (L, 1, H), jnp.float32)
    p["bv"] = 0.01 * jax.random.normal(ks[10], (L, 1, H), jnp.float32)
    p["wo"] = xavier(ks[11], H, H, (L, H, H))
    p["bo"] = 0.01 * jax.random.normal(ks[12], (L, 1, H), jnp.float32)
    p["ln1w"] = jnp.ones((L, 1, H), jnp.float32)
    p["ln1b"] = jnp.zeros((L, 1, H), jnp.float32)
    p["w1"] = xavier(ks[13], H, F, (L, H, F))
    p["b1"] = 0.01 * jax.random.normal(ks[14], (L, 1, F), jnp.float32)
    p["w2"] = xavier(ks[15], F, H, (L, F, H))
    p["b2"] = 0.01 * jax.random.normal(ks[16], (L, 1, H), jnp.float32)
    p["ln2w"] = jnp.ones((L, 1, H), jnp.float32)
    p["ln2b"] = jnp.zeros((L, 1, H), jnp.float32)
    p["normw"] = jnp.ones((1, H), jnp.float32)
    p["normb"] = jnp.zeros((1, H), jnp.float32)
    return p


def reference_forward(params, visual, imu, *, num_layers, num_heads):
    # Pure-JAX mirror of the PyTorch forward (eval mode), full f32 matmul precision.
    B, S, _ = visual.shape
    H = params["w_vis"].shape[1]
    hd = H // num_heads
    scale = 1.0 / math.sqrt(hd)

    x = (jnp.matmul(visual, params["w_vis"], precision=_HI) + params["b_vis"]
         + jnp.matmul(imu, params["w_imu"], precision=_HI) + params["b_imu"]
         + params["pos"][:S][None])
    for l in range(num_layers):
        q = jnp.matmul(x, params["wq"][l], precision=_HI) + params["bq"][l]
        k = jnp.matmul(x, params["wk"][l], precision=_HI) + params["bk"][l]
        v = jnp.matmul(x, params["wv"][l], precision=_HI) + params["bv"][l]
        q = q.reshape(B, S, num_heads, hd).transpose(0, 2, 1, 3)
        k = k.reshape(B, S, num_heads, hd).transpose(0, 2, 1, 3)
        v = v.reshape(B, S, num_heads, hd).transpose(0, 2, 1, 3)
        scores = jnp.einsum("bhqd,bhkd->bhqk", q, k, precision=_HI) * scale
        probs = jax.nn.softmax(scores, axis=-1)
        a = jnp.einsum("bhqk,bhkd->bhqd", probs, v,
                       precision=_HI).transpose(0, 2, 1, 3).reshape(B, S, H)
        a = jnp.matmul(a, params["wo"][l], precision=_HI) + params["bo"][l]
        x = _layernorm(x + a, params["ln1w"][l], params["ln1b"][l])
        h1 = jax.nn.gelu(jnp.matmul(x, params["w1"][l], precision=_HI) + params["b1"][l],
                         approximate=False)
        ff = jnp.matmul(h1, params["w2"][l], precision=_HI) + params["b2"][l]
        x = _layernorm(x + ff, params["ln2w"][l], params["ln2b"][l])
    return _layernorm(x, params["normw"], params["normb"])


# ------------------------------------- main ----------------------------------------

if __name__ == "__main__":
    # Small, forward-consistent shapes: visual_dim=64, imu_dim=32, hidden=32,
    # 2 layers, 4 heads, ffn=4*hidden=128, max_seq=20, batch=2, seq=8.
    B, S = 2, 8
    Dv, Di, H, L, NH, MAXS = 64, 32, 32, 2, 4, 20
    F = 4 * H

    key = jax.random.PRNGKey(0)
    kp, kv, ki = jax.random.split(key, 3)
    params = init_params(kp, Dv, Di, H, L, F, MAXS)
    visual = jax.random.normal(kv, (B, S, Dv), jnp.float32)
    imu = jax.random.normal(ki, (B, S, Di), jnp.float32)

    out = multimodal_pose_transformer(visual, imu, params, num_layers=L, num_heads=NH)
    out = jax.block_until_ready(out)

    ref = jax.block_until_ready(
        reference_forward(params, visual, imu, num_layers=L, num_heads=NH))

    assert out.shape == (B, S, H), out.shape
    max_err = float(jnp.max(jnp.abs(out - ref)))
    # Exact softmax reciprocal + HIGHEST-precision matmuls on both sides leave only
    # the polynomial-erf (~1.5e-7) and MXU rounding; 2e-3 gives a wide margin.
    if not jnp.allclose(out, ref, atol=2e-3, rtol=2e-3):
        raise AssertionError(f"Pallas kernel mismatch vs reference, max|err|={max_err}")
    print("KERNEL_OK")
</pallas_src>

<mosaic_0001>
module attributes {stable_mosaic.version = 11 : i64} {
  func.func @_transformer_kernel(%arg0: i32, %arg1: memref<1x8x96xf32, #tpu.memory_space<vmem>>, %arg2: memref<8x32xf32, #tpu.memory_space<vmem>>, %arg3: memref<96x32xf32, #tpu.memory_space<vmem>>, %arg4: memref<2x4x32x24xf32, #tpu.memory_space<vmem>>, %arg5: memref<2x4x1x24xf32, #tpu.memory_space<vmem>>, %arg6: memref<2x4x8x32xf32, #tpu.memory_space<vmem>>, %arg7: memref<2x1x32xf32, #tpu.memory_space<vmem>>, %arg8: memref<2x1x32xf32, #tpu.memory_space<vmem>>, %arg9: memref<2x1x32xf32, #tpu.memory_space<vmem>>, %arg10: memref<2x32x128xf32, #tpu.memory_space<vmem>>, %arg11: memref<2x1x128xf32, #tpu.memory_space<vmem>>, %arg12: memref<2x128x32xf32, #tpu.memory_space<vmem>>, %arg13: memref<2x1x32xf32, #tpu.memory_space<vmem>>, %arg14: memref<2x1x32xf32, #tpu.memory_space<vmem>>, %arg15: memref<2x1x32xf32, #tpu.memory_space<vmem>>, %arg16: memref<1x32xf32, #tpu.memory_space<vmem>>, %arg17: memref<1x32xf32, #tpu.memory_space<vmem>>, %arg18: memref<1x8x32xf32, #tpu.memory_space<vmem>>) attributes {dimension_semantics = [#tpu.dimension_semantics<parallel>], iteration_bounds = array<i64: 2>, scalar_prefetch = 0 : i64, scratch_operands = 0 : i64, tpu.core_type = #tpu.core_type<tc>, window_params = [{transform_indices = @transform_0, window_bounds = array<i64: 1, 8, 96>}, {pipeline_mode = #tpu.pipeline_mode<synchronous>, transform_indices = @transform_1, window_bounds = array<i64: 8, 32>}, {pipeline_mode = #tpu.pipeline_mode<synchronous>, transform_indices = @transform_2, window_bounds = array<i64: 96, 32>}, {pipeline_mode = #tpu.pipeline_mode<synchronous>, transform_indices = @transform_3, window_bounds = array<i64: 2, 4, 32, 24>}, {pipeline_mode = #tpu.pipeline_mode<synchronous>, transform_indices = @transform_4, window_bounds = array<i64: 2, 4, 1, 24>}, {pipeline_mode = #tpu.pipeline_mode<synchronous>, transform_indices = @transform_5, window_bounds = array<i64: 2, 4, 8, 32>}, {pipeline_mode = #tpu.pipeline_mode<synchronous>, transform_indices = @transform_6, window_bounds = array<i64: 2, 1, 32>}, {pipeline_mode = #tpu.pipeline_mode<synchronous>, transform_indices = @transform_7, window_bounds = array<i64: 2, 1, 32>}, {pipeline_mode = #tpu.pipeline_mode<synchronous>, transform_indices = @transform_8, window_bounds = array<i64: 2, 1, 32>}, {pipeline_mode = #tpu.pipeline_mode<synchronous>, transform_indices = @transform_9, window_bounds = array<i64: 2, 32, 128>}, {pipeline_mode = #tpu.pipeline_mode<synchronous>, transform_indices = @transform_10, window_bounds = array<i64: 2, 1, 128>}, {pipeline_mode = #tpu.pipeline_mode<synchronous>, transform_indices = @transform_11, window_bounds = array<i64: 2, 128, 32>}, {pipeline_mode = #tpu.pipeline_mode<synchronous>, transform_indices = @transform_12, window_bounds = array<i64: 2, 1, 32>}, {pipeline_mode = #tpu.pipeline_mode<synchronous>, transform_indices = @transform_13, window_bounds = array<i64: 2, 1, 32>}, {pipeline_mode = #tpu.pipeline_mode<synchronous>, transform_indices = @transform_14, window_bounds = array<i64: 2, 1, 32>}, {pipeline_mode = #tpu.pipeline_mode<synchronous>, transform_indices = @transform_15, window_bounds = array<i64: 1, 32>}, {pipeline_mode = #tpu.pipeline_mode<synchronous>, transform_indices = @transform_16, window_bounds = array<i64: 1, 32>}, {transform_indices = @transform_17, window_bounds = array<i64: 1, 8, 32>}]} {
    %c0 = arith.constant 0 : index
    %c0_0 = arith.constant 0 : index
    %0 = vector.load %arg3[%c0, %c0_0] : memref<96x32xf32, #tpu.memory_space<vmem>>, vector<96x32xf32>
    %c0_1 = arith.constant 0 : index
    %c0_2 = arith.constant 0 : index
    %1 = vector.load %arg2[%c0_1, %c0_2] : memref<8x32xf32, #tpu.memory_space<vmem>>, vector<8x32xf32>
    %c0_3 = arith.constant 0 : index
    %c0_4 = arith.constant 0 : index
    %c0_5 = arith.constant 0 : index
    %2 = vector.load %arg1[%c0_3, %c0_4, %c0_5] : memref<1x8x96xf32, #tpu.memory_space<vmem>>, vector<1x8x96xf32>
    %3 = vector.shape_cast %2 : vector<1x8x96xf32> to vector<8x96xf32>
    %cst = arith.constant dense<0.000000e+00> : vector<8x32xf32>
    %4 = tpu.matmul %3, %0, %cst {dimension_numbers = #tpu.dot_dimension_numbers<[1], [0], [0], [1], [0, 0, 1, 1], [], []>, precision = #tpu.contract_precision<fp32>} : vector<8x96xf32>, vector<96x32xf32>, vector<8x32xf32> -> vector<8x32xf32>
    %5 = arith.addf %4, %1 : vector<8x32xf32>
    %6 = vector.shape_cast %5 : vector<8x32xf32> to vector<1x8x32xf32>
    %7 = vector.broadcast %6 : vector<1x8x32xf32> to vector<4x8x32xf32>
    %c0_6 = arith.constant 0 : index
    %c0_7 = arith.constant 0 : index
    %c0_8 = arith.constant 0 : index
    %c0_9 = arith.constant 0 : index
    %8 = vector.load %arg4[%c0_6, %c0_7, %c0_8, %c0_9] : memref<2x4x32x24xf32, #tpu.memory_space<vmem>>, vector<1x4x32x24xf32>
    %9 = vector.shape_cast %8 : vector<1x4x32x24xf32> to vector<4x32x24xf32>
    %cst_10 = arith.constant dense<0.000000e+00> : vector<4x8x24xf32>
    %10 = tpu.matmul %7, %9, %cst_10 {dimension_numbers = #tpu.dot_dimension_numbers<[2], [1], [1], [2], [0, 0, 0, 1, 1, 2], [0], [0]>, precision = #tpu.contract_precision<fp32>} : vector<4x8x32xf32>, vector<4x32x24xf32>, vector<4x8x24xf32> -> vector<4x8x24xf32>
    %c0_11 = arith.constant 0 : index
    %c0_12 = arith.constant 0 : index
    %c0_13 = arith.constant 0 : index
    %c0_14 = arith.constant 0 : index
    %11 = vector.load %arg5[%c0_11, %c0_12, %c0_13, %c0_14] : memref<2x4x1x24xf32, #tpu.memory_space<vmem>>, vector<1x4x1x24xf32>
    %12 = vector.shape_cast %11 : vector<1x4x1x24xf32> to vector<4x1x24xf32>
    %13 = vector.broadcast %12 : vector<4x1x24xf32> to vector<4x8x24xf32>
    %14 = arith.addf %10, %13 : vector<4x8x24xf32>
    %15 = vector.extract_strided_slice %14 {offsets = [0, 0, 0], sizes = [4, 8, 8], strides = [1, 1, 1]} : vector<4x8x24xf32> to vector<4x8x8xf32>
    %16 = vector.extract_strided_slice %14 {offsets = [0, 0, 8], sizes = [4, 8, 8], strides = [1, 1, 1]} : vector<4x8x24xf32> to vector<4x8x8xf32>
    %17 = vector.extract_strided_slice %14 {offsets = [0, 0, 16], sizes = [4, 8, 8], strides = [1, 1, 1]} : vector<4x8x24xf32> to vector<4x8x8xf32>
    %cst_15 = arith.constant dense<0.000000e+00> : vector<4x8x8xf32>
    %18 = tpu.matmul %15, %16, %cst_15 {dimension_numbers = #tpu.dot_dimension_numbers<[2], [2], [1], [1], [0, 0, 0, 1, 1, 1], [0], [0]>, precision = #tpu.contract_precision<fp32>} : vector<4x8x8xf32>, vector<4x8x8xf32>, vector<4x8x8xf32> -> vector<4x8x8xf32>
    %cst_16 = arith.constant dense<0xFF800000> : vector<4x8xf32>
    %19 = vector.multi_reduction <maximumf>, %18, %cst_16 [2] : vector<4x8x8xf32> to vector<4x8xf32>
    %20 = vector.shape_cast %19 : vector<4x8xf32> to vector<4x8x1xf32>
    %21 = vector.broadcast %20 : vector<4x8x1xf32> to vector<4x8x8xf32>
    %22 = arith.subf %18, %21 : vector<4x8x8xf32>
    %23 = math.exp %22 : vector<4x8x8xf32>
    %cst_17 = arith.constant dense<0.000000e+00> : vector<4x8xf32>
    %24 = vector.multi_reduction <add>, %23, %cst_17 [2] : vector<4x8x8xf32> to vector<4x8xf32>
    %25 = vector.shape_cast %24 : vector<4x8xf32> to vector<4x8x1xf32>
    %26 = vector.broadcast %25 : vector<4x8x1xf32> to vector<4x8x8xf32>
    %27 = arith.divf %23, %26 : vector<4x8x8xf32>
    %cst_18 = arith.constant dense<0.000000e+00> : vector<4x8x8xf32>
    %28 = tpu.matmul %27, %17, %cst_18 {dimension_numbers = #tpu.dot_dimension_numbers<[2], [1], [1], [2], [0, 0, 0, 1, 1, 2], [0], [0]>, precision = #tpu.contract_precision<fp32>} : vector<4x8x8xf32>, vector<4x8x8xf32>, vector<4x8x8xf32> -> vector<4x8x8xf32>
    %c0_19 = arith.constant 0 : index
    %c0_20 = arith.constant 0 : index
    %c0_21 = arith.constant 0 : index
    %c0_22 = arith.constant 0 : index
    %29 = vector.load %arg6[%c0_19, %c0_20, %c0_21, %c0_22] : memref<2x4x8x32xf32, #tpu.memory_space<vmem>>, vector<1x4x8x32xf32>
    %30 = vector.shape_cast %29 : vector<1x4x8x32xf32> to vector<4x8x32xf32>
    %cst_23 = arith.constant dense<0.000000e+00> : vector<4x8x32xf32>
    %31 = tpu.matmul %28, %30, %cst_23 {dimension_numbers = #tpu.dot_dimension_numbers<[2], [1], [1], [2], [0, 0, 0, 1, 1, 2], [0], [0]>, precision = #tpu.contract_precision<fp32>} : vector<4x8x8xf32>, vector<4x8x32xf32>, vector<4x8x32xf32> -> vector<4x8x32xf32>
    %cst_24 = arith.constant dense<0.000000e+00> : vector<8x32xf32>
    %32 = vector.multi_reduction <add>, %31, %cst_24 [0] : vector<4x8x32xf32> to vector<8x32xf32>
    %c0_25 = arith.constant 0 : index
    %c0_26 = arith.constant 0 : index
    %c0_27 = arith.constant 0 : index
    %33 = vector.load %arg7[%c0_25, %c0_26, %c0_27] : memref<2x1x32xf32, #tpu.memory_space<vmem>>, vector<1x1x32xf32>
    %34 = vector.shape_cast %33 : vector<1x1x32xf32> to vector<1x32xf32>
    %35 = vector.broadcast %34 : vector<1x32xf32> to vector<8x32xf32>
    %36 = arith.addf %32, %35 : vector<8x32xf32>
    %37 = arith.addf %5, %36 : vector<8x32xf32>
    %c0_28 = arith.constant 0 : index
    %c0_29 = arith.constant 0 : index
    %c0_30 = arith.constant 0 : index
    %38 = vector.load %arg8[%c0_28, %c0_29, %c0_30] : memref<2x1x32xf32, #tpu.memory_space<vmem>>, vector<1x1x32xf32>
    %39 = vector.shape_cast %38 : vector<1x1x32xf32> to vector<1x32xf32>
    %c0_31 = arith.constant 0 : index
    %c0_32 = arith.constant 0 : index
    %c0_33 = arith.constant 0 : index
    %40 = vector.load %arg9[%c0_31, %c0_32, %c0_33] : memref<2x1x32xf32, #tpu.memory_space<vmem>>, vector<1x1x32xf32>
    %41 = vector.shape_cast %40 : vector<1x1x32xf32> to vector<1x32xf32>
    %cst_34 = arith.constant dense<0.000000e+00> : vector<8xf32>
    %42 = vector.multi_reduction <add>, %37, %cst_34 [1] : vector<8x32xf32> to vector<8xf32>
    %43 = vector.shape_cast %42 : vector<8xf32> to vector<8x1xf32>
    %cst_35 = arith.constant 3.200000e+01 : f32
    %44 = vector.broadcast %cst_35 : f32 to vector<8x1xf32>
    %45 = arith.divf %43, %44 : vector<8x1xf32>
    %46 = vector.broadcast %45 : vector<8x1xf32> to vector<8x32xf32>
    %47 = arith.subf %37, %46 : vector<8x32xf32>
    %48 = arith.mulf %47, %47 : vector<8x32xf32>
    %cst_36 = arith.constant dense<0.000000e+00> : vector<8xf32>
    %49 = vector.multi_reduction <add>, %48, %cst_36 [1] : vector<8x32xf32> to vector<8xf32>
    %50 = vector.shape_cast %49 : vector<8xf32> to vector<8x1xf32>
    %cst_37 = arith.constant 3.200000e+01 : f32
    %51 = vector.broadcast %cst_37 : f32 to vector<8x1xf32>
    %52 = arith.divf %50, %51 : vector<8x1xf32>
    %cst_38 = arith.constant 9.99999974E-6 : f32
    %53 = vector.broadcast %cst_38 : f32 to vector<8x1xf32>
    %54 = arith.addf %52, %53 : vector<8x1xf32>
    %55 = math.rsqrt %54 : vector<8x1xf32>
    %56 = vector.broadcast %55 : vector<8x1xf32> to vector<8x32xf32>
    %57 = arith.mulf %47, %56 : vector<8x32xf32>
    %58 = vector.broadcast %39 : vector<1x32xf32> to vector<8x32xf32>
    %59 = arith.mulf %57, %58 : vector<8x32xf32>
    %60 = vector.broadcast %41 : vector<1x32xf32> to vector<8x32xf32>
    %61 = arith.addf %59, %60 : vector<8x32xf32>
    %c0_39 = arith.constant 0 : index
    %c0_40 = arith.constant 0 : index
    %c0_41 = arith.constant 0 : index
    %62 = vector.load %arg10[%c0_39, %c0_40, %c0_41] : memref<2x32x128xf32, #tpu.memory_space<vmem>>, vector<1x32x128xf32>
    %63 = vector.shape_cast %62 : vector<1x32x128xf32> to vector<32x128xf32>
    %cst_42 = arith.constant dense<0.000000e+00> : vector<8x128xf32>
    %64 = tpu.matmul %61, %63, %cst_42 {dimension_numbers = #tpu.dot_dimension_numbers<[1], [0], [0], [1], [0, 0, 1, 1], [], []>, precision = #tpu.contract_precision<fp32>} : vector<8x32xf32>, vector<32x128xf32>, vector<8x128xf32> -> vector<8x128xf32>
    %c0_43 = arith.constant 0 : index
    %c0_44 = arith.constant 0 : index
    %c0_45 = arith.constant 0 : index
    %65 = vector.load %arg11[%c0_43, %c0_44, %c0_45] : memref<2x1x128xf32, #tpu.memory_space<vmem>>, vector<1x1x128xf32>
    %66 = vector.shape_cast %65 : vector<1x1x128xf32> to vector<1x128xf32>
    %67 = vector.broadcast %66 : vector<1x128xf32> to vector<8x128xf32>
    %68 = arith.addf %64, %67 : vector<8x128xf32>
    %cst_46 = arith.constant 5.000000e-01 : f32
    %69 = vector.broadcast %cst_46 : f32 to vector<8x128xf32>
    %70 = arith.mulf %69, %68 : vector<8x128xf32>
    %cst_47 = arith.constant 0.707106769 : f32
    %71 = vector.broadcast %cst_47 : f32 to vector<8x128xf32>
    %72 = arith.mulf %68, %71 : vector<8x128xf32>
    %73 = math.absf %72 : vector<8x128xf32>
    %cst_48 = arith.constant 0.327591091 : f32
    %74 = vector.broadcast %cst_48 : f32 to vector<8x128xf32>
    %75 = arith.mulf %74, %73 : vector<8x128xf32>
    %cst_49 = arith.constant 1.000000e+00 : f32
    %76 = vector.broadcast %cst_49 : f32 to vector<8x128xf32>
    %77 = arith.addf %76, %75 : vector<8x128xf32>
    %cst_50 = arith.constant 1.000000e+00 : f32
    %78 = vector.broadcast %cst_50 : f32 to vector<8x128xf32>
    %79 = arith.divf %78, %77 : vector<8x128xf32>
    %cst_51 = arith.constant 1.06140542 : f32
    %80 = vector.broadcast %cst_51 : f32 to vector<8x128xf32>
    %81 = arith.mulf %80, %79 : vector<8x128xf32>
    %cst_52 = arith.constant -1.45315206 : f32
    %82 = vector.broadcast %cst_52 : f32 to vector<8x128xf32>
    %83 = arith.addf %81, %82 : vector<8x128xf32>
    %84 = arith.mulf %83, %79 : vector<8x128xf32>
    %cst_53 = arith.constant 1.42141378 : f32
    %85 = vector.broadcast %cst_53 : f32 to vector<8x128xf32>
    %86 = arith.addf %84, %85 : vector<8x128xf32>
    %87 = arith.mulf %86, %79 : vector<8x128xf32>
    %cst_54 = arith.constant -0.284496725 : f32
    %88 = vector.broadcast %cst_54 : f32 to vector<8x128xf32>
    %89 = arith.addf %87, %88 : vector<8x128xf32>
    %90 = arith.mulf %89, %79 : vector<8x128xf32>
    %cst_55 = arith.constant 0.254829586 : f32
    %91 = vector.broadcast %cst_55 : f32 to vector<8x128xf32>
    %92 = arith.addf %90, %91 : vector<8x128xf32>
    %93 = arith.mulf %92, %79 : vector<8x128xf32>
    %cst_56 = arith.constant 0.000000e+00 : f32
    %94 = vector.broadcast %cst_56 : f32 to vector<8x128xf32>
    %95 = arith.subf %94, %73 : vector<8x128xf32>
    %96 = arith.mulf %95, %73 : vector<8x128xf32>
    %97 = math.exp %96 : vector<8x128xf32>
    %98 = arith.mulf %93, %97 : vector<8x128xf32>
    %cst_57 = arith.constant 1.000000e+00 : f32
    %99 = vector.broadcast %cst_57 : f32 to vector<8x128xf32>
    %100 = arith.subf %99, %98 : vector<8x128xf32>
    %cst_58 = arith.constant 0.000000e+00 : f32
    %101 = vector.broadcast %cst_58 : f32 to vector<8x128xf32>
    %102 = arith.cmpf oge, %72, %101 : vector<8x128xf32>
    %cst_59 = arith.constant 0.000000e+00 : f32
    %103 = vector.broadcast %cst_59 : f32 to vector<8x128xf32>
    %104 = arith.subf %103, %100 : vector<8x128xf32>
    %105 = arith.select %102, %100, %104 : vector<8x128xi1>, vector<8x128xf32>
    %cst_60 = arith.constant 1.000000e+00 : f32
    %106 = vector.broadcast %cst_60 : f32 to vector<8x128xf32>
    %107 = arith.addf %106, %105 : vector<8x128xf32>
    %108 = arith.mulf %70, %107 : vector<8x128xf32>
    %c0_61 = arith.constant 0 : index
    %c0_62 = arith.constant 0 : index
    %c0_63 = arith.constant 0 : index
    %109 = vector.load %arg12[%c0_61, %c0_62, %c0_63] : memref<2x128x32xf32, #tpu.memory_space<vmem>>, vector<1x128x32xf32>
    %110 = vector.shape_cast %109 : vector<1x128x32xf32> to vector<128x32xf32>
    %cst_64 = arith.constant dense<0.000000e+00> : vector<8x32xf32>
    %111 = tpu.matmul %108, %110, %cst_64 {dimension_numbers = #tpu.dot_dimension_numbers<[1], [0], [0], [1], [0, 0, 1, 1], [], []>, precision = #tpu.contract_precision<fp32>} : vector<8x128xf32>, vector<128x32xf32>, vector<8x32xf32> -> vector<8x32xf32>
    %c0_65 = arith.constant 0 : index
    %c0_66 = arith.constant 0 : index
    %c0_67 = arith.constant 0 : index
    %112 = vector.load %arg13[%c0_65, %c0_66, %c0_67] : memref<2x1x32xf32, #tpu.memory_space<vmem>>, vector<1x1x32xf32>
    %113 = vector.shape_cast %112 : vector<1x1x32xf32> to vector<1x32xf32>
    %114 = vector.broadcast %113 : vector<1x32xf32> to vector<8x32xf32>
    %115 = arith.addf %111, %114 : vector<8x32xf32>
    %116 = arith.addf %61, %115 : vector<8x32xf32>
    %c0_68 = arith.constant 0 : index
    %c0_69 = arith.constant 0 : index
    %c0_70 = arith.constant 0 : index
    %117 = vector.load %arg14[%c0_68, %c0_69, %c0_70] : memref<2x1x32xf32, #tpu.memory_space<vmem>>, vector<1x1x32xf32>
    %118 = vector.shape_cast %117 : vector<1x1x32xf32> to vector<1x32xf32>
    %c0_71 = arith.constant 0 : index
    %c0_72 = arith.constant 0 : index
    %c0_73 = arith.constant 0 : index
    %119 = vector.load %arg15[%c0_71, %c0_72, %c0_73] : memref<2x1x32xf32, #tpu.memory_space<vmem>>, vector<1x1x32xf32>
    %120 = vector.shape_cast %119 : vector<1x1x32xf32> to vector<1x32xf32>
    %cst_74 = arith.constant dense<0.000000e+00> : vector<8xf32>
    %121 = vector.multi_reduction <add>, %116, %cst_74 [1] : vector<8x32xf32> to vector<8xf32>
    %122 = vector.shape_cast %121 : vector<8xf32> to vector<8x1xf32>
    %cst_75 = arith.constant 3.200000e+01 : f32
    %123 = vector.broadcast %cst_75 : f32 to vector<8x1xf32>
    %124 = arith.divf %122, %123 : vector<8x1xf32>
    %125 = vector.broadcast %124 : vector<8x1xf32> to vector<8x32xf32>
    %126 = arith.subf %116, %125 : vector<8x32xf32>
    %127 = arith.mulf %126, %126 : vector<8x32xf32>
    %cst_76 = arith.constant dense<0.000000e+00> : vector<8xf32>
    %128 = vector.multi_reduction <add>, %127, %cst_76 [1] : vector<8x32xf32> to vector<8xf32>
    %129 = vector.shape_cast %128 : vector<8xf32> to vector<8x1xf32>
    %cst_77 = arith.constant 3.200000e+01 : f32
    %130 = vector.broadcast %cst_77 : f32 to vector<8x1xf32>
    %131 = arith.divf %129, %130 : vector<8x1xf32>
    %cst_78 = arith.constant 9.99999974E-6 : f32
    %132 = vector.broadcast %cst_78 : f32 to vector<8x1xf32>
    %133 = arith.addf %131, %132 : vector<8x1xf32>
    %134 = math.rsqrt %133 : vector<8x1xf32>
    %135 = vector.broadcast %134 : vector<8x1xf32> to vector<8x32xf32>
    %136 = arith.mulf %126, %135 : vector<8x32xf32>
    %137 = vector.broadcast %118 : vector<1x32xf32> to vector<8x32xf32>
    %138 = arith.mulf %136, %137 : vector<8x32xf32>
    %139 = vector.broadcast %120 : vector<1x32xf32> to vector<8x32xf32>
    %140 = arith.addf %138, %139 : vector<8x32xf32>
    %141 = vector.shape_cast %140 : vector<8x32xf32> to vector<1x8x32xf32>
    %142 = vector.broadcast %141 : vector<1x8x32xf32> to vector<4x8x32xf32>
    %c1 = arith.constant 1 : index
    %c0_79 = arith.constant 0 : index
    %c0_80 = arith.constant 0 : index
    %c0_81 = arith.constant 0 : index
    %143 = vector.load %arg4[%c1, %c0_79, %c0_80, %c0_81] : memref<2x4x32x24xf32, #tpu.memory_space<vmem>>, vector<1x4x32x24xf32>
    %144 = vector.shape_cast %143 : vector<1x4x32x24xf32> to vector<4x32x24xf32>
    %cst_82 = arith.constant dense<0.000000e+00> : vector<4x8x24xf32>
    %145 = tpu.matmul %142, %144, %cst_82 {dimension_numbers = #tpu.dot_dimension_numbers<[2], [1], [1], [2], [0, 0, 0, 1, 1, 2], [0], [0]>, precision = #tpu.contract_precision<fp32>} : vector<4x8x32xf32>, vector<4x32x24xf32>, vector<4x8x24xf32> -> vector<4x8x24xf32>
    %c1_83 = arith.constant 1 : index
    %c0_84 = arith.constant 0 : index
    %c0_85 = arith.constant 0 : index
    %c0_86 = arith.constant 0 : index
    %146 = vector.load %arg5[%c1_83, %c0_84, %c0_85, %c0_86] : memref<2x4x1x24xf32, #tpu.memory_space<vmem>>, vector<1x4x1x24xf32>
    %147 = vector.shape_cast %146 : vector<1x4x1x24xf32> to vector<4x1x24xf32>
    %148 = vector.broadcast %147 : vector<4x1x24xf32> to vector<4x8x24xf32>
    %149 = arith.addf %145, %148 : vector<4x8x24xf32>
    %150 = vector.extract_strided_slice %149 {offsets = [0, 0, 0], sizes = [4, 8, 8], strides = [1, 1, 1]} : vector<4x8x24xf32> to vector<4x8x8xf32>
    %151 = vector.extract_strided_slice %149 {offsets = [0, 0, 8], sizes = [4, 8, 8], strides = [1, 1, 1]} : vector<4x8x24xf32> to vector<4x8x8xf32>
    %152 = vector.extract_strided_slice %149 {offsets = [0, 0, 16], sizes = [4, 8, 8], strides = [1, 1, 1]} : vector<4x8x24xf32> to vector<4x8x8xf32>
    %cst_87 = arith.constant dense<0.000000e+00> : vector<4x8x8xf32>
    %153 = tpu.matmul %150, %151, %cst_87 {dimension_numbers = #tpu.dot_dimension_numbers<[2], [2], [1], [1], [0, 0, 0, 1, 1, 1], [0], [0]>, precision = #tpu.contract_precision<fp32>} : vector<4x8x8xf32>, vector<4x8x8xf32>, vector<4x8x8xf32> -> vector<4x8x8xf32>
    %cst_88 = arith.constant dense<0xFF800000> : vector<4x8xf32>
    %154 = vector.multi_reduction <maximumf>, %153, %cst_88 [2] : vector<4x8x8xf32> to vector<4x8xf32>
    %155 = vector.shape_cast %154 : vector<4x8xf32> to vector<4x8x1xf32>
    %156 = vector.broadcast %155 : vector<4x8x1xf32> to vector<4x8x8xf32>
    %157 = arith.subf %153, %156 : vector<4x8x8xf32>
    %158 = math.exp %157 : vector<4x8x8xf32>
    %cst_89 = arith.constant dense<0.000000e+00> : vector<4x8xf32>
    %159 = vector.multi_reduction <add>, %158, %cst_89 [2] : vector<4x8x8xf32> to vector<4x8xf32>
    %160 = vector.shape_cast %159 : vector<4x8xf32> to vector<4x8x1xf32>
    %161 = vector.broadcast %160 : vector<4x8x1xf32> to vector<4x8x8xf32>
    %162 = arith.divf %158, %161 : vector<4x8x8xf32>
    %cst_90 = arith.constant dense<0.000000e+00> : vector<4x8x8xf32>
    %163 = tpu.matmul %162, %152, %cst_90 {dimension_numbers = #tpu.dot_dimension_numbers<[2], [1], [1], [2], [0, 0, 0, 1, 1, 2], [0], [0]>, precision = #tpu.contract_precision<fp32>} : vector<4x8x8xf32>, vector<4x8x8xf32>, vector<4x8x8xf32> -> vector<4x8x8xf32>
    %c1_91 = arith.constant 1 : index
    %c0_92 = arith.constant 0 : index
    %c0_93 = arith.constant 0 : index
    %c0_94 = arith.constant 0 : index
    %164 = vector.load %arg6[%c1_91, %c0_92, %c0_93, %c0_94] : memref<2x4x8x32xf32, #tpu.memory_space<vmem>>, vector<1x4x8x32xf32>
    %165 = vector.shape_cast %164 : vector<1x4x8x32xf32> to vector<4x8x32xf32>
    %cst_95 = arith.constant dense<0.000000e+00> : vector<4x8x32xf32>
    %166 = tpu.matmul %163, %165, %cst_95 {dimension_numbers = #tpu.dot_dimension_numbers<[2], [1], [1], [2], [0, 0, 0, 1, 1, 2], [0], [0]>, precision = #tpu.contract_precision<fp32>} : vector<4x8x8xf32>, vector<4x8x32xf32>, vector<4x8x32xf32> -> vector<4x8x32xf32>
    %cst_96 = arith.constant dense<0.000000e+00> : vector<8x32xf32>
    %167 = vector.multi_reduction <add>, %166, %cst_96 [0] : vector<4x8x32xf32> to vector<8x32xf32>
    %c1_97 = arith.constant 1 : index
    %c0_98 = arith.constant 0 : index
    %c0_99 = arith.constant 0 : index
    %168 = vector.load %arg7[%c1_97, %c0_98, %c0_99] : memref<2x1x32xf32, #tpu.memory_space<vmem>>, vector<1x1x32xf32>
    %169 = vector.shape_cast %168 : vector<1x1x32xf32> to vector<1x32xf32>
    %170 = vector.broadcast %169 : vector<1x32xf32> to vector<8x32xf32>
    %171 = arith.addf %167, %170 : vector<8x32xf32>
    %172 = arith.addf %140, %171 : vector<8x32xf32>
    %c1_100 = arith.constant 1 : index
    %c0_101 = arith.constant 0 : index
    %c0_102 = arith.constant 0 : index
    %173 = vector.load %arg8[%c1_100, %c0_101, %c0_102] : memref<2x1x32xf32, #tpu.memory_space<vmem>>, vector<1x1x32xf32>
    %174 = vector.shape_cast %173 : vector<1x1x32xf32> to vector<1x32xf32>
    %c1_103 = arith.constant 1 : index
    %c0_104 = arith.constant 0 : index
    %c0_105 = arith.constant 0 : index
    %175 = vector.load %arg9[%c1_103, %c0_104, %c0_105] : memref<2x1x32xf32, #tpu.memory_space<vmem>>, vector<1x1x32xf32>
    %176 = vector.shape_cast %175 : vector<1x1x32xf32> to vector<1x32xf32>
    %cst_106 = arith.constant dense<0.000000e+00> : vector<8xf32>
    %177 = vector.multi_reduction <add>, %172, %cst_106 [1] : vector<8x32xf32> to vector<8xf32>
    %178 = vector.shape_cast %177 : vector<8xf32> to vector<8x1xf32>
    %cst_107 = arith.constant 3.200000e+01 : f32
    %179 = vector.broadcast %cst_107 : f32 to vector<8x1xf32>
    %180 = arith.divf %178, %179 : vector<8x1xf32>
    %181 = vector.broadcast %180 : vector<8x1xf32> to vector<8x32xf32>
    %182 = arith.subf %172, %181 : vector<8x32xf32>
    %183 = arith.mulf %182, %182 : vector<8x32xf32>
    %cst_108 = arith.constant dense<0.000000e+00> : vector<8xf32>
    %184 = vector.multi_reduction <add>, %183, %cst_108 [1] : vector<8x32xf32> to vector<8xf32>
    %185 = vector.shape_cast %184 : vector<8xf32> to vector<8x1xf32>
    %cst_109 = arith.constant 3.200000e+01 : f32
    %186 = vector.broadcast %cst_109 : f32 to vector<8x1xf32>
    %187 = arith.divf %185, %186 : vector<8x1xf32>
    %cst_110 = arith.constant 9.99999974E-6 : f32
    %188 = vector.broadcast %cst_110 : f32 to vector<8x1xf32>
    %189 = arith.addf %187, %188 : vector<8x1xf32>
    %190 = math.rsqrt %189 : vector<8x1xf32>
    %191 = vector.broadcast %190 : vector<8x1xf32> to vector<8x32xf32>
    %192 = arith.mulf %182, %191 : vector<8x32xf32>
    %193 = vector.broadcast %174 : vector<1x32xf32> to vector<8x32xf32>
    %194 = arith.mulf %192, %193 : vector<8x32xf32>
    %195 = vector.broadcast %176 : vector<1x32xf32> to vector<8x32xf32>
    %196 = arith.addf %194, %195 : vector<8x32xf32>
    %c1_111 = arith.constant 1 : index
    %c0_112 = arith.constant 0 : index
    %c0_113 = arith.constant 0 : index
    %197 = vector.load %arg10[%c1_111, %c0_112, %c0_113] : memref<2x32x128xf32, #tpu.memory_space<vmem>>, vector<1x32x128xf32>
    %198 = vector.shape_cast %197 : vector<1x32x128xf32> to vector<32x128xf32>
    %cst_114 = arith.constant dense<0.000000e+00> : vector<8x128xf32>
    %199 = tpu.matmul %196, %198, %cst_114 {dimension_numbers = #tpu.dot_dimension_numbers<[1], [0], [0], [1], [0, 0, 1, 1], [], []>, precision = #tpu.contract_precision<fp32>} : vector<8x32xf32>, vector<32x128xf32>, vector<8x128xf32> -> vector<8x128xf32>
    %c1_115 = arith.constant 1 : index
    %c0_116 = arith.constant 0 : index
    %c0_117 = arith.constant 0 : index
    %200 = vector.load %arg11[%c1_115, %c0_116, %c0_117] : memref<2x1x128xf32, #tpu.memory_space<vmem>>, vector<1x1x128xf32>
    %201 = vector.shape_cast %200 : vector<1x1x128xf32> to vector<1x128xf32>
    %202 = vector.broadcast %201 : vector<1x128xf32> to vector<8x128xf32>
    %203 = arith.addf %199, %202 : vector<8x128xf32>
    %cst_118 = arith.constant 5.000000e-01 : f32
    %204 = vector.broadcast %cst_118 : f32 to vector<8x128xf32>
    %205 = arith.mulf %204, %203 : vector<8x128xf32>
    %cst_119 = arith.constant 0.707106769 : f32
    %206 = vector.broadcast %cst_119 : f32 to vector<8x128xf32>
    %207 = arith.mulf %203, %206 : vector<8x128xf32>
    %208 = math.absf %207 : vector<8x128xf32>
    %cst_120 = arith.constant 0.327591091 : f32
    %209 = vector.broadcast %cst_120 : f32 to vector<8x128xf32>
    %210 = arith.mulf %209, %208 : vector<8x128xf32>
    %cst_121 = arith.constant 1.000000e+00 : f32
    %211 = vector.broadcast %cst_121 : f32 to vector<8x128xf32>
    %212 = arith.addf %211, %210 : vector<8x128xf32>
    %cst_122 = arith.constant 1.000000e+00 : f32
    %213 = vector.broadcast %cst_122 : f32 to vector<8x128xf32>
    %214 = arith.divf %213, %212 : vector<8x128xf32>
    %cst_123 = arith.constant 1.06140542 : f32
    %215 = vector.broadcast %cst_123 : f32 to vector<8x128xf32>
    %216 = arith.mulf %215, %214 : vector<8x128xf32>
    %cst_124 = arith.constant -1.45315206 : f32
    %217 = vector.broadcast %cst_124 : f32 to vector<8x128xf32>
    %218 = arith.addf %216, %217 : vector<8x128xf32>
    %219 = arith.mulf %218, %214 : vector<8x128xf32>
    %cst_125 = arith.constant 1.42141378 : f32
    %220 = vector.broadcast %cst_125 : f32 to vector<8x128xf32>
    %221 = arith.addf %219, %220 : vector<8x128xf32>
    %222 = arith.mulf %221, %214 : vector<8x128xf32>
    %cst_126 = arith.constant -0.284496725 : f32
    %223 = vector.broadcast %cst_126 : f32 to vector<8x128xf32>
    %224 = arith.addf %222, %223 : vector<8x128xf32>
    %225 = arith.mulf %224, %214 : vector<8x128xf32>
    %cst_127 = arith.constant 0.254829586 : f32
    %226 = vector.broadcast %cst_127 : f32 to vector<8x128xf32>
    %227 = arith.addf %225, %226 : vector<8x128xf32>
    %228 = arith.mulf %227, %214 : vector<8x128xf32>
    %cst_128 = arith.constant 0.000000e+00 : f32
    %229 = vector.broadcast %cst_128 : f32 to vector<8x128xf32>
    %230 = arith.subf %229, %208 : vector<8x128xf32>
    %231 = arith.mulf %230, %208 : vector<8x128xf32>
    %232 = math.exp %231 : vector<8x128xf32>
    %233 = arith.mulf %228, %232 : vector<8x128xf32>
    %cst_129 = arith.constant 1.000000e+00 : f32
    %234 = vector.broadcast %cst_129 : f32 to vector<8x128xf32>
    %235 = arith.subf %234, %233 : vector<8x128xf32>
    %cst_130 = arith.constant 0.000000e+00 : f32
    %236 = vector.broadcast %cst_130 : f32 to vector<8x128xf32>
    %237 = arith.cmpf oge, %207, %236 : vector<8x128xf32>
    %cst_131 = arith.constant 0.000000e+00 : f32
    %238 = vector.broadcast %cst_131 : f32 to vector<8x128xf32>
    %239 = arith.subf %238, %235 : vector<8x128xf32>
    %240 = arith.select %237, %235, %239 : vector<8x128xi1>, vector<8x128xf32>
    %cst_132 = arith.constant 1.000000e+00 : f32
    %241 = vector.broadcast %cst_132 : f32 to vector<8x128xf32>
    %242 = arith.addf %241, %240 : vector<8x128xf32>
    %243 = arith.mulf %205, %242 : vector<8x128xf32>
    %c1_133 = arith.constant 1 : index
    %c0_134 = arith.constant 0 : index
    %c0_135 = arith.constant 0 : index
    %244 = vector.load %arg12[%c1_133, %c0_134, %c0_135] : memref<2x128x32xf32, #tpu.memory_space<vmem>>, vector<1x128x32xf32>
    %245 = vector.shape_cast %244 : vector<1x128x32xf32> to vector<128x32xf32>
    %cst_136 = arith.constant dense<0.000000e+00> : vector<8x32xf32>
    %246 = tpu.matmul %243, %245, %cst_136 {dimension_numbers = #tpu.dot_dimension_numbers<[1], [0], [0], [1], [0, 0, 1, 1], [], []>, precision = #tpu.contract_precision<fp32>} : vector<8x128xf32>, vector<128x32xf32>, vector<8x32xf32> -> vector<8x32xf32>
    %c1_137 = arith.constant 1 : index
    %c0_138 = arith.constant 0 : index
    %c0_139 = arith.constant 0 : index
    %247 = vector.load %arg13[%c1_137, %c0_138, %c0_139] : memref<2x1x32xf32, #tpu.memory_space<vmem>>, vector<1x1x32xf32>
    %248 = vector.shape_cast %247 : vector<1x1x32xf32> to vector<1x32xf32>
    %249 = vector.broadcast %248 : vector<1x32xf32> to vector<8x32xf32>
    %250 = arith.addf %246, %249 : vector<8x32xf32>
    %251 = arith.addf %196, %250 : vector<8x32xf32>
    %c1_140 = arith.constant 1 : index
    %c0_141 = arith.constant 0 : index
    %c0_142 = arith.constant 0 : index
    %252 = vector.load %arg14[%c1_140, %c0_141, %c0_142] : memref<2x1x32xf32, #tpu.memory_space<vmem>>, vector<1x1x32xf32>
    %253 = vector.shape_cast %252 : vector<1x1x32xf32> to vector<1x32xf32>
    %c1_143 = arith.constant 1 : index
    %c0_144 = arith.constant 0 : index
    %c0_145 = arith.constant 0 : index
    %254 = vector.load %arg15[%c1_143, %c0_144, %c0_145] : memref<2x1x32xf32, #tpu.memory_space<vmem>>, vector<1x1x32xf32>
    %255 = vector.shape_cast %254 : vector<1x1x32xf32> to vector<1x32xf32>
    %cst_146 = arith.constant dense<0.000000e+00> : vector<8xf32>
    %256 = vector.multi_reduction <add>, %251, %cst_146 [1] : vector<8x32xf32> to vector<8xf32>
    %257 = vector.shape_cast %256 : vector<8xf32> to vector<8x1xf32>
    %cst_147 = arith.constant 3.200000e+01 : f32
    %258 = vector.broadcast %cst_147 : f32 to vector<8x1xf32>
    %259 = arith.divf %257, %258 : vector<8x1xf32>
    %260 = vector.broadcast %259 : vector<8x1xf32> to vector<8x32xf32>
    %261 = arith.subf %251, %260 : vector<8x32xf32>
    %262 = arith.mulf %261, %261 : vector<8x32xf32>
    %cst_148 = arith.constant dense<0.000000e+00> : vector<8xf32>
    %263 = vector.multi_reduction <add>, %262, %cst_148 [1] : vector<8x32xf32> to vector<8xf32>
    %264 = vector.shape_cast %263 : vector<8xf32> to vector<8x1xf32>
    %cst_149 = arith.constant 3.200000e+01 : f32
    %265 = vector.broadcast %cst_149 : f32 to vector<8x1xf32>
    %266 = arith.divf %264, %265 : vector<8x1xf32>
    %cst_150 = arith.constant 9.99999974E-6 : f32
    %267 = vector.broadcast %cst_150 : f32 to vector<8x1xf32>
    %268 = arith.addf %266, %267 : vector<8x1xf32>
    %269 = math.rsqrt %268 : vector<8x1xf32>
    %270 = vector.broadcast %269 : vector<8x1xf32> to vector<8x32xf32>
    %271 = arith.mulf %261, %270 : vector<8x32xf32>
    %272 = vector.broadcast %253 : vector<1x32xf32> to vector<8x32xf32>
    %273 = arith.mulf %271, %272 : vector<8x32xf32>
    %274 = vector.broadcast %255 : vector<1x32xf32> to vector<8x32xf32>
    %275 = arith.addf %273, %274 : vector<8x32xf32>
    %c0_151 = arith.constant 0 : index
    %c0_152 = arith.constant 0 : index
    %276 = vector.load %arg16[%c0_151, %c0_152] : memref<1x32xf32, #tpu.memory_space<vmem>>, vector<1x32xf32>
    %c0_153 = arith.constant 0 : index
    %c0_154 = arith.constant 0 : index
    %277 = vector.load %arg17[%c0_153, %c0_154] : memref<1x32xf32, #tpu.memory_space<vmem>>, vector<1x32xf32>
    %cst_155 = arith.constant dense<0.000000e+00> : vector<8xf32>
    %278 = vector.multi_reduction <add>, %275, %cst_155 [1] : vector<8x32xf32> to vector<8xf32>
    %279 = vector.shape_cast %278 : vector<8xf32> to vector<8x1xf32>
    %cst_156 = arith.constant 3.200000e+01 : f32
    %280 = vector.broadcast %cst_156 : f32 to vector<8x1xf32>
    %281 = arith.divf %279, %280 : vector<8x1xf32>
    %282 = vector.broadcast %281 : vector<8x1xf32> to vector<8x32xf32>
    %283 = arith.subf %275, %282 : vector<8x32xf32>
    %284 = arith.mulf %283, %283 : vector<8x32xf32>
    %cst_157 = arith.constant dense<0.000000e+00> : vector<8xf32>
    %285 = vector.multi_reduction <add>, %284, %cst_157 [1] : vector<8x32xf32> to vector<8xf32>
    %286 = vector.shape_cast %285 : vector<8xf32> to vector<8x1xf32>
    %cst_158 = arith.constant 3.200000e+01 : f32
    %287 = vector.broadcast %cst_158 : f32 to vector<8x1xf32>
    %288 = arith.divf %286, %287 : vector<8x1xf32>
    %cst_159 = arith.constant 9.99999974E-6 : f32
    %289 = vector.broadcast %cst_159 : f32 to vector<8x1xf32>
    %290 = arith.addf %288, %289 : vector<8x1xf32>
    %291 = math.rsqrt %290 : vector<8x1xf32>
    %292 = vector.broadcast %291 : vector<8x1xf32> to vector<8x32xf32>
    %293 = arith.mulf %283, %292 : vector<8x32xf32>
    %294 = vector.broadcast %276 : vector<1x32xf32> to vector<8x32xf32>
    %295 = arith.mulf %293, %294 : vector<8x32xf32>
    %296 = vector.broadcast %277 : vector<1x32xf32> to vector<8x32xf32>
    %297 = arith.addf %295, %296 : vector<8x32xf32>
    %c0_160 = arith.constant 0 : index
    %c0_161 = arith.constant 0 : index
    %c0_162 = arith.constant 0 : index
    %298 = vector.load %arg18[%c0_160, %c0_161, %c0_162] : memref<1x8x32xf32, #tpu.memory_space<vmem>>, vector<1x8x32xf32>
    %299 = vector.shape_cast %298 : vector<1x8x32xf32> to vector<8x32xf32>
    %300 = vector.shape_cast %297 : vector<8x32xf32> to vector<1x8x32xf32>
    tpu.vector_store %arg18[%c0_160, %c0_161, %c0_162], %300 {strides = array<i32>} : memref<1x8x32xf32, #tpu.memory_space<vmem>>, vector<1x8x32xf32>,
    return
  }
  func.func @transform_0(%arg0: i32) -> (i32, i32, i32) {
    %c0_i32 = arith.constant 0 : i32
    %c0_i32_0 = arith.constant 0 : i32
    %c0_i32_1 = arith.constant 0 : i32
    return %arg0, %c0_i32, %c0_i32_0 : i32, i32, i32
  }
  func.func @transform_1(%arg0: i32) -> (i32, i32) {
    %c0_i32 = arith.constant 0 : i32
    %c0_i32_0 = arith.constant 0 : i32
    %c0_i32_1 = arith.constant 0 : i32
    return %c0_i32, %c0_i32_0 : i32, i32
  }
  func.func @transform_2(%arg0: i32) -> (i32, i32) {
    %c0_i32 = arith.constant 0 : i32
    %c0_i32_0 = arith.constant 0 : i32
    %c0_i32_1 = arith.constant 0 : i32
    return %c0_i32, %c0_i32_0 : i32, i32
  }
  func.func @transform_3(%arg0: i32) -> (i32, i32, i32, i32) {
    %c0_i32 = arith.constant 0 : i32
    %c0_i32_0 = arith.constant 0 : i32
    %c0_i32_1 = arith.constant 0 : i32
    %c0_i32_2 = arith.constant 0 : i32
    %c0_i32_3 = arith.constant 0 : i32
    return %c0_i32, %c0_i32_0, %c0_i32_1, %c0_i32_2 : i32, i32, i32, i32
  }
  func.func @transform_4(%arg0: i32) -> (i32, i32, i32, i32) {
    %c0_i32 = arith.constant 0 : i32
    %c0_i32_0 = arith.constant 0 : i32
    %c0_i32_1 = arith.constant 0 : i32
    %c0_i32_2 = arith.constant 0 : i32
    %c0_i32_3 = arith.constant 0 : i32
    return %c0_i32, %c0_i32_0, %c0_i32_1, %c0_i32_2 : i32, i32, i32, i32
  }
  func.func @transform_5(%arg0: i32) -> (i32, i32, i32, i32) {
    %c0_i32 = arith.constant 0 : i32
    %c0_i32_0 = arith.constant 0 : i32
    %c0_i32_1 = arith.constant 0 : i32
    %c0_i32_2 = arith.constant 0 : i32
    %c0_i32_3 = arith.constant 0 : i32
    return %c0_i32, %c0_i32_0, %c0_i32_1, %c0_i32_2 : i32, i32, i32, i32
  }
  func.func @transform_6(%arg0: i32) -> (i32, i32, i32) {
    %c0_i32 = arith.constant 0 : i32
    %c0_i32_0 = arith.constant 0 : i32
    %c0_i32_1 = arith.constant 0 : i32
    %c0_i32_2 = arith.constant 0 : i32
    return %c0_i32, %c0_i32_0, %c0_i32_1 : i32, i32, i32
  }
  func.func @transform_7(%arg0: i32) -> (i32, i32, i32) {
    %c0_i32 = arith.constant 0 : i32
    %c0_i32_0 = arith.constant 0 : i32
    %c0_i32_1 = arith.constant 0 : i32
    %c0_i32_2 = arith.constant 0 : i32
    return %c0_i32, %c0_i32_0, %c0_i32_1 : i32, i32, i32
  }
  func.func @transform_8(%arg0: i32) -> (i32, i32, i32) {
    %c0_i32 = arith.constant 0 : i32
    %c0_i32_0 = arith.constant 0 : i32
    %c0_i32_1 = arith.constant 0 : i32
    %c0_i32_2 = arith.constant 0 : i32
    return %c0_i32, %c0_i32_0, %c0_i32_1 : i32, i32, i32
  }
  func.func @transform_9(%arg0: i32) -> (i32, i32, i32) {
    %c0_i32 = arith.constant 0 : i32
    %c0_i32_0 = arith.constant 0 : i32
    %c0_i32_1 = arith.constant 0 : i32
    %c0_i32_2 = arith.constant 0 : i32
    return %c0_i32, %c0_i32_0, %c0_i32_1 : i32, i32, i32
  }
  func.func @transform_10(%arg0: i32) -> (i32, i32, i32) {
    %c0_i32 = arith.constant 0 : i32
    %c0_i32_0 = arith.constant 0 : i32
    %c0_i32_1 = arith.constant 0 : i32
    %c0_i32_2 = arith.constant 0 : i32
    return %c0_i32, %c0_i32_0, %c0_i32_1 : i32, i32, i32
  }
  func.func @transform_11(%arg0: i32) -> (i32, i32, i32) {
    %c0_i32 = arith.constant 0 : i32
    %c0_i32_0 = arith.constant 0 : i32
    %c0_i32_1 = arith.constant 0 : i32
    %c0_i32_2 = arith.constant 0 : i32
    return %c0_i32, %c0_i32_0, %c0_i32_1 : i32, i32, i32
  }
  func.func @transform_12(%arg0: i32) -> (i32, i32, i32) {
    %c0_i32 = arith.constant 0 : i32
    %c0_i32_0 = arith.constant 0 : i32
    %c0_i32_1 = arith.constant 0 : i32
    %c0_i32_2 = arith.constant 0 : i32
    return %c0_i32, %c0_i32_0, %c0_i32_1 : i32, i32, i32
  }
  func.func @transform_13(%arg0: i32) -> (i32, i32, i32) {
    %c0_i32 = arith.constant 0 : i32
    %c0_i32_0 = arith.constant 0 : i32
    %c0_i32_1 = arith.constant 0 : i32
    %c0_i32_2 = arith.constant 0 : i32
    return %c0_i32, %c0_i32_0, %c0_i32_1 : i32, i32, i32
  }
  func.func @transform_14(%arg0: i32) -> (i32, i32, i32) {
    %c0_i32 = arith.constant 0 : i32
    %c0_i32_0 = arith.constant 0 : i32
    %c0_i32_1 = arith.constant 0 : i32
    %c0_i32_2 = arith.constant 0 : i32
    return %c0_i32, %c0_i32_0, %c0_i32_1 : i32, i32, i32
  }
  func.func @transform_15(%arg0: i32) -> (i32, i32) {
    %c0_i32 = arith.constant 0 : i32
    %c0_i32_0 = arith.constant 0 : i32
    %c0_i32_1 = arith.constant 0 : i32
    return %c0_i32, %c0_i32_0 : i32, i32
  }
  func.func @transform_16(%arg0: i32) -> (i32, i32) {
    %c0_i32 = arith.constant 0 : i32
    %c0_i32_0 = arith.constant 0 : i32
    %c0_i32_1 = arith.constant 0 : i32
    return %c0_i32, %c0_i32_0 : i32, i32
  }
  func.func @transform_17(%arg0: i32) -> (i32, i32, i32) {
    %c0_i32 = arith.constant 0 : i32
    %c0_i32_0 = arith.constant 0 : i32
    %c0_i32_1 = arith.constant 0 : i32
    return %arg0, %c0_i32, %c0_i32_0 : i32, i32, i32
  }
}

</mosaic_0001>

<bundles_post_ra>
// kernel: tpu_custom_call.1
= control target key start
LH: loop header
LB: loop body
LE: loop exit
PB: predicated region body
PF: predicated region fallthrough
CT: control target
= control target key end

     0   :  { %s9825_s0 = inlined_call_operand.vmem [shape: f32[2,8,96], index: 0, kind: input, shape index: {}]   ;;  %s9826_s1 = inlined_call_operand.vmem [shape: f32[8,32], index: 1, kind: input, shape index: {}]   ;;  %s9827_s2 = inlined_call_operand.vmem [shape: f32[96,32], index: 2, kind: input, shape index: {}]   ;;  %s9828_s3 = inlined_call_operand.vmem [shape: f32[2,4,32,24], index: 3, kind: input, shape index: {}]   ;;  %s9829_s4 = inlined_call_operand.vmem [shape: f32[2,4,1,24], index: 4, kind: input, shape index: {}]   ;;  %s9830_s5 = inlined_call_operand.vmem [shape: f32[2,4,8,32], index: 5, kind: input, shape index: {}]   ;;  %s9831_s6 = inlined_call_operand.vmem [shape: f32[2,1,32], index: 6, kind: input, shape index: {}]   ;;  %s9832_s7 = inlined_call_operand.vmem [shape: f32[2,1,32], index: 7, kind: input, shape index: {}]   ;;  %s9833_s8 = inlined_call_operand.vmem [shape: f32[2,1,32], index: 8, kind: input, shape index: {}]   ;;  %s9834_s9 = inlined_call_operand.vmem [shape: f32[2,32,128], index: 9, kind: input, shape index: {}]   ;;  %s9835_s10 = inlined_call_operand.vmem [shape: f32[2,1,128], index: 10, kind: input, shape index: {}]   ;;  %s9836_s11 = inlined_call_operand.vmem [shape: f32[2,128,32], index: 11, kind: input, shape index: {}]   ;;  %s9837_s12 = inlined_call_operand.vmem [shape: f32[2,1,32], index: 12, kind: input, shape index: {}]   ;;  %s9838_s13 = inlined_call_operand.vmem [shape: f32[2,1,32], index: 13, kind: input, shape index: {}]   ;;  %s9839_s14 = inlined_call_operand.vmem [shape: f32[2,1,32], index: 14, kind: input, shape index: {}]   ;;  %s9840_s15 = inlined_call_operand.vmem [shape: f32[1,32], index: 15, kind: input, shape index: {}]   ;;  %s9841_s16 = inlined_call_operand.vmem [shape: f32[1,32], index: 16, kind: input, shape index: {}]   ;;  %s9842_s17 = inlined_call_operand.hbm [shape: f32[2,8,32], index: 17, kind: output, shape index: {}]  }
   0x1   :  { %9844 = sst [smem:[#allocation7_spill]] %s9825_s0 }
   0x2   :  { %9845 = sst [smem:[#allocation8_spill]] %s9826_s1 }
   0x3   :  { %9846 = sst [smem:[#allocation9_spill]] %s9827_s2 }
   0x4   :  { %9847 = sst [smem:[#allocation10_spill]] %s9828_s3 }
   0x5   :  { %9848 = sst [smem:[#allocation11_spill]] %s9829_s4 }
   0x6   :  { %9849 = sst [smem:[#allocation12_spill]] %s9830_s5 }
   0x7   :  { %22 = vsyncpa [#allocation3], 0 }
   0x8   :  { %24 = vsyncpa [#allocation3 + $0x1], 0  ;;  %s8048_s24 = smov 0   ;;  %s8050_s25 = smov 0  }
   0x9   :  { %s8052_s26 = smov 0   ;;  %s8054_s27 = smov 0  }
   0xa LB: > { %9850 = sst [smem:[#allocation5_spill]] %s7949_s26  ;;  %s8069_s28 = sadd.s32 4294967295, %s7953_s27   ;;  %s7953_s27 = sphi %s8054_s27, %s9866_s27   ;;  %s7949_s26 = sphi %s8052_s26, %s9863_s26   ;;  %s7945_s25 = sphi %s8050_s25, %s9865_s25   ;;  %s7941_s24 = sphi %s8048_s24, %s9864_s24  }
   0xb   : > { %s7712_s29 = sadd.s32 4294967294, %s7953_s27   ;;  %s8073_s0 = sadd.s32 1, %s7953_s27  }
   0xc   : > { %s399_s30 = sadd.s32 1, %s7949_s26  ;;  %s396_s18 = ssub.s32 %s7953_s27, %s8073_s0 }
   0xd   : > { %p409_p0 = scmp.ne.s32.totalorder %s7949_s26, %s7945_s25  ;;  %p397_p1 = scmp.eq.s32.totalorder %s396_s18, 0 }
   0xe   : > { %p410_p2 = scmp.eq.s32.totalorder %s8069_s28, 1  ;;  %p415_p3 = scmp.ne.s32.totalorder %s7945_s25, %s7941_s24 }
   0xf   : > { %p416_p4 = scmp.eq.s32.totalorder %s7712_s29, 1  ;;  %p7715_p7 = scmp.ge.s32.totalorder %s7953_s27, 1 }
  0x10   : > { %s8084_s19 = scalar_select %p397_p1, %s7949_s26, %s399_s30  }
  0x11   : > { %p8086_p5 = por %p410_p2, %p409_p0  ;;  %p8090_p6 = por %p416_p4, %p415_p3 }
  0x12   : > { %9851 = sst [smem:[#allocation6_spill]] %s8084_s19  ;;  %p489_p8 = scmp.lt.s32.totalorder %s7953_s27, 3 }
  0x14   : > { %p490_p9 = pnand %p7715_p7, %p489_p8 }
  0x15   : > { %s9854_s2 = sld [smem:[#allocation9_spill]] (!%p490_p9)  ;;  %p540_p10 = scmp.lt.s32.totalorder (!%p490_p9), %s8069_s28, 1 }
  0x16   : > { %493 = sbr.rel (%p490_p9) target bundleno = 4424 (0x1148), region = 88  ;;  %s9855_s23 = sld [smem:[#allocation7_spill]] (!%p490_p9) }
  0x17   : > { %s9856_s3 = sld [smem:[#allocation10_spill]] (!%p490_p9)  ;;  %s7955_s18 = smov (!%p490_p9), 120  }
  0x18   : > { %s9858_s4 = sld [smem:[#allocation11_spill]] (!%p490_p9) }
  0x19   : > { %s9861_s5 = sld [smem:[#allocation12_spill]] (!%p490_p9) }
  0x1b   : > { %v555_v0 = vld [vmem:[%s9854_s2 + $0x58] sm:$0xff]  ;;  %v554_v1 = vld [vmem:[%s9854_s2 + $0x50] sm:$0xff]  ;;  %v553_v2 = vld [vmem:[%s9854_s2 + $0x48] sm:$0xff]  ;;  %s541_s26 = scalar_select %p540_p10, %s8069_s28, 1  ;;  %vm558_vm0 = vcmask 785408   ;;  %vm883_vm1 = vcmask 261120  }
  0x1c   : > { %v8106_v3 = vand.u32 4294901760, %v555_v0  ;;  %v8108_v4 = vand.u32 4294901760, %v554_v1  ;;  %v8110_v5 = vand.u32 4294901760, %v553_v2  ;;  %v552_v6 = vld [vmem:[%s9854_s2 + $0x40] sm:$0xff]  ;;  %v551_v7 = vld [vmem:[%s9854_s2 + $0x38] sm:$0xff]  ;;  %v550_v8 = vld [vmem:[%s9854_s2 + $0x30] sm:$0xff] }
  0x1d   : > { %v8121_v9 = vand.u32 4294901760, %v552_v6  ;;  %v8123_v10 = vand.u32 4294901760, %v551_v7  ;;  %v8125_v11 = vand.u32 4294901760, %v550_v8  ;;  %v549_v12 = vld [vmem:[%s9854_s2 + $0x28] sm:$0xff]  ;;  %v548_v13 = vld [vmem:[%s9854_s2 + $0x20] sm:$0xff]  ;;  %v547_v21 = vld [vmem:[%s9854_s2 + $0x18] sm:$0xff] }
  0x1e   : > { %567 = vmatpush.msra.mxu0 %v8106_v3  ;;  %v8135_v14 = vsub.f32 %v555_v0, %v8106_v3  ;;  %v8138_v15 = vsub.f32 %v554_v1, %v8108_v4  ;;  %v8141_v16 = vsub.f32 %v553_v2, %v8110_v5  ;;  %v8143_v17 = vand.u32 4294901760, %v549_v12  ;;  %731 = vmatpush.msra.mxu3 %v8106_v3  ;;  %s7717_s29 = sshll.u32 %s541_s26, 3  ;;  %v546_v29 = vld [vmem:[%s9854_s2 + $0x10] sm:$0xff]  ;;  %v545_v34 = vld [vmem:[%s9854_s2 + $0x8] sm:$0xff]  ;;  %v544_v43 = vld [vmem:[%s9854_s2] sm:$0xff]  ;;  %s9857_s26 = sld [smem:[#allocation8_spill]] }
  0x1f   : > { %v8150_v18 = vsub.f32 %v552_v6, %v8121_v9  ;;  %v8153_v19 = vsub.f32 %v551_v7, %v8123_v10  ;;  %v8155_v20 = vand.u32 4294901760, %v548_v13  ;;  %v8165_v25 = vsub.f32 %v550_v8, %v8125_v11  ;;  %s543_s30 = scalar_lea.vmem %s9855_s23, %s7717_s29  ;;  %s7956_s23 = smov 112  }
  0x20   : > { %569 = vmatpush.msra.mxu0 %v8108_v4  ;;  %v605_v22 = vand.u32 4294901760, %v8135_v14  ;;  %v611_v23 = vand.u32 4294901760, %v8138_v15  ;;  %v617_v24 = vand.u32 4294901760, %v8141_v16  ;;  %686 = vmatpush.msra.mxu2 %v8135_v14  ;;  %v8171_v28 = vsub.f32 %v549_v12, %v8143_v17  ;;  %v557_v44 = vld [vmem:[%s543_s30] sm:$0xff] }
  0x21   : > { %v623_v26 = vand.u32 4294901760, %v8150_v18  ;;  %v629_v27 = vand.u32 4294901760, %v8153_v19  ;;  %733 = vmatpush.msra.mxu3 %v8108_v4  ;;  %v8188_v33 = vand.u32 4294901760, %v547_v21  ;;  %v8200_v36 = vsub.f32 %v548_v13, %v8155_v20 }
  0x22   : > { %v606_v30 = vsub.f32 %v8135_v14, %v605_v22  ;;  %571 = vmatpush.msra.mxu0 %v8110_v5  ;;  %v612_v31 = vsub.f32 %v8138_v15, %v611_v23  ;;  %v618_v32 = vsub.f32 %v8141_v16, %v617_v24  ;;  %689 = vmatpush.msra.mxu2 %v8138_v15  ;;  %v635_v39 = vand.u32 4294901760, %v8165_v25 }
  0x23   : > { %v624_v35 = vsub.f32 %v8150_v18, %v623_v26  ;;  %735 = vmatpush.msra.mxu3 %v8110_v5  ;;  %v630_v41 = vsub.f32 %v8153_v19, %v629_v27  ;;  %v641_v42 = vand.u32 4294901760, %v8171_v28  ;;  %v8215_v46 = vand.u32 4294901760, %v546_v29 }
  0x24   : > { %v607_v37 = vand.u32 4294901760, %v606_v30  ;;  %v613_v38 = vand.u32 4294901760, %v612_v31  ;;  %573 = vmatpush.msra.mxu0 %v8121_v9  ;;  %692 = vmatpush.msra.mxu2 %v8141_v16  ;;  %v619_v40 = vand.u32 4294901760, %v618_v32  ;;  %v8218_v47 = vsub.f32 %v547_v21, %v8188_v33 }
  0x25   : > { %737 = vmatpush.msra.mxu3 %v8121_v9  ;;  %v625_v45 = vand.u32 4294901760, %v624_v35  ;;  %v8220_v48 = vand.u32 4294901760, %v545_v34  ;;  %v647_v49 = vand.u32 4294901760, %v8200_v36  ;;  %v636_v50 = vsub.f32 %v8165_v25, %v635_v39 }
  0x26   : > { %608 = vmatpush.msra.mxu1 %v607_v37  ;;  %575 = vmatpush.msra.mxu0 %v8123_v10  ;;  %v8230_v51 = vsub.f32 %v546_v29, %v8215_v46  ;;  %v8232_v52 = vand.u32 4294901760, %v544_v43  ;;  %v560_v53 = vsel %vm558_vm0, %v557_v44, 0  ;;  %v631_v55 = vand.u32 4294901760, %v630_v41  ;;  %v856_v41 = vld [vmem:[%s9856_s3 + $0x28] sm:$0xff] }
  0x27   : > { %695 = vmatpush.msra.mxu2 %v8150_v18  ;;  %739 = vmatpush.msra.mxu3 %v8123_v10  ;;  %v8236_v54 = vand.u32 4294901760, %v560_v53  ;;  %v642_v56 = vsub.f32 %v8171_v28, %v641_v42  ;;  %v653_v57 = vand.u32 4294901760, %v8218_v47  ;;  %v8244_v58 = vsub.f32 %v545_v34, %v8220_v48 }
  0x28   : > { %614 = vmatpush.msra.mxu1 %v613_v38  ;;  %577 = vmatpush.msra.mxu0 %v8125_v11  ;;  %v637_v60 = vand.u32 4294901760, %v636_v50  ;;  %v648_v61 = vsub.f32 %v8200_v36, %v647_v49  ;;  %v659_v62 = vand.u32 4294901760, %v8230_v51  ;;  %v670_v63 = vsub.f32 %v544_v43, %v8232_v52 }
  0x29   : > { %698 = vmatpush.msra.mxu2 %v8153_v19  ;;  %741 = vmatpush.msra.mxu3 %v8125_v11  ;;  %v591_v59 = vsub.f32 %v560_v53, %v8236_v54  ;;  %v643_v0 = vand.u32 4294901760, %v642_v56  ;;  %v654_v1 = vsub.f32 %v8218_v47, %v653_v57  ;;  %v665_v2 = vand.u32 4294901760, %v8244_v58 }
  0x2a   : > { %620 = vmatpush.msra.mxu1 %v619_v40  ;;  %579 = vmatpush.msra.mxu0 %v8143_v17  ;;  %v649_v7 = vand.u32 4294901760, %v648_v61  ;;  %v660_v8 = vsub.f32 %v8230_v51, %v659_v62  ;;  %v671_v12 = vand.u32 4294901760, %v670_v63  ;;  %v556_v61 = vld [vmem:[%s9857_s26] sm:$0xff]  ;;  %vm1630_vm2 = vcmask 64512   ;;  %s537_s26 = sand.u32 1, %s7945_s25  }
  0x2b   : > { %701 = vmatpush.msra.mxu2 %v8165_v25  ;;  %743 = vmatpush.msra.mxu3 %v8143_v17  ;;  %v592_v6 = vand.u32 4294901760, %v591_v59  ;;  %v655_v13 = vand.u32 4294901760, %v654_v1  ;;  %v666_v21 = vsub.f32 %v8244_v58, %v665_v2  ;;  %s7716_s19 = sshll.u32 %s537_s26, 3 }
  0x2c   : > { %626 = vmatpush.msra.mxu1 %v625_v45  ;;  %581 = vmatpush.msra.mxu0 %v8155_v20  ;;  %v661_v30 = vand.u32 4294901760, %v660_v8  ;;  %v672_v31 = vsub.f32 %v670_v63, %v671_v12 }
  0x2d   : > { %704 = vmatpush.msra.mxu2 %v8171_v28  ;;  %745 = vmatpush.msra.mxu3 %v8155_v20  ;;  %v593_v29 = vsub.f32 %v591_v59, %v592_v6  ;;  %v667_v32 = vand.u32 4294901760, %v666_v21 }
  0x2e   : > { %632 = vmatpush.msra.mxu1 %v631_v55  ;;  %583 = vmatpush.msra.mxu0 %v8188_v33  ;;  %v673_v35 = vand.u32 4294901760, %v672_v31 }
  0x2f   : > { %707 = vmatpush.msra.mxu2 %v8200_v36  ;;  %747 = vmatpush.msra.mxu3 %v8188_v33  ;;  %v594_v34 = vand.u32 4294901760, %v593_v29 }
  0x30   : > { %638 = vmatpush.msra.mxu1 %v637_v60  ;;  %585 = vmatpush.msra.mxu0 %v8215_v46 }
  0x31   : > { %710 = vmatpush.msra.mxu2 %v8218_v47  ;;  %749 = vmatpush.msra.mxu3 %v8215_v46  ;;  %v855_v47 = vld [vmem:[%s9856_s3 + $0x20] sm:$0xff] }
  0x32   : > { %644 = vmatpush.msra.mxu1 %v643_v0  ;;  %587 = vmatpush.msra.mxu0 %v8220_v48  ;;  %v8347_v50 = vand.u32 4294901760, %v855_v47 }
  0x33   : > { %713 = vmatpush.msra.mxu2 %v8230_v51  ;;  %751 = vmatpush.msra.mxu3 %v8220_v48 }
  0x34   : > { %650 = vmatpush.msra.mxu1 %v649_v7  ;;  %589 = vmatpush.msra.mxu0 %v8232_v52 }
  0x35   : > { %716 = vmatpush.msra.mxu2 %v8244_v58  ;;  %753 = vmatpush.msra.mxu3 %v8232_v52 }
  0x36   : > { %768 = vmatpush.msrb.mxu0 %v605_v22  ;;  %656 = vmatpush.msra.mxu1 %v655_v13 }
  0x37   : > { %719 = vmatpush.msra.mxu2 %v670_v63  ;;  %757 = vmatmul.f32.vlgmr.msra.gmra.mxu3 %v592_v6 }
  0x38   : > { %772 = vmatpush.msrb.mxu0 %v611_v23  ;;  %662 = vmatpush.msra.mxu1 %v661_v30  ;;  %v858_v23 = vld [vmem:[%s9856_s3 + $0x38] sm:$0xff] }
  0x39   : > { %722 = vmatmul.f32.vlgmr.msra.gmra.mxu2 %v591_v59  ;;  %595 = vmatmul.f32.vlgmr.msra.gmra.mxu0 %v594_v34  ;;  %v8323_v28 = vand.u32 4294901760, %v858_v23  ;;  %v862_v30 = vld [vmem:[%s9856_s3 + $0x58] sm:$0xff] }
  0x3a   : > { %776 = vmatpush.msrb.mxu0 %v617_v24  ;;  %668 = vmatpush.msra.mxu1 %v667_v32  ;;  %v8380_v34 = vand.u32 4294901760, %v862_v30 }
  0x3b   : > { %v8331_v40 = vsub.f32 %v858_v23, %v8323_v28 }
  0x3c   : > { %780 = vmatpush.msrb.mxu0 %v623_v26  ;;  %674 = vmatpush.msra.mxu1 %v673_v35  ;;  %v861_v35 = vld [vmem:[%s9856_s3 + $0x50] sm:$0xff] }
  0x3d   : > { %676 = vmatmul.f32.vlgmr.msra.gmra.mxu1 %v8236_v54  ;;  %v1115_v45 = vand.u32 4294901760, %v8331_v40 }
  0x3e   : > { %823 = vmatpush.msrb.mxu1 %v8106_v3  ;;  %784 = vmatpush.msrb.mxu0 %v629_v27  ;;  %v854_v3 = vld [vmem:[%s9856_s3 + $0x18] sm:$0xff] }
  0x3f   : > { %v1116_v51 = vsub.f32 %v8331_v40, %v1115_v45 }
  0x40   : > { %825 = vmatpush.msrb.mxu1 %v8108_v4  ;;  %788 = vmatpush.msrb.mxu0 %v635_v39  ;;  %v899_v4 = vand.u32 4294901760, %v854_v3 }
  0x41   : > { %v1117_v55 = vand.u32 4294901760, %v1116_v51 }
  0x42   : > { %827 = vmatpush.msrb.mxu1 %v8110_v5  ;;  %792 = vmatpush.msrb.mxu0 %v641_v42  ;;  %v853_v5 = vld [vmem:[%s9856_s3 + $0x10] sm:$0xff] }
  0x43   : > { %1000 = vmatpush.msrb.mxu3 %v899_v4 }
  0x44   : > { %829 = vmatpush.msrb.mxu1 %v8121_v9  ;;  %796 = vmatpush.msrb.mxu0 %v647_v49  ;;  %v929_v9 = vsub.f32 %v854_v3, %v899_v4 }
  0x46   : > { %831 = vmatpush.msrb.mxu1 %v8123_v10  ;;  %800 = vmatpush.msrb.mxu0 %v653_v57  ;;  %v901_v10 = vand.u32 4294901760, %v853_v5  ;;  %v930_v14 = vand.u32 4294901760, %v929_v9 }
  0x47   : > { %971 = vmatpush.msrb.mxu2 %v929_v9 }
  0x48   : > { %833 = vmatpush.msrb.mxu1 %v8125_v11  ;;  %804 = vmatpush.msrb.mxu0 %v659_v62  ;;  %v852_v11 = vld [vmem:[%s9856_s3 + $0x8] sm:$0xff]  ;;  %v935_v15 = vsub.f32 %v853_v5, %v901_v10  ;;  %v931_v18 = vsub.f32 %v929_v9, %v930_v14  ;;  %v8389_v5 = vand.u32 4294901760, %v861_v35 }
  0x49   : > { %v903_v16 = vand.u32 4294901760, %v852_v11  ;;  %1002 = vmatpush.msrb.mxu3 %v901_v10  ;;  %v860_v9 = vld [vmem:[%s9856_s3 + $0x48] sm:$0xff] }
  0x4a   : > { %835 = vmatpush.msrb.mxu1 %v8143_v17  ;;  %808 = vmatpush.msrb.mxu0 %v665_v2  ;;  %v851_v17 = vld [vmem:[%s9856_s3] sm:$0xff]  ;;  %v936_v19 = vand.u32 4294901760, %v935_v15  ;;  %v932_v24 = vand.u32 4294901760, %v931_v18  ;;  %v8415_v18 = vsub.f32 %v861_v35, %v8389_v5 }
  0x4b   : > { %974 = vmatpush.msrb.mxu2 %v935_v15  ;;  %v905_v22 = vand.u32 4294901760, %v851_v17  ;;  %1004 = vmatpush.msrb.mxu3 %v903_v16 }
  0x4c   : > { %837 = vmatpush.msrb.mxu1 %v8155_v20  ;;  %812 = vmatpush.msrb.mxu0 %v671_v12  ;;  %v941_v20 = vsub.f32 %v852_v11, %v903_v16  ;;  %v937_v25 = vsub.f32 %v935_v15, %v936_v19  ;;  %v866_v11 = vld [vmem:[%s9856_s3 + $0x78] sm:$0xff]  ;;  %v859_v15 = vld [vmem:[%s9856_s3 + $0x40] sm:$0xff] }
  0x4d   : > { %814 = vmatmul.f32.vlgmr.msrb.gmra.mxu0 %v8236_v54  ;;  %v947_v27 = vsub.f32 %v851_v17, %v905_v22  ;;  %1006 = vmatpush.msrb.mxu3 %v905_v22  ;;  %v8425_v23 = vand.u32 4294901760, %v859_v15 }
  0x4e   : > { %839 = vmatpush.msrb.mxu1 %v8188_v33  ;;  %900 = vmatpush.msra.mxu0 %v899_v4  ;;  %v942_v26 = vand.u32 4294901760, %v941_v20  ;;  %v857_v33 = vld [vmem:[%s9856_s3 + $0x30] sm:$0xff]  ;;  %v938_v36 = vand.u32 4294901760, %v937_v25  ;;  %v864_v25 = vld [vmem:[%s9856_s3 + $0x68] sm:$0xff] }
  0x4f   : > { %977 = vmatpush.msrb.mxu2 %v941_v20  ;;  %1060 = vmatpush.msra.mxu3 %v899_v4  ;;  %v948_v38 = vand.u32 4294901760, %v947_v27  ;;  %v8328_v39 = vand.u32 4294901760, %v857_v33 }
  0x50   : > { %841 = vmatpush.msrb.mxu1 %v8215_v46  ;;  %902 = vmatpush.msra.mxu0 %v901_v10  ;;  %v943_v37 = vsub.f32 %v941_v20, %v942_v26  ;;  %v8341_v46 = vand.u32 4294901760, %v856_v41  ;;  %v865_v20 = vld [vmem:[%s9856_s3 + $0x70] sm:$0xff] }
  0x51   : > { %980 = vmatpush.msrb.mxu2 %v947_v27  ;;  %1062 = vmatpush.msra.mxu3 %v901_v10  ;;  %v949_v43 = vsub.f32 %v947_v27, %v948_v38  ;;  %v8337_v44 = vsub.f32 %v857_v33, %v8328_v39  ;;  %v8395_v10 = vsub.f32 %v862_v30, %v8380_v34  ;;  %v8438_v27 = vand.u32 4294901760, %v865_v20 }
  0x52   : > { %843 = vmatpush.msrb.mxu1 %v8220_v48  ;;  %904 = vmatpush.msra.mxu0 %v903_v16  ;;  %v944_v42 = vand.u32 4294901760, %v943_v37 }
  0x53   : > { %1029 = vmatpush.msra.mxu2 %v930_v14  ;;  %1064 = vmatpush.msra.mxu3 %v903_v16  ;;  %v950_v48 = vand.u32 4294901760, %v949_v43  ;;  %v1121_v49 = vand.u32 4294901760, %v8337_v44  ;;  %v8408_v16 = vand.u32 4294901760, %v860_v9  ;;  %v8466_v43 = vsub.f32 %v865_v20, %v8438_v27 }
  0x54   : > { %845 = vmatpush.msrb.mxu1 %v8232_v52  ;;  %906 = vmatpush.msra.mxu0 %v905_v22  ;;  %v8354_v52 = vsub.f32 %v856_v41, %v8341_v46  ;;  %v8455_v41 = vand.u32 4294901760, %v864_v25 }
  0x55   : > { %847 = vmatmul.f32.vlgmr.msrb.gmra.mxu1 %v8236_v54  ;;  %1033 = vmatpush.msra.mxu2 %v936_v19  ;;  %v1122_v53 = vsub.f32 %v8337_v44, %v1121_v49  ;;  %v8360_v54 = vsub.f32 %v855_v47, %v8347_v50  ;;  %v8417_v19 = vand.u32 4294901760, %v866_v11 }
  0x56   : > { %933 = vmatpush.msra.mxu1 %v932_v24  ;;  %1085 = vmatpush.msrb.mxu0 %v8323_v28  ;;  %v1127_v56 = vand.u32 4294901760, %v8354_v52 }
  0x57   : > { %1037 = vmatpush.msra.mxu2 %v942_v26  ;;  %1066 = vmatpush.msra.mxu3 %v905_v22  ;;  %v1123_v57 = vand.u32 4294901760, %v1122_v53  ;;  %v1133_v58 = vand.u32 4294901760, %v8360_v54  ;;  %v1300_v22 = vand.u32 4294901760, %v8395_v10  ;;  %v8436_v26 = vsub.f32 %v860_v9, %v8408_v16 }
  0x58   : > { %939 = vmatpush.msra.mxu1 %v938_v36  ;;  %1087 = vmatpush.msrb.mxu0 %v8328_v39  ;;  %v1128_v59 = vsub.f32 %v8354_v52, %v1127_v56  ;;  %v1306_v36 = vand.u32 4294901760, %v8415_v18  ;;  %v8445_v37 = vsub.f32 %v866_v11, %v8417_v19 }
  0x59   : > { %1041 = vmatpush.msra.mxu2 %v948_v38  ;;  %v1134_v60 = vsub.f32 %v8360_v54, %v1133_v58  ;;  %v8453_v38 = vsub.f32 %v859_v15, %v8425_v23 }
  0x5a   : > { %945 = vmatpush.msra.mxu1 %v944_v42  ;;  %1089 = vmatpush.msrb.mxu0 %v8341_v46  ;;  %v1129_v63 = vand.u32 4294901760, %v1128_v59  ;;  %v863_v42 = vld [vmem:[%s9856_s3 + $0x60] sm:$0xff]  ;;  %v1307_v47 = vsub.f32 %v8415_v18, %v1306_v36 }
  0x5b   : > { %v1135_v0 = vand.u32 4294901760, %v1134_v60  ;;  %v8474_v51 = vand.u32 4294901760, %v863_v42 }
  0x5c   : > { %951 = vmatpush.msra.mxu1 %v950_v48  ;;  %1091 = vmatpush.msrb.mxu0 %v8347_v50  ;;  %v1485_v48 = vand.u32 4294901760, %v8445_v37 }
  0x5d   : > { %v8496_v60 = vsub.f32 %v863_v42, %v8474_v51 }
  0x5e   : > { %1118 = vmatpush.msrb.mxu1 %v1117_v55  ;;  %v1318_v55 = vand.u32 4294901760, %v8453_v38  ;;  %v1486_v59 = vsub.f32 %v8445_v37, %v1485_v48 }
  0x60   : > { %1124 = vmatpush.msrb.mxu1 %v1123_v57  ;;  %v8481_v57 = vsub.f32 %v864_v25, %v8455_v41 }
  0x62   : > { %1130 = vmatpush.msrb.mxu1 %v1129_v63 }
  0x64   : > { %1136 = vmatpush.msrb.mxu1 %v1135_v0 }
  0xb6   : > { %v596_v62 = vpop.f32.mrf.mxu0 }
  0xb7   : > { %v597_v1 = vadd.f32 %v596_v62, %v556_v61  ;;  %v1503_v61 = vand.u32 4294901760, %v8496_v60 }
  0xb9   : > { %v1504_v63 = vsub.f32 %v8496_v60, %v1503_v61 }
  0xba   : > { %v677_v2 = vpop.f32.mrf.mxu1  ;;  %v758_v12 = vpop.f32.mrf.mxu3 }
  0xbb   : > { %v678_v6 = vadd.f32 %v677_v2, %v597_v1  ;;  %v1505_v1 = vand.u32 4294901760, %v1504_v63 }
  0xbc   : > { %v723_v7 = vpop.f32.mrf.mxu2 }
  0xbd   : > { %v724_v8 = vadd.f32 %v723_v7, %v678_v6  ;;  %v7815_v6 = vld [vmem:[%s9858_s4] ss:$0 sm:$0xff] }
  0xbf   : > { %v759_v13 = vadd.f32 %v758_v12, %v724_v8 }
  0xca   : > { %v815_v21 = vpop.f32.mrf.mxu0 }
  0xcb   : > { %v816_v29 = vadd.f32 %v815_v21, %v759_v13 }
  0xd2   : > { %v848_v31 = vpop.f32.mrf.mxu1 }
  0xd3   : > { %v8378_v32 = vadd.f32 %v848_v31, %v816_v29 }
  0xd5   : > { %v885_v3 = vsel %vm883_vm1, %v8378_v32, 0 }
  0xd6   : > { %v8387_v4 = vand.u32 4294901760, %v885_v3 }
  0xd8   : > { %v8401_v14 = vsub.f32 %v885_v3, %v8387_v4  ;;  %953 = vmatmul.f32.vlgmr.msra.gmra.mxu1 %v8387_v4 }
  0xd9   : > { %1245 = vmatpush.msra.mxu1 %v8323_v28 }
  0xda   : > { %983 = vmatmul.f32.vlgmr.msrb.gmra.mxu2 %v8401_v14  ;;  %v8412_v17 = vand.u32 4294901760, %v8401_v14 }
  0xdb   : > { %1156 = vmatpush.msrb.mxu2 %v8331_v40  ;;  %1247 = vmatpush.msra.mxu1 %v8328_v39 }
  0xdc   : > { %1010 = vmatmul.f32.vlgmr.msrb.gmra.mxu3 %v8412_v17  ;;  %v910_v24 = vsub.f32 %v8401_v14, %v8412_v17 }
  0xdd   : > { %1159 = vmatpush.msrb.mxu2 %v8337_v44  ;;  %1185 = vmatpush.msrb.mxu3 %v8323_v28  ;;  %v1301_v28 = vsub.f32 %v8395_v10, %v1300_v22  ;;  %v1319_v44 = vsub.f32 %v8453_v38, %v1318_v55 }
  0xde   : > { %v8440_v33 = vand.u32 4294901760, %v910_v24  ;;  %1249 = vmatpush.msra.mxu1 %v8341_v46 }
  0xdf   : > { %1162 = vmatpush.msrb.mxu2 %v8354_v52  ;;  %1187 = vmatpush.msrb.mxu3 %v8328_v39  ;;  %v1312_v39 = vand.u32 4294901760, %v8436_v26  ;;  %v1302_v53 = vand.u32 4294901760, %v1301_v28  ;;  %v1320_v62 = vand.u32 4294901760, %v1319_v44 }
  0xe0   : > { %912 = vmatmul.f32.vlgmr.msra.gmra.mxu0 %v8440_v33  ;;  %1138 = vmatmul.f32.vlgmr.msrb.gmra.mxu1 %v8387_v4 }
  0xe1   : > { %1251 = vmatpush.msra.mxu1 %v8347_v50  ;;  %1165 = vmatpush.msrb.mxu2 %v8360_v54  ;;  %v1313_v40 = vsub.f32 %v8436_v26, %v1312_v39 }
  0xe2   : > { %1043 = vmatmul.f32.vlgmr.msra.gmra.mxu2 %v8387_v4  ;;  %1189 = vmatpush.msrb.mxu3 %v8341_v46  ;;  %v1308_v46 = vand.u32 4294901760, %v1307_v47 }
  0xe3   : > { %1214 = vmatpush.msra.mxu0 %v1115_v45  ;;  %1370 = vmatpush.msrb.mxu1 %v8380_v34  ;;  %v1491_v45 = vand.u32 4294901760, %v8466_v43 }
  0xe4   : > { %1068 = vmatmul.f32.vlgmr.msra.gmra.mxu3 %v8387_v4  ;;  %1270 = vmatpush.msra.mxu2 %v8380_v34 }
  0xe5   : > { %1191 = vmatpush.msrb.mxu3 %v8347_v50  ;;  %1218 = vmatpush.msra.mxu0 %v1121_v49  ;;  %v1497_v49 = vand.u32 4294901760, %v8481_v57  ;;  %v1314_v50 = vand.u32 4294901760, %v1313_v40  ;;  %v1492_v52 = vsub.f32 %v8466_v43, %v1491_v45 }
  0xe6   : > { %1372 = vmatpush.msrb.mxu1 %v8389_v5  ;;  %1272 = vmatpush.msra.mxu2 %v8389_v5 }
  0xe7   : > { %1222 = vmatpush.msra.mxu0 %v1127_v56  ;;  %1303 = vmatpush.msra.mxu3 %v1302_v53  ;;  %v1487_v56 = vand.u32 4294901760, %v1486_v59  ;;  %v1498_v54 = vsub.f32 %v8481_v57, %v1497_v49 }
  0xe8   : > { %1097 = vmatmul.f32.vlgmr.msrb.gmra.mxu0 %v8440_v33  ;;  %1253 = vmatmul.f32.vlgmr.msra.gmra.mxu1 %v8387_v4 }
  0xe9   : > { %1374 = vmatpush.msrb.mxu1 %v8408_v16  ;;  %1226 = vmatpush.msra.mxu0 %v1133_v58  ;;  %v1493_v58 = vand.u32 4294901760, %v1492_v52  ;;  %v1499_v0 = vand.u32 4294901760, %v1498_v54 }
  0xea   : > { %1168 = vmatmul.f32.vlgmr.msrb.gmra.mxu2 %v8401_v14  ;;  %1309 = vmatpush.msra.mxu3 %v1308_v46 }
  0xeb   : > { %1274 = vmatpush.msra.mxu2 %v8408_v16  ;;  %1376 = vmatpush.msrb.mxu1 %v8425_v23 }
  0xec   : > { %1195 = vmatmul.f32.vlgmr.msrb.gmra.mxu3 %v8412_v17  ;;  %1341 = vmatpush.msrb.mxu0 %v8395_v10 }
  0xed   : > { %1276 = vmatpush.msra.mxu2 %v8425_v23  ;;  %1315 = vmatpush.msra.mxu3 %v1314_v50 }
  0xee   : > { %1488 = vmatpush.msra.mxu1 %v1487_v56  ;;  %1344 = vmatpush.msrb.mxu0 %v8415_v18 }
  0xef   : > { %1321 = vmatpush.msra.mxu3 %v1320_v62  ;;  %1399 = vmatpush.msrb.mxu2 %v1300_v22  ;;  %v7817_v22 = vld [vmem:[%s9858_s4 + $0x2] ss:$0 sm:$0xff] }
  0xf0   : > { %1228 = vmatmul.f32.vlgmr.msra.gmra.mxu0 %v8387_v4  ;;  %1380 = vmatmul.f32.vlgmr.msrb.gmra.mxu1 %v8412_v17 }
  0xf1   : > { %1494 = vmatpush.msra.mxu1 %v1493_v58  ;;  %1347 = vmatpush.msrb.mxu0 %v8436_v26 }
  0xf2   : > { %1282 = vmatmul.f32.vlgmr.msra.gmra.mxu2 %v8440_v33  ;;  %1430 = vmatpush.msrb.mxu3 %v8380_v34  ;;  %v7816_v34 = vld [vmem:[%s9858_s4 + $0x1] ss:$0 sm:$0xff] }
  0xf3   : > { %1403 = vmatpush.msrb.mxu2 %v1306_v36  ;;  %1500 = vmatpush.msra.mxu1 %v1499_v0 }
  0xf4   : > { %1323 = vmatmul.f32.vlgmr.msra.gmra.mxu3 %v8387_v4  ;;  %1350 = vmatpush.msrb.mxu0 %v8453_v38 }
  0xf5   : > { %1407 = vmatpush.msrb.mxu2 %v1312_v39  ;;  %1432 = vmatpush.msrb.mxu3 %v8389_v5 }
  0xf6   : > { %1506 = vmatpush.msra.mxu1 %v1505_v1  ;;  %1455 = vmatpush.msra.mxu0 %v8417_v19 }
  0xf7   : > { %1411 = vmatpush.msrb.mxu2 %v1318_v55  ;;  %1434 = vmatpush.msrb.mxu3 %v8408_v16 }
  0xf8   : > { %1353 = vmatmul.f32.vlgmr.msrb.gmra.mxu0 %v8401_v14  ;;  %1508 = vmatmul.f32.vlgmr.msra.gmra.mxu1 %v8387_v4 }
  0xf9   : > { %1615 = vmatpush.msrb.mxu1 %v8417_v19  ;;  %1436 = vmatpush.msrb.mxu3 %v8425_v23 }
  0xfa   : > { %1413 = vmatmul.f32.vlgmr.msrb.gmra.mxu2 %v8387_v4  ;;  %1457 = vmatpush.msra.mxu0 %v8438_v27 }
  0xfb   : > { %1526 = vmatpush.msra.mxu2 %v8445_v37  ;;  %1617 = vmatpush.msrb.mxu1 %v8438_v27 }
  0xfc   : > { %1438 = vmatmul.f32.vlgmr.msrb.gmra.mxu3 %v8387_v4  ;;  %1459 = vmatpush.msra.mxu0 %v8455_v41 }
  0xfd   : > { %1529 = vmatpush.msra.mxu2 %v8466_v43  ;;  %1555 = vmatpush.msra.mxu3 %v8417_v19 }
  0xfe   : > { %1619 = vmatpush.msrb.mxu1 %v8455_v41  ;;  %1461 = vmatpush.msra.mxu0 %v8474_v51 }
  0xff   : > { %1532 = vmatpush.msra.mxu2 %v8481_v57  ;;  %1557 = vmatpush.msra.mxu3 %v8438_v27 }
 0x100   : > { %1621 = vmatpush.msrb.mxu1 %v8474_v51  ;;  %1467 = vmatmul.f32.vlgmr.msra.gmra.mxu0 %v8440_v33 }
 0x101   : > { %1623 = vmatmul.f32.vlgmr.msrb.gmra.mxu1 %v8387_v4  ;;  %1535 = vmatpush.msra.mxu2 %v8496_v60 }
 0x102   : > { %1559 = vmatpush.msra.mxu3 %v8455_v41  ;;  %1584 = vmatpush.msrb.mxu0 %v1485_v48  ;;  %v7818_v41 = vld [vmem:[%s9858_s4 + $0x3] ss:$0 sm:$0xff] }
 0x103   : > { %1538 = vmatmul.f32.vlgmr.msra.gmra.mxu2 %v8401_v14 }
 0x104   : > { %1561 = vmatpush.msra.mxu3 %v8474_v51  ;;  %1588 = vmatpush.msrb.mxu0 %v1491_v45 }
 0x105   : > { %1565 = vmatmul.f32.vlgmr.msra.gmra.mxu3 %v8412_v17 }
 0x106   : > { %1592 = vmatpush.msrb.mxu0 %v1497_v49 }
 0x108   : > { %1596 = vmatpush.msrb.mxu0 %v1503_v61 }
 0x109   : > { %1598 = vmatmul.f32.vlgmr.msrb.gmra.mxu0 %v8387_v4 }
 0x155   : > { %v954_v2 = vpop.f32.mrf.mxu1 }
 0x15d   : > { %v913_v7 = vpop.f32.mrf.mxu0  ;;  %v984_v8 = vpop.f32.mrf.mxu2 }
 0x15e   : > { %v914_v12 = vadd.f32 %v7815_v6, %v913_v7  ;;  %v1139_v30 = vpop.f32.mrf.mxu1 }
 0x15f   : > { %v1011_v13 = vpop.f32.mrf.mxu3 }
 0x160   : > { %v955_v21 = vadd.f32 %v954_v2, %v914_v12 }
 0x162   : > { %v985_v29 = vadd.f32 %v984_v8, %v955_v21 }
 0x164   : > { %v1012_v31 = vadd.f32 %v1011_v13, %v985_v29 }
 0x165   : > { %v1044_v35 = vpop.f32.mrf.mxu2  ;;  %v1098_v3 = vpop.f32.mrf.mxu0 }
 0x166   : > { %v1045_v4 = vadd.f32 %v1044_v35, %v1012_v31  ;;  %v1099_v9 = vadd.f32 %v7816_v34, %v1098_v3  ;;  %v1254_v16 = vpop.f32.mrf.mxu1 }
 0x167   : > { %v1069_v5 = vpop.f32.mrf.mxu3 }
 0x168   : > { %v8573_v10 = vadd.f32 %v1069_v5, %v1045_v4  ;;  %v1140_v11 = vadd.f32 %v1139_v30, %v1099_v9 }
 0x16a   : > { %1628 = vrot.lane.b32.xlu0 %v8573_v10, %s7955_s18  ;;  %v1631_v49 = vsel %vm1630_vm2, %v8573_v10, 0 }
 0x16b   : > { %v1652_v50 = vand.u32 4294901760, %v1631_v49 }
 0x16d   : > { %v1169_v14 = vpop.f32.mrf.mxu2  ;;  %v1229_v15 = vpop.f32.mrf.mxu0  ;;  %v1653_v52 = vsub.f32 %v1631_v49, %v1652_v50 }
 0x16e   : > { %v1170_v17 = vadd.f32 %v1169_v14, %v1140_v11  ;;  %v1381_v33 = vpop.f32.mrf.mxu1 }
 0x16f   : > { %v1196_v18 = vpop.f32.mrf.mxu3  ;;  %v1654_v56 = vand.u32 4294901760, %v1653_v52 }
 0x170   : > { %v1197_v19 = vadd.f32 %v1196_v18, %v1170_v17 }
 0x171   : > { %v1655_v63 = vsub.f32 %v1653_v52, %v1654_v56 }
 0x172   : > { %v1230_v20 = vadd.f32 %v1229_v15, %v1197_v19 }
 0x173   : > { %v1656_v6 = vand.u32 4294901760, %v1655_v63 }
 0x174   : > { %v8580_v23 = vadd.f32 %v1254_v16, %v1230_v20 }
 0x175   : > { %v1283_v24 = vpop.f32.mrf.mxu2  ;;  %v1354_v25 = vpop.f32.mrf.mxu0 }
 0x176   : > { %v1284_v26 = vadd.f32 %v7817_v22, %v1283_v24  ;;  %1782 = vrot.lane.b32.xlu0 %v8580_v23, %s7955_s18  ;;  %v1509_v51 = vpop.f32.mrf.mxu1  ;;  %v1784_v61 = vsel %vm1630_vm2, %v8580_v23, 0 }
 0x177   : > { %v1324_v27 = vpop.f32.mrf.mxu3  ;;  %v8599_v54 = vand.u32 4294901760, %v1784_v61 }
 0x178   : > { %v1325_v36 = vadd.f32 %v1324_v27, %v1284_v26 }
 0x179   : > { %v1806_v2 = vsub.f32 %v1784_v61, %v8599_v54 }
 0x17a   : > { %v1355_v37 = vadd.f32 %v1354_v25, %v1325_v36 }
 0x17b   : > { %v1807_v12 = vand.u32 4294901760, %v1806_v2 }
 0x17c   : > { %v1382_v28 = vadd.f32 %v1381_v33, %v1355_v37 }
 0x17d   : > { %v1414_v38 = vpop.f32.mrf.mxu2  ;;  %v1468_v39 = vpop.f32.mrf.mxu0  ;;  %v1808_v34 = vsub.f32 %v1806_v2, %v1807_v12 }
 0x17e   : > { %v1415_v42 = vadd.f32 %v1414_v38, %v1382_v28  ;;  %v1469_v48 = vadd.f32 %v7818_v41, %v1468_v39  ;;  %v1624_v60 = vpop.f32.mrf.mxu1 }
 0x17f   : > { %v1439_v43 = vpop.f32.mrf.mxu3  ;;  %v1809_v5 = vand.u32 4294901760, %v1808_v34 }
 0x180   : > { %v8587_v47 = vadd.f32 %v1439_v43, %v1415_v42  ;;  %v1510_v53 = vadd.f32 %v1509_v51, %v1469_v48 }
 0x182   : > { %1935 = vrot.lane.b32.xlu1 %v8587_v47, %s7955_s18  ;;  %v1937_v13 = vsel %vm1630_vm2, %v8587_v47, 0 }
 0x183   : > { %v8605_v30 = vand.u32 4294901760, %v1937_v13 }
 0x185   : > { %v1959_v4 = vsub.f32 %v1937_v13, %v8605_v30 }
 0x186   : > { %v1539_v55 = vpop.f32.mrf.mxu2  ;;  %v1599_v46 = vpop.f32.mrf.mxu0 }
 0x187   : > { %v1540_v57 = vadd.f32 %v1539_v55, %v1510_v53  ;;  %v1960_v14 = vand.u32 4294901760, %v1959_v4 }
 0x188   : > { %v1566_v40 = vpop.f32.mrf.mxu3 }
 0x189   : > { %v1567_v45 = vadd.f32 %v1566_v40, %v1540_v57  ;;  %v1961_v19 = vsub.f32 %v1959_v4, %v1960_v14 }
 0x18b   : > { %v1600_v59 = vadd.f32 %v1599_v46, %v1567_v45  ;;  %v1962_v25 = vand.u32 4294901760, %v1961_v19 }
 0x18d   : > { %v8591_v44 = vadd.f32 %v1624_v60, %v1600_v59 }
 0x18f   : > { %2088 = vrot.lane.b32.xlu1 %v8591_v44, %s7955_s18  ;;  %v2090_v16 = vsel %vm1630_vm2, %v8591_v44, 0 }
 0x190   : > { %v2111_v20 = vand.u32 4294901760, %v2090_v16 }
 0x192   : > { %v2112_v26 = vsub.f32 %v2090_v16, %v2111_v20 }
 0x194   : > { %v2113_v37 = vand.u32 4294901760, %v2112_v26 }
 0x196   : > { %v2114_v41 = vsub.f32 %v2112_v26, %v2113_v37 }
 0x198   : > { %v2115_v43 = vand.u32 4294901760, %v2114_v41 }
 0x1dc   : > { %v1629_v62 = vpop.permute.xlu0 %1628 }
 0x1dd   : > { %v1633_v58 = vsel %vm1630_vm2, %v1629_v62, 0 }
 0x1de   : > { %v1650_v0 = vand.u32 4294901760, %v1633_v58 }
 0x1e0   : > { %v1677_v1 = vsub.f32 %v1633_v58, %v1650_v0  ;;  %1651 = vmatpush.xpose.msrb.mxu2 %v1650_v0  ;;  %1727 = vmatpush.xpose.msra.mxu1 %v1650_v0 }
 0x1e2   : > { %v1678_v7 = vand.u32 4294901760, %v1677_v1  ;;  %1704 = vmatpush.xpose.msra.mxu0 %v1677_v1 }
 0x1e3   : > { %1657 = vmatmul.f32.vlgmr.msrb.gmra.mxu2 %v1656_v6  ;;  %1731 = vmatmul.f32.vlgmr.msra.gmra.mxu1 %v1654_v56 }
 0x1e4   : > { %v1679_v8 = vsub.f32 %v1677_v1, %v1678_v7  ;;  %1753 = vmatpush.xpose.msra.mxu2 %v1678_v7 }
 0x1e5   : > { %1707 = vmatmul.f32.vlgmr.msra.gmra.mxu0 %v1653_v52 }
 0x1e6   : > { %v1680_v21 = vand.u32 4294901760, %v1679_v8 }
 0x1e8   : > { %1681 = vmatpush.xpose.msrb.mxu3 %v1680_v21  ;;  %v1783_v29 = vpop.permute.xlu0 %1782 }
 0x1e9   : > { %v1786_v31 = vsel %vm1630_vm2, %v1783_v29, 0 }
 0x1ea   : > { %v1803_v35 = vand.u32 4294901760, %v1786_v31 }
 0x1eb   : > { %1683 = vmatmul.f32.vlgmr.msrb.gmra.mxu3 %v1652_v50  ;;  %1755 = vmatmul.f32.vlgmr.msra.gmra.mxu2 %v1652_v50 }
 0x1ec   : > { %1775 = vmatpush.xpose.msra.mxu3 %v1650_v0  ;;  %v1830_v3 = vsub.f32 %v1786_v31, %v1803_v35  ;;  %1804 = vmatpush.xpose.msrb.mxu0 %v1803_v35 }
 0x1ee   : > { %v1831_v9 = vand.u32 4294901760, %v1830_v3  ;;  %1857 = vmatpush.xpose.msrb.mxu2 %v1830_v3 }
 0x1ef   : > { %1810 = vmatmul.f32.vlgmr.msrb.gmra.mxu0 %v1809_v5 }
 0x1f0   : > { %1880 = vmatpush.xpose.msrb.mxu3 %v1803_v35  ;;  %v1832_v11 = vsub.f32 %v1830_v3, %v1831_v9  ;;  %1906 = vmatpush.xpose.msra.mxu0 %v1831_v9 }
 0x1f2   : > { %v1833_v15 = vand.u32 4294901760, %v1832_v11 }
 0x1f3   : > { %1777 = vmatmul.f32.vlgmr.msra.gmra.mxu3 %v1652_v50  ;;  %1860 = vmatmul.f32.vlgmr.msrb.gmra.mxu2 %v1806_v2 }
 0x1f4   : > { %v1936_v17 = vpop.permute.xlu1 %1935  ;;  %1834 = vmatpush.xpose.msrb.mxu1 %v1833_v15 }
 0x1f5   : > { %v1939_v18 = vsel %vm1630_vm2, %v1936_v17, 0 }
 0x1f6   : > { %v1956_v22 = vand.u32 4294901760, %v1939_v18 }
 0x1f7   : > { %1836 = vmatmul.f32.vlgmr.msrb.gmra.mxu1 %v8599_v54  ;;  %1908 = vmatmul.f32.vlgmr.msra.gmra.mxu0 %v8599_v54 }
 0x1f8   : > { %1928 = vmatpush.xpose.msra.mxu1 %v1803_v35  ;;  %v1983_v24 = vsub.f32 %v1939_v18, %v1956_v22  ;;  %1957 = vmatpush.xpose.msra.mxu2 %v1956_v22 }
 0x1fa   : > { %v1984_v27 = vand.u32 4294901760, %v1983_v24  ;;  %2010 = vmatpush.xpose.msrb.mxu0 %v1983_v24 }
 0x1fb   : > { %1884 = vmatmul.f32.vlgmr.msrb.gmra.mxu3 %v1807_v12  ;;  %1963 = vmatmul.f32.vlgmr.msra.gmra.mxu2 %v1962_v25 }
 0x1fc   : > { %2033 = vmatpush.xpose.msrb.mxu1 %v1956_v22  ;;  %v1985_v33 = vsub.f32 %v1983_v24, %v1984_v27  ;;  %2059 = vmatpush.xpose.msrb.mxu2 %v1984_v27 }
 0x1fe   : > { %v1986_v36 = vand.u32 4294901760, %v1985_v33 }
 0x1ff   : > { %1930 = vmatmul.f32.vlgmr.msra.gmra.mxu1 %v8599_v54  ;;  %2013 = vmatmul.f32.vlgmr.msrb.gmra.mxu0 %v1959_v4 }
 0x200   : > { %1987 = vmatpush.xpose.msra.mxu3 %v1986_v36 }
 0x201   : > { %v2089_v28 = vpop.permute.xlu1 %2088 }
 0x202   : > { %v2092_v38 = vsel %vm1630_vm2, %v2089_v28, 0 }
 0x203   : > { %v2109_v42 = vand.u32 4294901760, %v2092_v38  ;;  %1989 = vmatmul.f32.vlgmr.msra.gmra.mxu3 %v8605_v30  ;;  %2061 = vmatmul.f32.vlgmr.msrb.gmra.mxu2 %v8605_v30 }
 0x204   : > { %2081 = vmatpush.xpose.msrb.mxu3 %v1956_v22 }
 0x205   : > { %v2136_v39 = vsub.f32 %v2092_v38, %v2109_v42  ;;  %2110 = vmatpush.xpose.msra.mxu0 %v2109_v42 }
 0x207   : > { %v2137_v48 = vand.u32 4294901760, %v2136_v39  ;;  %2163 = vmatpush.xpose.msra.mxu2 %v2136_v39  ;;  %2037 = vmatmul.f32.vlgmr.msrb.gmra.mxu1 %v1960_v14 }
 0x208   : > { %2186 = vmatpush.xpose.msra.mxu3 %v2109_v42  ;;  %2116 = vmatmul.f32.vlgmr.msra.gmra.mxu0 %v2115_v43 }
 0x209   : > { %v2138_v51 = vsub.f32 %v2136_v39, %v2137_v48  ;;  %2212 = vmatpush.xpose.msrb.mxu0 %v2137_v48 }
 0x20b   : > { %v2139_v53 = vand.u32 4294901760, %v2138_v51  ;;  %2083 = vmatmul.f32.vlgmr.msrb.gmra.mxu3 %v8605_v30  ;;  %2166 = vmatmul.f32.vlgmr.msra.gmra.mxu2 %v2112_v26 }
 0x20d   : > { %2140 = vmatpush.xpose.msra.mxu1 %v2139_v53 }
 0x210   : > { %2142 = vmatmul.f32.vlgmr.msra.gmra.mxu1 %v2111_v20  ;;  %2214 = vmatmul.f32.vlgmr.msrb.gmra.mxu0 %v2111_v20 }
 0x211   : > { %2234 = vmatpush.xpose.msrb.mxu1 %v2109_v42 }
 0x213   : > { %2190 = vmatmul.f32.vlgmr.msra.gmra.mxu3 %v2113_v37 }
 0x218   : > { %2236 = vmatmul.f32.vlgmr.msrb.gmra.mxu1 %v2111_v20 }
 0x260   : > { %v1732_v40 = vpop.f32.mrf.mxu1 }
 0x262   : > { %v1708_v57 = vpop.f32.mrf.mxu0 }
 0x266   : > { %v1658_v55 = vpop.f32.mrf.mxu2 }
 0x26c   : > { %v1811_v59 = vpop.f32.mrf.mxu0 }
 0x26e   : > { %v1684_v45 = vpop.f32.mrf.mxu3  ;;  %v1756_v46 = vpop.f32.mrf.mxu2 }
 0x26f   : > { %v1685_v60 = vadd.f32 %v1684_v45, %v1658_v55 }
 0x271   : > { %v1709_v49 = vadd.f32 %v1708_v57, %v1685_v60 }
 0x273   : > { %v1733_v50 = vadd.f32 %v1732_v40, %v1709_v49 }
 0x274   : > { %v1837_v52 = vpop.f32.mrf.mxu1  ;;  %v1909_v63 = vpop.f32.mrf.mxu0 }
 0x275   : > { %v1757_v56 = vadd.f32 %v1756_v46, %v1733_v50  ;;  %v1838_v58 = vadd.f32 %v1837_v52, %v1811_v59 }
 0x276   : > { %v1778_v61 = vpop.f32.mrf.mxu3  ;;  %v1861_v62 = vpop.f32.mrf.mxu2 }
 0x277   : > { %v1779_v54 = vadd.f32 %v1778_v61, %v1757_v56  ;;  %v1862_v2 = vadd.f32 %v1861_v62, %v1838_v58 }
 0x279   : > { %v2240_v0 = vsel %vm1630_vm2, %v1779_v54, -inf }
 0x27a   : > { %2241 = vmax.xlane.f32.xlu2 %v2240_v0 }
 0x27c   : > { %v1931_v1 = vpop.f32.mrf.mxu1  ;;  %v2014_v13 = vpop.f32.mrf.mxu0 }
 0x27e   : > { %v1885_v6 = vpop.f32.mrf.mxu3  ;;  %v1964_v7 = vpop.f32.mrf.mxu2 }
 0x27f   : > { %v1886_v8 = vadd.f32 %v1885_v6, %v1862_v2 }
 0x281   : > { %v1910_v12 = vadd.f32 %v1909_v63, %v1886_v8 }
 0x283   : > { %v1932_v21 = vadd.f32 %v1931_v1, %v1910_v12 }
 0x284   : > { %v2038_v29 = vpop.f32.mrf.mxu1 }
 0x285   : > { %v2243_v30 = vsel %vm1630_vm2, %v1932_v21, -inf  ;;  %v2117_v5 = vpop.f32.mrf.mxu0 }
 0x286   : > { %v1990_v31 = vpop.f32.mrf.mxu3  ;;  %2244 = vmax.xlane.f32.xlu2 %v2243_v30  ;;  %v2062_v35 = vpop.f32.mrf.mxu2 }
 0x287   : > { %v1991_v34 = vadd.f32 %v1990_v31, %v1964_v7 }
 0x289   : > { %v2015_v3 = vadd.f32 %v2014_v13, %v1991_v34 }
 0x28b   : > { %v2039_v4 = vadd.f32 %v2038_v29, %v2015_v3 }
 0x28d   : > { %v2063_v9 = vadd.f32 %v2062_v35, %v2039_v4  ;;  %v2143_v11 = vpop.f32.mrf.mxu1  ;;  %v2215_v24 = vpop.f32.mrf.mxu0 }
 0x28e   : > { %v2084_v14 = vpop.f32.mrf.mxu3  ;;  %v2144_v16 = vadd.f32 %v2143_v11, %v2117_v5  ;;  %v2167_v18 = vpop.f32.mrf.mxu2 }
 0x28f   : > { %v2085_v15 = vadd.f32 %v2084_v14, %v2063_v9 }
 0x290   : > { %v2168_v19 = vadd.f32 %v2167_v18, %v2144_v16 }
 0x291   : > { %v2246_v17 = vsel %vm1630_vm2, %v2085_v15, -inf }
 0x292   : > { %2247 = vmax.xlane.f32.xlu0 %v2246_v17 }
 0x295   : > { %v2237_v26 = vpop.f32.mrf.mxu1 }
 0x296   : > { %v2191_v20 = vpop.f32.mrf.mxu3 }
 0x297   : > { %v2192_v22 = vadd.f32 %v2191_v20, %v2168_v19 }
 0x299   : > { %v2216_v25 = vadd.f32 %v2215_v24, %v2192_v22 }
 0x29b   : > { %v2238_v27 = vadd.f32 %v2237_v26, %v2216_v25 }
 0x29d   : > { %v2249_v33 = vsel %vm1630_vm2, %v2238_v27, -inf }
 0x29e   : > { %2250 = vmax.xlane.f32.xlu1 %v2249_v33 }
 0x2a6   : > { %2488 = vrot.lane.b32.xlu0 %v8580_v23, %s7956_s23 }
 0x2b7   : > { %2640 = vrot.lane.b32.xlu1 %v8587_v47, %s7956_s23 }
 0x2bf   : > { %2792 = vrot.lane.b32.xlu1 %v8591_v44, %s7956_s23 }
 0x2ed   : > { %v2242_v36 = vpop.xlane.xlu2 %2241 }
 0x2ee   : > { %v2252_v37 = vsub.f32 %v1779_v54, %v2242_v36 }
 0x2f0   : > { %v2256_v28 = vmul.f32 1.442695, %v2252_v37 }
 0x2f2   : > { %7839 = vpow2.f32 %v2256_v28 }
 0x2f8   : > { %v7840_v38 = vpop.eup %7839 }
 0x2f9   : > { %v2264_v41 = vsel %vm1630_vm2, %v7840_v38, 0.0  ;;  %v2245_v44 = vpop.xlane.xlu2 %2244 }
 0x2fa   : > { %2265 = vadd.xlane.f32.xlu2 %v2264_v41  ;;  %v2253_v48 = vsub.f32 %v1932_v21, %v2245_v44 }
 0x2fc   : > { %v2258_v51 = vmul.f32 1.442695, %v2253_v48 }
 0x305   : > { %v2248_v53 = vpop.xlane.xlu0 %2247 }
 0x306   : > { %v2254_v55 = vsub.f32 %v2085_v15, %v2248_v53 }
 0x308   : > { %v2260_v57 = vmul.f32 1.442695, %v2254_v55 }
 0x311   : > { %v2251_v42 = vpop.xlane.xlu1 %2250 }
 0x312   : > { %v2255_v39 = vsub.f32 %v2238_v27, %v2251_v42  ;;  %2336 = vrot.lane.b32.xlu2 %v8573_v10, %s7956_s23 }
 0x314   : > { %v2262_v23 = vmul.f32 1.442695, %v2255_v39 }
 0x316   : > { %7841 = vpow2.f32 %v2262_v23 }
 0x317   : > { %7843 = vpow2.f32 %v2258_v51 }
 0x318   : > { %7845 = vpow2.f32 %v2260_v57  ;;  %v2489_v59 = vpop.permute.xlu0 %2488 }
 0x319   : > { %v2509_v60 = vand.u32 4294901760, %v2489_v59 }
 0x31b   : > { %v2536_v49 = vsub.f32 %v2489_v59, %v2509_v60 }
 0x31c   : > { %v8632_v43 = vpop.eup %7841 }
 0x31d   : > { %v2273_v47 = vsel %vm1630_vm2, %v8632_v43, 0.0  ;;  %v8636_v40 = vpop.eup %7843  ;;  %v2537_v52 = vand.u32 4294901760, %v2536_v49 }
 0x31e   : > { %2274 = vadd.xlane.f32.xlu0 %v2273_v47  ;;  %v2267_v10 = vsel %vm1630_vm2, %v8636_v40, 0.0  ;;  %v8640_v45 = vpop.eup %7845 }
 0x31f   : > { %v2270_v46 = vsel %vm1630_vm2, %v8640_v45, 0.0  ;;  %v2538_v56 = vsub.f32 %v2536_v49, %v2537_v52 }
 0x321   : > { %v2539_v63 = vand.u32 4294901760, %v2538_v56 }
 0x329   : > { %v2641_v1 = vpop.permute.xlu1 %2640 }
 0x32a   : > { %v8644_v13 = vand.u32 4294901760, %v2641_v1 }
 0x32c   : > { %v8647_v3 = vsub.f32 %v2641_v1, %v8644_v13 }
 0x32e   : > { %v2689_v11 = vand.u32 4294901760, %v8647_v3 }
 0x330   : > { %v2690_v16 = vsub.f32 %v8647_v3, %v2689_v11 }
 0x331   : > { %v2793_v37 = vpop.permute.xlu1 %2792 }
 0x332   : > { %v2691_v19 = vand.u32 4294901760, %v2690_v16  ;;  %v8655_v39 = vand.u32 4294901760, %v2793_v37 }
 0x334   : > { %v8658_v57 = vsub.f32 %v2793_v37, %v8655_v39 }
 0x33b   : > { %2268 = vadd.xlane.f32.xlu2 %v2267_v10 }
 0x343   : > { %2271 = vadd.xlane.f32.xlu2 %v2270_v46 }
 0x36d   : > { %v2266_v50 = vpop.xlane.xlu2 %2265 }
 0x36e   : > { %7847 = vrcp.f32 %v2266_v50  ;;  %v2287_v2 = vand.u32 2147483648, %v2266_v50  ;;  %v2285_v8 = vand.u32 2147483647, %v2266_v50  ;;  %vm2281_vm4 = vweird.f32 %v2266_v50 }
 0x370   : > { %v2288_v29 = vor.u32 1.1754944e-38, %v2287_v2  ;;  %vm2286_vm6 = vcmp.eq.f32.partialorder %v2285_v8, 8.507059e+37 }
 0x374   : > { %v7848_v61 = vpop.eup %7847 }
 0x375   : > { %v2277_v62 = vmul.f32 %v7848_v61, %v2266_v50  ;;  %v2337_v54 = vpop.permute.xlu2 %2336  ;;  %vm2282_vm3 = vweird.f32 %v7848_v61 }
 0x376   : > { %v2357_v58 = vand.u32 4294901760, %v2337_v54  ;;  %vm2283_vm5 = vmor %vm2281_vm4, %vm2282_vm3 }
 0x377   : > { %v2278_v0 = vsub.f32 1.0, %v2277_v62  ;;  %v2841_v62 = vand.u32 4294901760, %v8658_v57 }
 0x378   : > { %v2384_v6 = vsub.f32 %v2337_v54, %v2357_v58  ;;  %2358 = vmatpush.msrb.mxu2 %v2357_v58  ;;  %2434 = vmatpush.msra.mxu1 %v2357_v58 }
 0x379   : > { %v2279_v7 = vmul.f32 %v7848_v61, %v2278_v0 }
 0x37a   : > { %2540 = vmatpush.msrb.mxu1 %v2539_v63  ;;  %v2385_v12 = vand.u32 4294901760, %v2384_v6  ;;  %2411 = vmatpush.msra.mxu0 %v2384_v6 }
 0x37b   : > { %v2280_v21 = vadd.f32 %v7848_v61, %v2279_v7 }
 0x37c   : > { %2510 = vmatpush.msrb.mxu0 %v2509_v60  ;;  %v2386_v30 = vsub.f32 %v2384_v6, %v2385_v12  ;;  %2460 = vmatpush.msra.mxu2 %v2385_v12  ;;  %v2842_v12 = vsub.f32 %v8658_v57, %v2841_v62 }
 0x37d   : > { %v2284_v31 = vsel %vm2283_vm5, %v7848_v61, %v2280_v21 }
 0x37e   : > { %v2289_v34 = vsel %vm2286_vm6, %v2288_v29, %v2284_v31  ;;  %v2387_v35 = vand.u32 4294901760, %v2386_v30 }
 0x37f   : > { %v2290_v4 = vmul.f32 %v7840_v38, %v2289_v34 }
 0x380   : > { %2388 = vmatpush.msrb.mxu3 %v2387_v35 }
 0x381   : > { %v2340_v5 = vsel %vm1630_vm2, %v2290_v4, 0  ;;  %v2843_v4 = vand.u32 4294901760, %v2842_v12 }
 0x382   : > { %2482 = vmatpush.msra.mxu3 %v2357_v58  ;;  %v2359_v9 = vand.u32 4294901760, %v2340_v5 }
 0x384   : > { %2390 = vmatmul.f32.vlgmr.msrb.gmra.mxu3 %v2359_v9  ;;  %v2360_v14 = vsub.f32 %v2340_v5, %v2359_v9 }
 0x385   : > { %2586 = vmatpush.msrb.mxu3 %v2509_v60 }
 0x386   : > { %2414 = vmatmul.f32.vlgmr.msra.gmra.mxu0 %v2360_v14  ;;  %v2361_v15 = vand.u32 4294901760, %v2360_v14 }
 0x387   : > { %2612 = vmatpush.msra.mxu0 %v2537_v52 }
 0x388   : > { %2438 = vmatmul.f32.vlgmr.msra.gmra.mxu1 %v2361_v15  ;;  %v2362_v17 = vsub.f32 %v2360_v14, %v2361_v15 }
 0x389   : > { %2634 = vmatpush.msra.mxu1 %v2509_v60 }
 0x38a   : > { %v2363_v18 = vand.u32 4294901760, %v2362_v17 }
 0x38c   : > { %2364 = vmatmul.f32.vlgmr.msrb.gmra.mxu2 %v2363_v18  ;;  %2484 = vmatmul.f32.vlgmr.msra.gmra.mxu3 %v2359_v9  ;;  %v2944_v18 = vld [vmem:[%s9861_s5] sm:$0xff] }
 0x38d   : > { %2563 = vmatpush.msrb.mxu2 %v2536_v49  ;;  %2692 = vmatpush.msra.mxu3 %v2691_v19  ;;  %v2966_v19 = vand.u32 4294901760, %v2944_v18 }
 0x391   : > { %v2275_v20 = vpop.xlane.xlu0 %2274 }
 0x392   : > { %7849 = vrcp.f32 %v2275_v20  ;;  %vm2326_vm13 = vweird.f32 %v2275_v20  ;;  %v2332_v56 = vand.u32 2147483648, %v2275_v20  ;;  %v2330_v58 = vand.u32 2147483647, %v2275_v20 }
 0x394   : > { %2462 = vmatmul.f32.vlgmr.msra.gmra.mxu2 %v2359_v9  ;;  %v2333_v6 = vor.u32 1.1754944e-38, %v2332_v56  ;;  %vm2331_vm4 = vcmp.eq.f32.partialorder %v2330_v58, 8.507059e+37 }
 0x395   : > { %2662 = vmatpush.msra.mxu2 %v8644_v13 }
 0x398   : > { %v7850_v24 = vpop.eup %7849 }
 0x399   : > { %v2322_v26 = vmul.f32 %v7850_v24, %v2275_v20  ;;  %vm2327_vm11 = vweird.f32 %v7850_v24  ;;  %v2993_v20 = vsub.f32 %v2944_v18, %v2966_v19 }
 0x39a   : > { %vm8663_vm14 = vmor %vm2326_vm13, %vm2327_vm11 }
 0x39b   : > { %v2323_v28 = vsub.f32 1.0, %v2322_v26 }
 0x39d   : > { %v2324_v44 = vmul.f32 %v7850_v24, %v2323_v28 }
 0x39f   : > { %v2325_v59 = vadd.f32 %v7850_v24, %v2324_v44 }
 0x3a1   : > { %v2329_v1 = vsel %vm8663_vm14, %v7850_v24, %v2325_v59 }
 0x3a2   : > { %v2334_v29 = vsel %vm2331_vm4, %v2333_v6, %v2329_v1 }
 0x3a3   : > { %v2335_v5 = vmul.f32 %v8632_v43, %v2334_v29 }
 0x3ae   : > { %v2269_v22 = vpop.xlane.xlu2 %2268 }
 0x3af   : > { %7851 = vrcp.f32 %v2269_v22  ;;  %v2302_v38 = vand.u32 2147483648, %v2269_v22  ;;  %v2300_v42 = vand.u32 2147483647, %v2269_v22  ;;  %vm2296_vm8 = vweird.f32 %v2269_v22 }
 0x3b1   : > { %v2303_v48 = vor.u32 1.1754944e-38, %v2302_v38  ;;  %vm2301_vm10 = vcmp.eq.f32.partialorder %v2300_v42, 8.507059e+37 }
 0x3b5   : > { %v7852_v25 = vpop.eup %7851 }
 0x3b6   : > { %v2292_v27 = vmul.f32 %v7852_v25, %v2269_v22  ;;  %v2272_v33 = vpop.xlane.xlu2 %2271  ;;  %vm2297_vm7 = vweird.f32 %v7852_v25  ;;  %v2994_v22 = vand.u32 4294901760, %v2993_v20 }
 0x3b7   : > { %7853 = vrcp.f32 %v2272_v33  ;;  %vm2298_vm9 = vmor %vm2296_vm8, %vm2297_vm7  ;;  %v2317_v60 = vand.u32 2147483648, %v2272_v33  ;;  %v2315_v50 = vand.u32 2147483647, %v2272_v33  ;;  %vm2311_vm15 = vweird.f32 %v2272_v33 }
 0x3b8   : > { %v2293_v36 = vsub.f32 1.0, %v2292_v27  ;;  %v2995_v24 = vsub.f32 %v2993_v20, %v2994_v22 }
 0x3b9   : > { %vm2316_vm3 = vcmp.eq.f32.partialorder %v2315_v50, 8.507059e+37  ;;  %v2946_v50 = vld [vmem:[%s9861_s5 + $0x10] sm:$0xff] }
 0x3ba   : > { %v2294_v41 = vmul.f32 %v7852_v25, %v2293_v36 }
 0x3bc   : > { %v2295_v23 = vadd.f32 %v7852_v25, %v2294_v41 }
 0x3bd   : > { %v7854_v47 = vpop.eup %7853 }
 0x3be   : > { %v2299_v51 = vsel %vm2298_vm9, %v7852_v25, %v2295_v23  ;;  %v2307_v53 = vmul.f32 %v7854_v47, %v2272_v33  ;;  %vm2312_vm12 = vweird.f32 %v7854_v47  ;;  %v2996_v25 = vand.u32 4294901760, %v2995_v24 }
 0x3bf   : > { %v2304_v55 = vsel %vm2301_vm10, %v2303_v48, %v2299_v51  ;;  %vm2313_vm0 = vmor %vm2311_vm15, %vm2312_vm12 }
 0x3c0   : > { %v2308_v10 = vsub.f32 1.0, %v2307_v53  ;;  %v2305_v46 = vmul.f32 %v8636_v40, %v2304_v55  ;;  %v2318_v40 = vor.u32 1.1754944e-38, %v2317_v60 }
 0x3c2   : > { %v2309_v49 = vmul.f32 %v7854_v47, %v2308_v10  ;;  %v2492_v52 = vsel %vm1630_vm2, %v2305_v46, 0 }
 0x3c3   : > { %v2511_v61 = vand.u32 4294901760, %v2492_v52 }
 0x3c4   : > { %v2310_v63 = vadd.f32 %v7854_v47, %v2309_v49 }
 0x3c5   : > { %2542 = vmatmul.f32.vlgmr.msrb.gmra.mxu1 %v2511_v61  ;;  %v2512_v0 = vsub.f32 %v2492_v52, %v2511_v61  ;;  %v3264_v52 = vand.u32 4294901760, %v2946_v50 }
 0x3c6   : > { %v2314_v2 = vsel %vm2313_vm0, %v7854_v47, %v2310_v63  ;;  %2738 = vmatpush.msrb.mxu1 %v8644_v13 }
 0x3c7   : > { %v2319_v7 = vsel %vm2316_vm3, %v2318_v40, %v2314_v2  ;;  %2566 = vmatmul.f32.vlgmr.msrb.gmra.mxu2 %v2512_v0  ;;  %v2513_v8 = vand.u32 4294901760, %v2512_v0  ;;  %v3291_v56 = vsub.f32 %v2946_v50, %v3264_v52  ;;  %v2947_v2 = vld [vmem:[%s9861_s5 + $0x18] sm:$0xff] }
 0x3c8   : > { %2764 = vmatpush.msrb.mxu2 %v2689_v11  ;;  %v2320_v21 = vmul.f32 %v8640_v45, %v2319_v7  ;;  %v2796_v45 = vsel %vm1630_vm2, %v2335_v5, 0  ;;  %v3413_v7 = vand.u32 4294901760, %v2947_v2 }
 0x3c9   : > { %2590 = vmatmul.f32.vlgmr.msrb.gmra.mxu3 %v2513_v8  ;;  %v2514_v30 = vsub.f32 %v2512_v0, %v2513_v8  ;;  %v2815_v15 = vand.u32 4294901760, %v2796_v45 }
 0x3ca   : > { %2786 = vmatpush.msrb.mxu3 %v8644_v13  ;;  %v2644_v31 = vsel %vm1630_vm2, %v2320_v21, 0 }
 0x3cb   : > { %v2515_v34 = vand.u32 4294901760, %v2514_v30  ;;  %v2663_v35 = vand.u32 4294901760, %v2644_v31  ;;  %v2816_v43 = vsub.f32 %v2796_v45, %v2815_v15  ;;  %v3440_v30 = vsub.f32 %v2947_v2, %v3413_v7 }
 0x3cd   : > { %2516 = vmatmul.f32.vlgmr.msrb.gmra.mxu0 %v2515_v34  ;;  %2636 = vmatmul.f32.vlgmr.msra.gmra.mxu1 %v2511_v61  ;;  %v2664_v9 = vsub.f32 %v2644_v31, %v2663_v35 }
 0x3ce   : > { %2715 = vmatpush.msrb.mxu0 %v8647_v3  ;;  %2844 = vmatpush.msra.mxu1 %v2843_v4  ;;  %v2817_v3 = vand.u32 4294901760, %v2816_v43  ;;  %v3441_v4 = vand.u32 4294901760, %v3440_v30 }
 0x3cf   : > { %v2665_v11 = vand.u32 4294901760, %v2664_v9 }
 0x3d0   : > { %v2818_v16 = vsub.f32 %v2816_v43, %v2817_v3 }
 0x3d1   : > { %2694 = vmatmul.f32.vlgmr.msra.gmra.mxu3 %v2663_v35  ;;  %v2666_v14 = vsub.f32 %v2664_v9, %v2665_v11 }
 0x3d2   : > { %2890 = vmatpush.msra.mxu3 %v8655_v39  ;;  %v2819_v17 = vand.u32 4294901760, %v2818_v16 }
 0x3d3   : > { %v2667_v13 = vand.u32 4294901760, %v2666_v14 }
 0x3d5   : > { %2614 = vmatmul.f32.vlgmr.msra.gmra.mxu0 %v2511_v61  ;;  %2668 = vmatmul.f32.vlgmr.msra.gmra.mxu2 %v2667_v13  ;;  %v3292_v61 = vand.u32 4294901760, %v3291_v56 }
 0x3d6   : > { %2742 = vmatmul.f32.vlgmr.msrb.gmra.mxu1 %v2665_v11  ;;  %2814 = vmatpush.msra.mxu0 %v8655_v39 }
 0x3d7   : > { %2867 = vmatpush.msra.mxu2 %v8658_v57  ;;  %2938 = vmatpush.msrb.mxu1 %v8655_v39  ;;  %v2945_v57 = vld [vmem:[%s9861_s5 + $0x8] sm:$0xff] }
 0x3d8   : > { %v3115_v10 = vand.u32 4294901760, %v2945_v57 }
 0x3d9   : > { %2788 = vmatmul.f32.vlgmr.msrb.gmra.mxu3 %v2663_v35 }
 0x3da   : > { %2997 = vmatpush.msrb.mxu3 %v2996_v25  ;;  %v3142_v46 = vsub.f32 %v2945_v57, %v3115_v10 }
 0x3dc   : > { %v3143_v59 = vand.u32 4294901760, %v3142_v46 }
 0x3dd   : > { %2718 = vmatmul.f32.vlgmr.msrb.gmra.mxu0 %v2664_v9  ;;  %2766 = vmatmul.f32.vlgmr.msrb.gmra.mxu2 %v2663_v35 }
 0x3de   : > { %2846 = vmatmul.f32.vlgmr.msra.gmra.mxu1 %v2815_v15  ;;  %2916 = vmatpush.msrb.mxu0 %v2841_v62  ;;  %v3144_v60 = vsub.f32 %v3142_v46, %v3143_v59  ;;  %v3293_v62 = vsub.f32 %v3291_v56, %v3292_v61 }
 0x3df   : > { %3043 = vmatpush.msra.mxu1 %v2966_v19  ;;  %2967 = vmatpush.msrb.mxu2 %v2966_v19 }
 0x3e0   : > { %v3145_v49 = vand.u32 4294901760, %v3144_v60  ;;  %v3294_v58 = vand.u32 4294901760, %v3293_v62 }
 0x3e1   : > { %2894 = vmatmul.f32.vlgmr.msra.gmra.mxu3 %v2817_v3 }
 0x3e2   : > { %3091 = vmatpush.msra.mxu3 %v2966_v19 }
 0x3e5   : > { %2820 = vmatmul.f32.vlgmr.msra.gmra.mxu0 %v2819_v17  ;;  %2870 = vmatmul.f32.vlgmr.msra.gmra.mxu2 %v2816_v43  ;;  %v3442_v43 = vsub.f32 %v3440_v30, %v3441_v4 }
 0x3e6   : > { %2940 = vmatmul.f32.vlgmr.msrb.gmra.mxu1 %v2815_v15  ;;  %3020 = vmatpush.msra.mxu0 %v2993_v20 }
 0x3e7   : > { %3069 = vmatpush.msra.mxu2 %v2994_v22  ;;  %3146 = vmatpush.msrb.mxu1 %v3145_v49  ;;  %v3443_v18 = vand.u32 4294901760, %v3442_v43 }
 0x3ed   : > { %2918 = vmatmul.f32.vlgmr.msrb.gmra.mxu0 %v2815_v15 }
 0x3ee   : > { %3116 = vmatpush.msrb.mxu0 %v3115_v10 }
 0x403   : > { %v2415_v36 = vpop.f32.mrf.mxu0 }
 0x405   : > { %v2439_v28 = vpop.f32.mrf.mxu1 }
 0x407   : > { %v2391_v26 = vpop.f32.mrf.mxu3 }
 0x40f   : > { %v2365_v27 = vpop.f32.mrf.mxu2  ;;  %v2485_v39 = vpop.f32.mrf.mxu3 }
 0x410   : > { %v2392_v33 = vadd.f32 %v2391_v26, %v2365_v27 }
 0x412   : > { %v2416_v37 = vadd.f32 %v2415_v36, %v2392_v33 }
 0x414   : > { %v2440_v38 = vadd.f32 %v2439_v28, %v2416_v37 }
 0x417   : > { %v2463_v41 = vpop.f32.mrf.mxu2 }
 0x418   : > { %v2464_v42 = vadd.f32 %v2463_v41, %v2440_v38 }
 0x41a   : > { %v2486_v23 = vadd.f32 %v2485_v39, %v2464_v42 }
 0x41c   : > { %v2949_v47 = vsel %vm1630_vm2, %v2486_v23, 0 }
 0x41d   : > { %v2968_v44 = vand.u32 4294901760, %v2949_v47 }
 0x41f   : > { %v2969_v48 = vsub.f32 %v2949_v47, %v2968_v44  ;;  %2999 = vmatmul.f32.vlgmr.msrb.gmra.mxu3 %v2968_v44 }
 0x420   : > { %3192 = vmatpush.msrb.mxu3 %v3115_v10 }
 0x421   : > { %3023 = vmatmul.f32.vlgmr.msra.gmra.mxu0 %v2969_v48  ;;  %v2970_v51 = vand.u32 4294901760, %v2969_v48 }
 0x422   : > { %3218 = vmatpush.msra.mxu0 %v3143_v59 }
 0x423   : > { %3047 = vmatmul.f32.vlgmr.msra.gmra.mxu1 %v2970_v51  ;;  %v2971_v53 = vsub.f32 %v2969_v48, %v2970_v51 }
 0x424   : > { %3240 = vmatpush.msra.mxu1 %v3115_v10 }
 0x425   : > { %v2972_v55 = vand.u32 4294901760, %v2971_v53 }
 0x427   : > { %2973 = vmatmul.f32.vlgmr.msrb.gmra.mxu2 %v2972_v55  ;;  %3093 = vmatmul.f32.vlgmr.msra.gmra.mxu3 %v2968_v44 }
 0x428   : > { %3169 = vmatpush.msrb.mxu2 %v3142_v46  ;;  %3295 = vmatpush.msra.mxu3 %v3294_v58 }
 0x42f   : > { %3071 = vmatmul.f32.vlgmr.msra.gmra.mxu2 %v2968_v44 }
 0x430   : > { %3265 = vmatpush.msra.mxu2 %v3264_v52 }
 0x442   : > { %v2543_v54 = vpop.f32.mrf.mxu1 }
 0x44a   : > { %v2517_v63 = vpop.f32.mrf.mxu0  ;;  %v2567_v0 = vpop.f32.mrf.mxu2 }
 0x44b   : > { %v2544_v40 = vadd.f32 %v2543_v54, %v2517_v63  ;;  %v2637_v8 = vpop.f32.mrf.mxu1 }
 0x44c   : > { %v2591_v1 = vpop.f32.mrf.mxu3 }
 0x44d   : > { %v2568_v6 = vadd.f32 %v2567_v0, %v2544_v40 }
 0x44f   : > { %v2592_v12 = vadd.f32 %v2591_v1, %v2568_v6 }
 0x452   : > { %v2615_v21 = vpop.f32.mrf.mxu0 }
 0x453   : > { %v2616_v29 = vadd.f32 %v2615_v21, %v2592_v12  ;;  %v2743_v14 = vpop.f32.mrf.mxu1 }
 0x454   : > { %v2695_v34 = vpop.f32.mrf.mxu3 }
 0x455   : > { %v2638_v31 = vadd.f32 %v2637_v8, %v2616_v29 }
 0x457   : > { %v3098_v35 = vsel %vm1630_vm2, %v2638_v31, 0 }
 0x458   : > { %v3117_v5 = vand.u32 4294901760, %v3098_v35  ;;  %v2669_v9 = vpop.f32.mrf.mxu2 }
 0x459   : > { %v2696_v11 = vadd.f32 %v2695_v34, %v2669_v9 }
 0x45a   : > { %v3118_v45 = vsub.f32 %v3098_v35, %v3117_v5  ;;  %v2719_v13 = vpop.f32.mrf.mxu0  ;;  %3148 = vmatmul.f32.vlgmr.msrb.gmra.mxu1 %v3117_v5 }
 0x45b   : > { %v2720_v15 = vadd.f32 %v2719_v13, %v2696_v11  ;;  %3341 = vmatpush.msrb.mxu1 %v3264_v52  ;;  %v2847_v27 = vpop.f32.mrf.mxu1 }
 0x45c   : > { %3172 = vmatmul.f32.vlgmr.msrb.gmra.mxu2 %v3118_v45  ;;  %v3119_v3 = vand.u32 4294901760, %v3118_v45  ;;  %v2789_v19 = vpop.f32.mrf.mxu3 }
 0x45d   : > { %3367 = vmatpush.msrb.mxu2 %v3292_v61  ;;  %v2744_v17 = vadd.f32 %v2743_v14, %v2720_v15 }
 0x45e   : > { %3196 = vmatmul.f32.vlgmr.msrb.gmra.mxu3 %v3119_v3  ;;  %v3120_v16 = vsub.f32 %v3118_v45, %v3119_v3 }
 0x45f   : > { %3389 = vmatpush.msrb.mxu3 %v3264_v52 }
 0x460   : > { %v2767_v20 = vpop.f32.mrf.mxu2  ;;  %v3121_v22 = vand.u32 4294901760, %v3120_v16 }
 0x461   : > { %v2768_v24 = vadd.f32 %v2767_v20, %v2744_v17 }
 0x462   : > { %v2821_v25 = vpop.f32.mrf.mxu0  ;;  %3122 = vmatmul.f32.vlgmr.msrb.gmra.mxu0 %v3121_v22  ;;  %3242 = vmatmul.f32.vlgmr.msra.gmra.mxu1 %v3117_v5 }
 0x463   : > { %v2790_v26 = vadd.f32 %v2789_v19, %v2768_v24  ;;  %3318 = vmatpush.msrb.mxu0 %v3291_v56  ;;  %3444 = vmatpush.msra.mxu1 %v3443_v18  ;;  %v2848_v37 = vadd.f32 %v2847_v27, %v2821_v25  ;;  %v2941_v51 = vpop.f32.mrf.mxu1 }
 0x464   : > { %v2895_v42 = vpop.f32.mrf.mxu3 }
 0x465   : > { %v3247_v33 = vsel %vm1630_vm2, %v2790_v26, 0 }
 0x466   : > { %v3266_v36 = vand.u32 4294901760, %v3247_v33 }
 0x468   : > { %v3267_v28 = vsub.f32 %v3247_v33, %v3266_v36  ;;  %v2871_v38 = vpop.f32.mrf.mxu2  ;;  %3297 = vmatmul.f32.vlgmr.msra.gmra.mxu3 %v3266_v36 }
 0x469   : > { %v2872_v41 = vadd.f32 %v2871_v38, %v2848_v37  ;;  %3490 = vmatpush.msra.mxu3 %v3413_v7 }
 0x46a   : > { %3220 = vmatmul.f32.vlgmr.msra.gmra.mxu0 %v3117_v5  ;;  %v3268_v39 = vand.u32 4294901760, %v3267_v28  ;;  %v2919_v47 = vpop.f32.mrf.mxu0 }
 0x46b   : > { %v2896_v23 = vadd.f32 %v2895_v42, %v2872_v41  ;;  %3414 = vmatpush.msra.mxu0 %v3413_v7 }
 0x46c   : > { %3345 = vmatmul.f32.vlgmr.msrb.gmra.mxu1 %v3268_v39  ;;  %v3269_v44 = vsub.f32 %v3267_v28, %v3268_v39  ;;  %v7819_v39 = vld [vmem:[%s9831_s6] ss:$0 sm:$0xff] }
 0x46d   : > { %v2920_v48 = vadd.f32 %v2919_v47, %v2896_v23  ;;  %3538 = vmatpush.msrb.mxu1 %v3413_v7 }
 0x46e   : > { %v3270_v53 = vand.u32 4294901760, %v3269_v44 }
 0x46f   : > { %v2942_v55 = vadd.f32 %v2941_v51, %v2920_v48 }
 0x470   : > { %3271 = vmatmul.f32.vlgmr.msra.gmra.mxu2 %v3270_v53  ;;  %3391 = vmatmul.f32.vlgmr.msrb.gmra.mxu3 %v3266_v36  ;;  %v7957_v53 = vmov 32.0  }
 0x471   : > { %v3396_v57 = vsel %vm1630_vm2, %v2942_v55, 0  ;;  %3467 = vmatpush.msra.mxu2 %v3440_v30  ;;  %7855 = vrcp.f32 %v7957_v53 }
 0x472   : > { %v3415_v10 = vand.u32 4294901760, %v3396_v57  ;;  %3321 = vmatmul.f32.vlgmr.msrb.gmra.mxu0 %v3267_v28 }
 0x473   : > { %3516 = vmatpush.msrb.mxu0 %v3441_v4 }
 0x474   : > { %v3416_v46 = vsub.f32 %v3396_v57, %v3415_v10  ;;  %3446 = vmatmul.f32.vlgmr.msra.gmra.mxu1 %v3415_v10 }
 0x476   : > { %v3417_v59 = vand.u32 4294901760, %v3416_v46 }
 0x477   : > { %v7856_v55 = vpop.eup %7855 }
 0x478   : > { %v3418_v60 = vsub.f32 %v3416_v46, %v3417_v59  ;;  %3369 = vmatmul.f32.vlgmr.msrb.gmra.mxu2 %v3266_v36  ;;  %3494 = vmatmul.f32.vlgmr.msra.gmra.mxu3 %v3417_v59  ;;  %v3563_v57 = vmul.f32 32.0, %v7856_v55  ;;  %vm3567_vm5 = vweird.f32 %v7856_v55 }
 0x47a   : > { %v3419_v49 = vand.u32 4294901760, %v3418_v60 }
 0x47c   : > { %3420 = vmatmul.f32.vlgmr.msra.gmra.mxu0 %v3419_v49  ;;  %3540 = vmatmul.f32.vlgmr.msrb.gmra.mxu1 %v3415_v10 }
 0x480   : > { %3470 = vmatmul.f32.vlgmr.msra.gmra.mxu2 %v3416_v46 }
 0x484   : > { %3518 = vmatmul.f32.vlgmr.msrb.gmra.mxu0 %v3415_v10  ;;  %v3564_v10 = vsub.f32 1.0, %v3563_v57  ;;  %v3844_v57 = vld [vmem:[%s9836_s11 + $0x60] sm:$0xff] }
 0x486   : > { %v3565_v46 = vmul.f32 %v7856_v55, %v3564_v10 }
 0x488   : > { %v3566_v59 = vadd.f32 %v7856_v55, %v3565_v46 }
 0x48a   : > { %v8708_v60 = vsel %vm3567_vm5, %v7856_v55, %v3566_v59 }
 0x49e   : > { %v3024_v52 = vpop.f32.mrf.mxu0 }
 0x4a0   : > { %v3048_v61 = vpop.f32.mrf.mxu1 }
 0x4a2   : > { %v3000_v50 = vpop.f32.mrf.mxu3 }
 0x4aa   : > { %v2974_v56 = vpop.f32.mrf.mxu2  ;;  %v3094_v62 = vpop.f32.mrf.mxu3 }
 0x4ab   : > { %v3001_v29 = vadd.f32 %v3000_v50, %v2974_v56 }
 0x4ad   : > { %v3025_v34 = vadd.f32 %v3024_v52, %v3001_v29 }
 0x4af   : > { %v3049_v45 = vadd.f32 %v3048_v61, %v3025_v34  ;;  %v3599_v61 = vld [vmem:[%s9834_s9 + $0x18] sm:$0xff] }
 0x4b2   : > { %v3072_v58 = vpop.f32.mrf.mxu2 }
 0x4b3   : > { %v3073_v43 = vadd.f32 %v3072_v58, %v3049_v45 }
 0x4b5   : > { %v3095_v19 = vadd.f32 %v3094_v62, %v3073_v43  ;;  %v3619_v62 = vand.u32 4294901760, %v3599_v61 }
 0x4b7   : > { %v3544_v33 = vsel %vm883_vm1, %v3095_v19, 0.0  ;;  %v3649_v58 = vsub.f32 %v3599_v61, %v3619_v62  ;;  %3720 = vmatpush.msra.mxu1 %v3619_v62  ;;  %3620 = vmatpush.msrb.mxu2 %v3619_v62 }
 0x4b9   : > { %3691 = vmatpush.msra.mxu0 %v3649_v58 }
 0x4d7   : > { %v3149_v63 = vpop.f32.mrf.mxu1 }
 0x4df   : > { %v3123_v54 = vpop.f32.mrf.mxu0  ;;  %v3173_v0 = vpop.f32.mrf.mxu2 }
 0x4e0   : > { %v3243_v2 = vpop.f32.mrf.mxu1  ;;  %v3150_v8 = vadd.f32 %v3149_v63, %v3123_v54  ;;  %v3598_v54 = vld [vmem:[%s9834_s9 + $0x10] sm:$0xff] }
 0x4e1   : > { %v3197_v40 = vpop.f32.mrf.mxu3  ;;  %v3621_v63 = vand.u32 4294901760, %v3598_v54 }
 0x4e2   : > { %v3174_v31 = vadd.f32 %v3173_v0, %v3150_v8  ;;  %v3650_v0 = vand.u32 4294901760, %v3649_v58 }
 0x4e3   : > { %3722 = vmatpush.msra.mxu1 %v3621_v63  ;;  %3622 = vmatpush.msrb.mxu2 %v3621_v63 }
 0x4e4   : > { %v3198_v9 = vadd.f32 %v3197_v40, %v3174_v31  ;;  %v3597_v40 = vld [vmem:[%s9834_s9 + $0x8] sm:$0xff] }
 0x4e7   : > { %v3221_v1 = vpop.f32.mrf.mxu0 }
 0x4e8   : > { %v3222_v14 = vadd.f32 %v3221_v1, %v3198_v9  ;;  %v3655_v1 = vsub.f32 %v3598_v54, %v3621_v63  ;;  %v3842_v54 = vld [vmem:[%s9836_s11 + $0x50] sm:$0xff] }
 0x4e9   : > { %v3346_v12 = vpop.f32.mrf.mxu1 }
 0x4ea   : > { %v3244_v16 = vadd.f32 %v3243_v2, %v3222_v14  ;;  %v3623_v2 = vand.u32 4294901760, %v3597_v40  ;;  %v3656_v8 = vand.u32 4294901760, %v3655_v1  ;;  %3694 = vmatpush.msra.mxu0 %v3655_v1 }
 0x4eb   : > { %v3298_v6 = vpop.f32.mrf.mxu3 }
 0x4ec   : > { %v3545_v25 = vsel %vm883_vm1, %v3244_v16, 0.0  ;;  %3724 = vmatpush.msra.mxu1 %v3623_v2  ;;  %3624 = vmatpush.msrb.mxu2 %v3623_v2 }
 0x4ed   : > { %v3546_v28 = vadd.f32 %v3545_v25, %v3544_v33 }
 0x4ef   : > { %v3322_v21 = vpop.f32.mrf.mxu0 }
 0x4f1   : > { %v3447_v15 = vpop.f32.mrf.mxu1 }
 0x4f3   : > { %v3272_v7 = vpop.f32.mrf.mxu2  ;;  %v3392_v4 = vpop.f32.mrf.mxu3 }
 0x4f4   : > { %v3299_v30 = vadd.f32 %v3298_v6, %v3272_v7  ;;  %v3596_v6 = vld [vmem:[%s9834_s9] sm:$0xff]  ;;  %v3651_v7 = vsub.f32 %v3649_v58, %v3650_v0 }
 0x4f6   : > { %v3323_v35 = vadd.f32 %v3322_v21, %v3299_v30  ;;  %v3625_v21 = vand.u32 4294901760, %v3596_v6  ;;  %v3652_v29 = vand.u32 4294901760, %v3651_v7  ;;  %v3657_v30 = vsub.f32 %v3655_v1, %v3656_v8 }
 0x4f8   : > { %v3347_v13 = vadd.f32 %v3346_v12, %v3323_v35  ;;  %v3661_v12 = vsub.f32 %v3597_v40, %v3623_v2  ;;  %v3667_v34 = vsub.f32 %v3596_v6, %v3625_v21  ;;  %3726 = vmatpush.msra.mxu1 %v3625_v21  ;;  %3626 = vmatpush.msrb.mxu2 %v3625_v21  ;;  %v3658_v35 = vand.u32 4294901760, %v3657_v30 }
 0x4f9   : > { %v3421_v11 = vpop.f32.mrf.mxu0  ;;  %v3541_v38 = vpop.f32.mrf.mxu1  ;;  %3653 = vmatpush.msrb.mxu3 %v3652_v29  ;;  %v3840_v29 = vld [vmem:[%s9836_s11 + $0x40] sm:$0xff] }
 0x4fa   : > { %v3448_v17 = vadd.f32 %v3447_v15, %v3421_v11  ;;  %v3662_v31 = vand.u32 4294901760, %v3661_v12  ;;  %3697 = vmatpush.msra.mxu0 %v3661_v12  ;;  %3749 = vmatpush.msra.mxu2 %v3650_v0  ;;  %v8804_v0 = vand.u32 4294901760, %v3842_v54 }
 0x4fb   : > { %v3370_v5 = vpop.f32.mrf.mxu2  ;;  %v3495_v24 = vpop.f32.mrf.mxu3  ;;  %3659 = vmatpush.msrb.mxu3 %v3658_v35  ;;  %v8833_v35 = vand.u32 4294901760, %v3840_v29 }
 0x4fc   : > { %v3371_v3 = vadd.f32 %v3370_v5, %v3347_v13  ;;  %v3668_v5 = vand.u32 4294901760, %v3667_v34  ;;  %3700 = vmatpush.msra.mxu0 %v3667_v34  ;;  %3753 = vmatpush.msra.mxu2 %v3656_v8  ;;  %v8819_v8 = vsub.f32 %v3842_v54, %v8804_v0 }
 0x4fe   : > { %v3393_v20 = vadd.f32 %v3392_v4, %v3371_v3  ;;  %v3663_v4 = vsub.f32 %v3661_v12, %v3662_v31  ;;  %v3669_v11 = vsub.f32 %v3667_v34, %v3668_v5  ;;  %3757 = vmatpush.msra.mxu2 %v3662_v31  ;;  %v3925_v31 = vand.u32 4294901760, %v8819_v8 }
 0x500   : > { %v3547_v36 = vsel %vm883_vm1, %v3393_v20, 0.0  ;;  %v3664_v9 = vand.u32 4294901760, %v3663_v4  ;;  %v3670_v45 = vand.u32 4294901760, %v3669_v11  ;;  %3761 = vmatpush.msra.mxu2 %v3668_v5  ;;  %v7820_v20 = vld [vmem:[%s9832_s7] ss:$0 sm:$0xff]  ;;  %v3839_v5 = vld [vmem:[%s9836_s11 + $0x38] sm:$0xff] }
 0x501   : > { %v3519_v27 = vpop.f32.mrf.mxu0  ;;  %v3548_v42 = vadd.f32 %v3547_v36, %v3546_v28 }
 0x502   : > { %3665 = vmatpush.msrb.mxu3 %v3664_v9  ;;  %v3926_v9 = vsub.f32 %v8819_v8, %v3925_v31 }
 0x503   : > { %v3471_v18 = vpop.f32.mrf.mxu2 }
 0x504   : > { %v3472_v22 = vadd.f32 %v3471_v18, %v3448_v17  ;;  %3671 = vmatpush.msrb.mxu3 %v3670_v45  ;;  %v8849_v45 = vsub.f32 %v3840_v29, %v8833_v35 }
 0x506   : > { %v3496_v26 = vadd.f32 %v3495_v24, %v3472_v22  ;;  %3780 = vmatpush.msra.mxu3 %v3619_v62  ;;  %v7821_v24 = vld [vmem:[%s9833_s8] ss:$0 sm:$0xff] }
 0x508   : > { %v3520_v37 = vadd.f32 %v3519_v27, %v3496_v26  ;;  %3782 = vmatpush.msra.mxu3 %v3621_v63 }
 0x50a   : > { %v3542_v41 = vadd.f32 %v3541_v38, %v3520_v37  ;;  %3784 = vmatpush.msra.mxu3 %v3623_v2  ;;  %v3841_v2 = vld [vmem:[%s9836_s11 + $0x48] sm:$0xff] }
 0x50b   : > { %v8821_v12 = vand.u32 4294901760, %v3841_v2 }
 0x50c   : > { %v3549_v23 = vsel %vm883_vm1, %v3542_v41, 0.0  ;;  %3786 = vmatpush.msra.mxu3 %v3625_v21 }
 0x50d   : > { %v3550_v47 = vadd.f32 %v3549_v23, %v3548_v42  ;;  %v3847_v42 = vld [vmem:[%s9836_s11 + $0x78] sm:$0xff]  ;;  %v3846_v23 = vld [vmem:[%s9836_s11 + $0x70] sm:$0xff]  ;;  %v8831_v34 = vsub.f32 %v3841_v2, %v8821_v12 }
 0x50f   : > { %v3555_v44 = vadd.f32 %v7819_v39, %v3550_v47  ;;  %v8743_v39 = vand.u32 4294901760, %v3847_v42  ;;  %v3931_v11 = vand.u32 4294901760, %v8831_v34 }
 0x511   : > { %v3556_v48 = vadd.f32 %v3555_v44, %v8378_v32  ;;  %v8749_v47 = vsub.f32 %v3847_v42, %v8743_v39  ;;  %v8751_v44 = vand.u32 4294901760, %v3846_v23  ;;  %3853 = vmatpush.msrb.mxu0 %v8743_v39 }
 0x513   : > { %v3559_v51 = vsel %vm883_vm1, %v3556_v48, 0.0  ;;  %v8760_v53 = vsub.f32 %v3846_v23, %v8751_v44  ;;  %3855 = vmatpush.msrb.mxu0 %v8751_v44  ;;  %v3835_v23 = vld [vmem:[%s9836_s11 + $0x18] sm:$0xff] }
 0x514   : > { %3560 = vadd.xlane.f32.xlu1 %v3559_v51  ;;  %v3895_v51 = vand.u32 4294901760, %v8749_v47 }
 0x515   : > { %v3901_v46 = vand.u32 4294901760, %v8760_v53 }
 0x516   : > { %v3896_v10 = vsub.f32 %v8749_v47, %v3895_v51 }
 0x587   : > { %v3561_v49 = vpop.xlane.xlu1 %3560 }
 0x588   : > { %v3569_v50 = vmul.f32 %v8708_v60, %v3561_v49  ;;  %v8777_v49 = vand.u32 4294901760, %v3844_v57 }
 0x58a   : > { %v8711_v52 = vsub.f32 %v3556_v48, %v3569_v50  ;;  %v3845_v48 = vld [vmem:[%s9836_s11 + $0x68] sm:$0xff]  ;;  %v3843_v50 = vld [vmem:[%s9836_s11 + $0x58] sm:$0xff]  ;;  %v8790_v61 = vsub.f32 %v3844_v57, %v8777_v49 }
 0x58b   : > { %v8762_v55 = vand.u32 4294901760, %v3845_v48  ;;  %v8794_v62 = vand.u32 4294901760, %v3843_v50 }
 0x58c   : > { %v3571_v32 = vmul.f32 %v8711_v52, %v8711_v52  ;;  %v3913_v40 = vand.u32 4294901760, %v8790_v61 }
 0x58d   : > { %v8775_v59 = vsub.f32 %v3845_v48, %v8762_v55  ;;  %3857 = vmatpush.msrb.mxu0 %v8762_v55  ;;  %v8808_v1 = vsub.f32 %v3843_v50, %v8794_v62  ;;  %v8910_v50 = vand.u32 4294901760, %v3835_v23 }
 0x58e   : > { %v3572_v56 = vsel %vm883_vm1, %v3571_v32, 0.0  ;;  %v3902_v32 = vsub.f32 %v8760_v53, %v3901_v46  ;;  %v3914_v7 = vsub.f32 %v8790_v61, %v3913_v40 }
 0x58f   : > { %3573 = vadd.xlane.f32.xlu2 %v3572_v56  ;;  %v3907_v56 = vand.u32 4294901760, %v8775_v59  ;;  %3859 = vmatpush.msrb.mxu0 %v8777_v49  ;;  %v3919_v21 = vand.u32 4294901760, %v8808_v1 }
 0x590   : > { %v3903_v58 = vand.u32 4294901760, %v3902_v32  ;;  %v3915_v30 = vand.u32 4294901760, %v3914_v7  ;;  %v8926_v7 = vsub.f32 %v3835_v23, %v8910_v50 }
 0x591   : > { %v3908_v63 = vsub.f32 %v8775_v59, %v3907_v56  ;;  %3861 = vmatpush.msrb.mxu0 %v8794_v62  ;;  %v3920_v4 = vsub.f32 %v8808_v1, %v3919_v21 }
 0x593   : > { %v3909_v6 = vand.u32 4294901760, %v3908_v63  ;;  %3863 = vmatpush.msrb.mxu0 %v8804_v0 }
 0x595   : > { %3865 = vmatpush.msrb.mxu0 %v8821_v12 }
 0x597   : > { %3867 = vmatpush.msrb.mxu0 %v8833_v35 }
 0x602   : > { %v3574_v14 = vpop.xlane.xlu2 %3573 }
 0x603   : > { %v3575_v13 = vmul.f32 %v3574_v14, %v8708_v60  ;;  %v8851_v14 = vand.u32 4294901760, %v3839_v5 }
 0x605   : > { %v3576_v15 = vadd.f32 1e-05, %v3575_v13  ;;  %v3921_v13 = vand.u32 4294901760, %v3920_v4  ;;  %3869 = vmatpush.msrb.mxu0 %v8851_v14  ;;  %v3833_v4 = vld [vmem:[%s9836_s11 + $0x8] sm:$0xff] }
 0x607   : > { %7857 = vrsqrt.f32 %v3576_v15  ;;  %vm3583_vm7 = vweird.f32 %v3576_v15 }
 0x60d   : > { %v7858_v43 = vpop.eup %7857 }
 0x60e   : > { %v3578_v3 = vmul.f32 %v7858_v43, %v3576_v15  ;;  %vm3584_vm6 = vweird.f32 %v7858_v43  ;;  %v3838_v15 = vld [vmem:[%s9836_s11 + $0x30] sm:$0xff] }
 0x60f   : > { %vm3585_vm8 = vmor %vm3583_vm7, %vm3584_vm6 }
 0x610   : > { %v3579_v16 = vmul.f32 %v7858_v43, %v3578_v3  ;;  %v3932_v3 = vsub.f32 %v8831_v34, %v3931_v11 }
 0x612   : > { %v3580_v17 = vmul.f32 0.5, %v3579_v16  ;;  %v3937_v16 = vand.u32 4294901760, %v8849_v45 }
 0x614   : > { %v3581_v18 = vsub.f32 1.5, %v3580_v17  ;;  %v8864_v17 = vsub.f32 %v3839_v5, %v8851_v14 }
 0x616   : > { %v3582_v19 = vmul.f32 %v7858_v43, %v3581_v18  ;;  %v8867_v18 = vand.u32 4294901760, %v3838_v15 }
 0x618   : > { %v3586_v22 = vsel %vm3585_vm8, %v7858_v43, %v3582_v19  ;;  %v3927_v43 = vand.u32 4294901760, %v3926_v9  ;;  %v3837_v19 = vld [vmem:[%s9836_s11 + $0x28] sm:$0xff]  ;;  %3871 = vmatpush.msrb.mxu0 %v8867_v18 }
 0x619   : > { %v3587_v25 = vmul.f32 %v3586_v22, %v8711_v52  ;;  %v3897_v52 = vand.u32 4294901760, %v3896_v10  ;;  %v3938_v22 = vsub.f32 %v8849_v45, %v3937_v16 }
 0x61b   : > { %v3591_v26 = vmul.f32 %v7820_v20, %v3587_v25  ;;  %3898 = vmatpush.msrb.mxu1 %v3897_v52  ;;  %v3933_v20 = vand.u32 4294901760, %v3932_v3  ;;  %v8877_v25 = vand.u32 4294901760, %v3837_v19 }
 0x61d   : > { %v8736_v27 = vadd.f32 %v7821_v24, %v3591_v26  ;;  %3904 = vmatpush.msrb.mxu1 %v3903_v58  ;;  %v3943_v24 = vand.u32 4294901760, %v8864_v17  ;;  %v8882_v26 = vsub.f32 %v3838_v15, %v8867_v18  ;;  %3873 = vmatpush.msrb.mxu0 %v8877_v25  ;;  %v3834_v58 = vld [vmem:[%s9836_s11 + $0x10] sm:$0xff]  ;;  %v3967_v15 = vand.u32 4294901760, %v8926_v7 }
 0x61f   : > { %v3605_v33 = vsel %vm883_vm1, %v8736_v27, 0  ;;  %3910 = vmatpush.msrb.mxu1 %v3909_v6  ;;  %v3949_v42 = vand.u32 4294901760, %v8882_v26 }
 0x620   : > { %v3627_v36 = vand.u32 4294901760, %v3605_v33 }
 0x621   : > { %3916 = vmatpush.msrb.mxu1 %v3915_v30  ;;  %v3950_v54 = vsub.f32 %v8882_v26, %v3949_v42  ;;  %v8930_v30 = vand.u32 4294901760, %v3834_v58 }
 0x622   : > { %3673 = vmatmul.f32.vlgmr.msrb.gmra.mxu3 %v3627_v36  ;;  %v3628_v37 = vsub.f32 %v3605_v33, %v3627_v36  ;;  %v3836_v33 = vld [vmem:[%s9836_s11 + $0x20] sm:$0xff] }
 0x623   : > { %4049 = vmatpush.msrb.mxu3 %v8743_v39  ;;  %3922 = vmatpush.msrb.mxu1 %v3921_v13  ;;  %v3951_v29 = vand.u32 4294901760, %v3950_v54  ;;  %v8943_v3 = vsub.f32 %v3834_v58, %v8930_v30 }
 0x624   : > { %3703 = vmatmul.f32.vlgmr.msra.gmra.mxu0 %v3628_v37  ;;  %v3629_v28 = vand.u32 4294901760, %v3628_v37 }
 0x625   : > { %4051 = vmatpush.msrb.mxu3 %v8751_v44  ;;  %3928 = vmatpush.msrb.mxu1 %v3927_v43  ;;  %v3973_v23 = vand.u32 4294901760, %v8943_v3 }
 0x626   : > { %3730 = vmatmul.f32.vlgmr.msra.gmra.mxu1 %v3629_v28  ;;  %v3630_v38 = vsub.f32 %v3628_v37, %v3629_v28  ;;  %v3939_v37 = vand.u32 4294901760, %v3938_v22  ;;  %v3944_v28 = vsub.f32 %v8864_v17, %v3943_v24 }
 0x627   : > { %4053 = vmatpush.msrb.mxu3 %v8762_v55  ;;  %3934 = vmatpush.msrb.mxu1 %v3933_v20  ;;  %v3832_v20 = vld [vmem:[%s9836_s11] sm:$0xff] }
 0x628   : > { %v3631_v41 = vand.u32 4294901760, %v3630_v38  ;;  %v8895_v38 = vsub.f32 %v3837_v19, %v8877_v25  ;;  %v3945_v48 = vand.u32 4294901760, %v3944_v28  ;;  %v8945_v19 = vand.u32 4294901760, %v3833_v4 }
 0x629   : > { %4055 = vmatpush.msrb.mxu3 %v8777_v49  ;;  %3940 = vmatpush.msrb.mxu1 %v3939_v37  ;;  %v8954_v37 = vand.u32 4294901760, %v3832_v20 }
 0x62a   : > { %3632 = vmatmul.f32.vlgmr.msrb.gmra.mxu2 %v3631_v41  ;;  %3788 = vmatmul.f32.vlgmr.msra.gmra.mxu3 %v3627_v36  ;;  %v8897_v41 = vand.u32 4294901760, %v3836_v33  ;;  %v3955_v57 = vand.u32 4294901760, %v8895_v38 }
 0x62b   : > { %3996 = vmatpush.msrb.mxu2 %v8749_v47  ;;  %4057 = vmatpush.msrb.mxu3 %v8794_v62  ;;  %v8964_v54 = vsub.f32 %v3832_v20, %v8954_v37 }
 0x62c   : > { %v8908_v10 = vsub.f32 %v3836_v33, %v8897_v41  ;;  %3875 = vmatpush.msrb.mxu0 %v8897_v41  ;;  %v3956_v2 = vsub.f32 %v8895_v38, %v3955_v57  ;;  %3946 = vmatpush.msrb.mxu1 %v3945_v48  ;;  %v8960_v48 = vsub.f32 %v3833_v4, %v8945_v19 }
 0x62d   : > { %3999 = vmatpush.msrb.mxu2 %v8760_v53  ;;  %4059 = vmatpush.msrb.mxu3 %v8804_v0  ;;  %v3985_v4 = vand.u32 4294901760, %v8964_v54 }
 0x62e   : > { %v3961_v6 = vand.u32 4294901760, %v8908_v10  ;;  %3877 = vmatpush.msrb.mxu0 %v8910_v50  ;;  %v3957_v9 = vand.u32 4294901760, %v3956_v2  ;;  %3952 = vmatpush.msrb.mxu1 %v3951_v29  ;;  %v3979_v2 = vand.u32 4294901760, %v8960_v48 }
 0x62f   : > { %4002 = vmatpush.msrb.mxu2 %v8775_v59  ;;  %4061 = vmatpush.msrb.mxu3 %v8821_v12  ;;  %v3986_v20 = vsub.f32 %v8964_v54, %v3985_v4 }
 0x630   : > { %v3962_v13 = vsub.f32 %v8908_v10, %v3961_v6  ;;  %3879 = vmatpush.msrb.mxu0 %v8930_v30  ;;  %3958 = vmatpush.msrb.mxu1 %v3957_v9 }
 0x631   : > { %4005 = vmatpush.msrb.mxu2 %v8790_v61  ;;  %4063 = vmatpush.msrb.mxu3 %v8833_v35 }
 0x632   : > { %3763 = vmatmul.f32.vlgmr.msra.gmra.mxu2 %v3627_v36  ;;  %v7822_v36 = vld [vmem:[%s9835_s10] ss:$0 sm:$0xff]  ;;  %v3963_v33 = vand.u32 4294901760, %v3962_v13  ;;  %3881 = vmatpush.msrb.mxu0 %v8945_v19  ;;  %v3980_v13 = vsub.f32 %v8960_v48, %v3979_v2 }
 0x633   : > { %4008 = vmatpush.msrb.mxu2 %v8808_v1  ;;  %4065 = vmatpush.msrb.mxu3 %v8851_v14 }
 0x634   : > { %3964 = vmatpush.msrb.mxu1 %v3963_v33  ;;  %3883 = vmatpush.msrb.mxu0 %v8954_v37  ;;  %v3981_v47 = vand.u32 4294901760, %v3980_v13 }
 0x635   : > { %4011 = vmatpush.msrb.mxu2 %v8819_v8  ;;  %4067 = vmatpush.msrb.mxu3 %v8867_v18 }
 0x636   : > { %4090 = vmatpush.msra.mxu0 %v3895_v51 }
 0x637   : > { %4014 = vmatpush.msrb.mxu2 %v8831_v34  ;;  %4069 = vmatpush.msrb.mxu3 %v8877_v25 }
 0x638   : > { %4094 = vmatpush.msra.mxu0 %v3901_v46 }
 0x639   : > { %4017 = vmatpush.msrb.mxu2 %v8849_v45  ;;  %4071 = vmatpush.msrb.mxu3 %v8897_v41 }
 0x63a   : > { %4098 = vmatpush.msra.mxu0 %v3907_v56 }
 0x63b   : > { %4020 = vmatpush.msrb.mxu2 %v8864_v17  ;;  %4073 = vmatpush.msrb.mxu3 %v8910_v50 }
 0x63c   : > { %4102 = vmatpush.msra.mxu0 %v3913_v40 }
 0x63d   : > { %4023 = vmatpush.msrb.mxu2 %v8882_v26  ;;  %4075 = vmatpush.msrb.mxu3 %v8930_v30 }
 0x63e   : > { %4106 = vmatpush.msra.mxu0 %v3919_v21 }
 0x63f   : > { %4026 = vmatpush.msrb.mxu2 %v8895_v38  ;;  %4077 = vmatpush.msrb.mxu3 %v8945_v19 }
 0x640   : > { %4110 = vmatpush.msra.mxu0 %v3925_v31 }
 0x641   : > { %4029 = vmatpush.msrb.mxu2 %v8908_v10  ;;  %4079 = vmatpush.msrb.mxu3 %v8954_v37 }
 0x642   : > { %4114 = vmatpush.msra.mxu0 %v3931_v11 }
 0x643   : > { %4032 = vmatpush.msrb.mxu2 %v8926_v7 }
 0x644   : > { %4118 = vmatpush.msra.mxu0 %v3937_v16 }
 0x645   : > { %4035 = vmatpush.msrb.mxu2 %v8943_v3 }
 0x646   : > { %4122 = vmatpush.msra.mxu0 %v3943_v24 }
 0x647   : > { %4038 = vmatpush.msrb.mxu2 %v8960_v48 }
 0x648   : > { %4126 = vmatpush.msra.mxu0 %v3949_v42 }
 0x649   : > { %4041 = vmatpush.msrb.mxu2 %v8964_v54 }
 0x64a   : > { %4130 = vmatpush.msra.mxu0 %v3955_v57 }
 0x64c   : > { %4134 = vmatpush.msra.mxu0 %v3961_v6 }
 0x64e   : > { %4138 = vmatpush.msra.mxu0 %v3967_v15 }
 0x650   : > { %4142 = vmatpush.msra.mxu0 %v3973_v23 }
 0x652   : > { %4146 = vmatpush.msra.mxu0 %v3979_v2 }
 0x654   : > { %4150 = vmatpush.msra.mxu0 %v3985_v4 }
 0x6a1   : > { %v3704_v43 = vpop.f32.mrf.mxu0 }
 0x6a3   : > { %v3731_v28 = vpop.f32.mrf.mxu1 }
 0x6a5   : > { %v3674_v52 = vpop.f32.mrf.mxu3 }
 0x6ad   : > { %v3633_v32 = vpop.f32.mrf.mxu2 }
 0x6ae   : > { %v3634_v63 = vadd.f32 %v7822_v36, %v3633_v32  ;;  %v3968_v36 = vsub.f32 %v8926_v7, %v3967_v15  ;;  %v7823_v15 = vld [vmem:[%s9837_s12] ss:$0 sm:$0xff] }
 0x6b0   : > { %v3675_v5 = vadd.f32 %v3674_v52, %v3634_v63  ;;  %v3969_v32 = vand.u32 4294901760, %v3968_v36  ;;  %v3974_v63 = vsub.f32 %v8943_v3, %v3973_v23 }
 0x6b2   : > { %v3705_v22 = vadd.f32 %v3704_v43, %v3675_v5  ;;  %v3789_v5 = vpop.f32.mrf.mxu3  ;;  %3970 = vmatpush.msrb.mxu1 %v3969_v32  ;;  %v3975_v9 = vand.u32 4294901760, %v3974_v63 }
 0x6b4   : > { %v3732_v52 = vadd.f32 %v3731_v28, %v3705_v22  ;;  %3976 = vmatpush.msrb.mxu1 %v3975_v9  ;;  %v3987_v22 = vand.u32 4294901760, %v3986_v20  ;;  %v7721_v20 = vld [vmem:[%s9856_s3 + $0x98] sm:$0xff] }
 0x6b5   : > { %v3764_v58 = vpop.f32.mrf.mxu2 }
 0x6b6   : > { %v3765_v29 = vadd.f32 %v3764_v58, %v3732_v52  ;;  %3982 = vmatpush.msrb.mxu1 %v3981_v47  ;;  %v9045_v47 = vand.u32 4294901760, %v7721_v20 }
 0x6b8   : > { %v8979_v43 = vadd.f32 %v3789_v5, %v3765_v29  ;;  %3988 = vmatpush.msrb.mxu1 %v3987_v22  ;;  %4276 = vmatpush.msra.mxu2 %v9045_v47 }
 0x6ba   : > { %v8986_v51 = vmul.f32 0.70710677, %v8979_v43  ;;  %4157 = vmatpush.msra.mxu1 %v8743_v39 }
 0x6bc   : > { %v3794_v33 = vand.u32 2147483647, %v8986_v51  ;;  %4159 = vmatpush.msra.mxu1 %v8751_v44  ;;  %vm3827_vm13 = vcmp.ge.f32.partialorder %v8986_v51, 0.0  ;;  %v9051_v51 = vsub.f32 %v7721_v20, %v9045_v47 }
 0x6be   : > { %v3795_v53 = vmul.f32 0.3275911, %v3794_v33  ;;  %4161 = vmatpush.msra.mxu1 %v8762_v55  ;;  %v3821_v1 = vsub.f32 0.0, %v3794_v33 }
 0x6c0   : > { %v3796_v46 = vadd.f32 1.0, %v3795_v53  ;;  %4163 = vmatpush.msra.mxu1 %v8777_v49  ;;  %v3822_v21 = vmul.f32 %v3821_v1, %v3794_v33  ;;  %v7719_v33 = vld [vmem:[%s9856_s3 + $0x88] sm:$0xff]  ;;  %v4306_v53 = vand.u32 4294901760, %v9051_v51 }
 0x6c2   : > { %7859 = vrcp.f32 %v3796_v46  ;;  %4165 = vmatpush.msra.mxu1 %v8794_v62  ;;  %v3808_v59 = vand.u32 2147483648, %v3796_v46  ;;  %v3806_v56 = vand.u32 2147483647, %v3796_v46  ;;  %vm3802_vm10 = vweird.f32 %v3796_v46 }
 0x6c4   : > { %4167 = vmatpush.msra.mxu1 %v8804_v0  ;;  %v3809_v62 = vor.u32 1.1754944e-38, %v3808_v59  ;;  %vm3807_vm12 = vcmp.eq.f32.partialorder %v3806_v56, 8.507059e+37 }
 0x6c6   : > { %4169 = vmatpush.msra.mxu1 %v8821_v12 }
 0x6c8   : > { %v7860_v39 = vpop.eup %7859  ;;  %4171 = vmatpush.msra.mxu1 %v8833_v35  ;;  %v3823_v35 = vmul.f32 1.442695, %v3822_v21 }
 0x6c9   : > { %v3798_v44 = vmul.f32 %v7860_v39, %v3796_v46  ;;  %vm3803_vm9 = vweird.f32 %v7860_v39 }
 0x6ca   : > { %4173 = vmatpush.msra.mxu1 %v8851_v14  ;;  %vm3804_vm11 = vmor %vm3802_vm10, %vm3803_vm9  ;;  %7861 = vpow2.f32 %v3823_v35 }
 0x6cb   : > { %v3799_v55 = vsub.f32 1.0, %v3798_v44  ;;  %v7718_v44 = vld [vmem:[%s9856_s3 + $0x80] sm:$0xff] }
 0x6cc   : > { %4175 = vmatpush.msra.mxu1 %v8867_v18  ;;  %v9076_v56 = vand.u32 4294901760, %v7718_v44 }
 0x6cd   : > { %v3800_v49 = vmul.f32 %v7860_v39, %v3799_v55  ;;  %v4307_v55 = vsub.f32 %v9051_v51, %v4306_v53 }
 0x6ce   : > { %4177 = vmatpush.msra.mxu1 %v8877_v25 }
 0x6cf   : > { %v3801_v61 = vadd.f32 %v7860_v39, %v3800_v49 }
 0x6d0   : > { %4179 = vmatpush.msra.mxu1 %v8897_v41  ;;  %v7862_v18 = vpop.eup %7861  ;;  %v3792_v41 = vmul.f32 0.5, %v8979_v43 }
 0x6d1   : > { %v3805_v40 = vsel %vm3804_vm11, %v7860_v39, %v3801_v61  ;;  %v9063_v39 = vand.u32 4294901760, %v7719_v33  ;;  %v7725_v61 = vld [vmem:[%s9856_s3 + $0xb8] sm:$0xff] }
 0x6d2   : > { %v3810_v0 = vsel %vm3807_vm12, %v3809_v62, %v3805_v40  ;;  %4181 = vmatpush.msra.mxu1 %v8910_v50  ;;  %v4308_v62 = vand.u32 4294901760, %v4307_v55 }
 0x6d3   : > { %v3812_v8 = vmul.f32 1.0614054, %v3810_v0  ;;  %v9074_v49 = vsub.f32 %v7719_v33, %v9063_v39 }
 0x6d4   : > { %4183 = vmatpush.msra.mxu1 %v8930_v30  ;;  %4309 = vmatpush.msra.mxu3 %v4308_v62 }
 0x6d5   : > { %v3813_v12 = vadd.f32 -1.4531521, %v3812_v8  ;;  %v4318_v1 = vand.u32 4294901760, %v9074_v49  ;;  %v7724_v8 = vld [vmem:[%s9856_s3 + $0xb0] sm:$0xff] }
 0x6d6   : > { %4185 = vmatpush.msra.mxu1 %v8945_v19  ;;  %v9102_v35 = vand.u32 4294901760, %v7724_v8 }
 0x6d7   : > { %v3814_v31 = vmul.f32 %v3813_v12, %v3810_v0  ;;  %v9093_v12 = vsub.f32 %v7718_v44, %v9076_v56 }
 0x6d8   : > { %4187 = vmatpush.msra.mxu1 %v8954_v37 }
 0x6d9   : > { %v3815_v34 = vadd.f32 1.4214138, %v3814_v31 }
 0x6db   : > { %v3816_v11 = vmul.f32 %v3815_v34, %v3810_v0  ;;  %v4319_v34 = vsub.f32 %v9074_v49, %v4318_v1 }
 0x6dd   : > { %v3817_v45 = vadd.f32 -0.28449672, %v3816_v11  ;;  %v4324_v11 = vand.u32 4294901760, %v9093_v12 }
 0x6df   : > { %v3818_v14 = vmul.f32 %v3817_v45, %v3810_v0  ;;  %v7723_v45 = vld [vmem:[%s9856_s3 + $0xa8] sm:$0xff] }
 0x6e1   : > { %v3819_v16 = vadd.f32 0.2548296, %v3818_v14  ;;  %v7729_v14 = vld [vmem:[%s9856_s3 + $0xd8] sm:$0xff] }
 0x6e3   : > { %v3820_v17 = vmul.f32 %v3819_v16, %v3810_v0  ;;  %v9085_v0 = vand.u32 4294901760, %v7725_v61  ;;  %v4320_v16 = vand.u32 4294901760, %v4319_v34 }
 0x6e5   : > { %v3825_v24 = vmul.f32 %v7862_v18, %v3820_v17  ;;  %v9097_v31 = vsub.f32 %v7725_v61, %v9085_v0  ;;  %v9115_v17 = vsub.f32 %v7724_v8, %v9102_v35  ;;  %v9117_v18 = vand.u32 4294901760, %v7723_v45 }
 0x6e7   : > { %v3826_v25 = vsub.f32 1.0, %v3825_v24  ;;  %v9119_v24 = vand.u32 4294901760, %v7729_v14 }
 0x6e9   : > { %v3828_v26 = vsub.f32 0.0, %v3826_v25 }
 0x6eb   : > { %v3829_v38 = vsel %vm3827_vm13, %v3826_v25, %v3828_v26  ;;  %v4325_v25 = vsub.f32 %v9093_v12, %v4324_v11  ;;  %v7722_v26 = vld [vmem:[%s9856_s3 + $0xa0] sm:$0xff] }
 0x6ec   : > { %v3830_v42 = vadd.f32 1.0, %v3829_v38  ;;  %v7728_v38 = vld [vmem:[%s9856_s3 + $0xd0] sm:$0xff] }
 0x6ee   : > { %v3831_v57 = vmul.f32 %v3830_v42, %v3792_v41  ;;  %v9134_v41 = vsub.f32 %v7723_v45, %v9117_v18  ;;  %v9136_v42 = vand.u32 4294901760, %v7722_v26 }
 0x6f0   : > { %v3884_v10 = vand.u32 4294901760, %v3831_v57 }
 0x6f2   : > { %v3885_v50 = vsub.f32 %v3831_v57, %v3884_v10  ;;  %3990 = vmatmul.f32.vlgmr.msrb.gmra.mxu1 %v3884_v10  ;;  %v9139_v57 = vsub.f32 %v7729_v14, %v9119_v24 }
 0x6f3   : > { %4561 = vmatpush.msrb.mxu1 %v9085_v0 }
 0x6f4   : > { %4044 = vmatmul.f32.vlgmr.msrb.gmra.mxu2 %v3885_v50  ;;  %v3886_v6 = vand.u32 4294901760, %v3885_v50 }
 0x6f5   : > { %4563 = vmatpush.msrb.mxu1 %v9102_v35 }
 0x6f6   : > { %4083 = vmatmul.f32.vlgmr.msrb.gmra.mxu3 %v3886_v6  ;;  %v3887_v7 = vsub.f32 %v3885_v50, %v3886_v6  ;;  %v4326_v6 = vand.u32 4294901760, %v4325_v25 }
 0x6f7   : > { %4565 = vmatpush.msrb.mxu1 %v9117_v18 }
 0x6f8   : > { %v3888_v30 = vand.u32 4294901760, %v3887_v7  ;;  %v7727_v7 = vld [vmem:[%s9856_s3 + $0xc8] sm:$0xff] }
 0x6f9   : > { %4567 = vmatpush.msrb.mxu1 %v9136_v42 }
 0x6fa   : > { %3889 = vmatmul.f32.vlgmr.msrb.gmra.mxu0 %v3888_v30  ;;  %4189 = vmatmul.f32.vlgmr.msra.gmra.mxu1 %v3884_v10 }
 0x6fb   : > { %4532 = vmatpush.msrb.mxu0 %v9097_v31 }
 0x6fd   : > { %4535 = vmatpush.msrb.mxu0 %v9115_v17 }
 0x6ff   : > { %4538 = vmatpush.msrb.mxu0 %v9134_v41 }
 0x702   : > { %4152 = vmatmul.f32.vlgmr.msra.gmra.mxu0 %v3884_v10  ;;  %v9141_v10 = vand.u32 4294901760, %v7728_v38 }
 0x76f   : > { %v3991_v3 = vpop.f32.mrf.mxu1 }
 0x777   : > { %v3890_v19 = vpop.f32.mrf.mxu0  ;;  %v4045_v28 = vpop.f32.mrf.mxu2 }
 0x778   : > { %v3891_v36 = vadd.f32 %v7823_v15, %v3890_v19  ;;  %v4190_v58 = vpop.f32.mrf.mxu1  ;;  %v9151_v15 = vsub.f32 %v7722_v26, %v9136_v42  ;;  %v9154_v19 = vand.u32 4294901760, %v7727_v7  ;;  %v4491_v26 = vand.u32 4294901760, %v9097_v31 }
 0x779   : > { %v4084_v48 = vpop.f32.mrf.mxu3 }
 0x77a   : > { %v3992_v37 = vadd.f32 %v3991_v3, %v3891_v36  ;;  %v4676_v3 = vand.u32 4294901760, %v9139_v57  ;;  %v9158_v36 = vsub.f32 %v7728_v38, %v9141_v10  ;;  %4541 = vmatpush.msrb.mxu0 %v9151_v15 }
 0x77c   : > { %v4046_v23 = vadd.f32 %v4045_v28, %v3992_v37  ;;  %v7726_v37 = vld [vmem:[%s9856_s3 + $0xc0] sm:$0xff]  ;;  %4646 = vmatpush.msra.mxu0 %v9119_v24 }
 0x77e   : > { %v4085_v52 = vadd.f32 %v4084_v48, %v4046_v23  ;;  %v4677_v23 = vsub.f32 %v9139_v57, %v4676_v3  ;;  %v9166_v48 = vand.u32 4294901760, %v7726_v37  ;;  %4648 = vmatpush.msra.mxu0 %v9141_v10 }
 0x77f   : > { %v4153_v32 = vpop.f32.mrf.mxu0 }
 0x780   : > { %v4154_v54 = vadd.f32 %v4153_v32, %v4085_v52  ;;  %v9169_v52 = vsub.f32 %v7727_v7, %v9154_v19  ;;  %v4682_v32 = vand.u32 4294901760, %v9158_v36  ;;  %4650 = vmatpush.msra.mxu0 %v9154_v19  ;;  %v7733_v7 = vld [vmem:[%s9856_s3 + $0xf8] sm:$0xff] }
 0x782   : > { %v4191_v63 = vadd.f32 %v4190_v58, %v4154_v54  ;;  %v4678_v54 = vand.u32 4294901760, %v4677_v23  ;;  %v4688_v58 = vand.u32 4294901760, %v9169_v52  ;;  %4652 = vmatpush.msra.mxu0 %v9166_v48  ;;  %v7732_v23 = vld [vmem:[%s9856_s3 + $0xf0] sm:$0xff] }
 0x784   : > { %v4193_v2 = vadd.f32 %v4191_v63, %v8736_v27  ;;  %v7720_v27 = vld [vmem:[%s9856_s3 + $0x90] sm:$0xff]  ;;  %v4683_v63 = vsub.f32 %v9158_v36, %v4682_v32  ;;  %4679 = vmatpush.msra.mxu1 %v4678_v54  ;;  %v4509_v54 = vand.u32 4294901760, %v9151_v15 }
 0x785   : > { %v9053_v22 = vand.u32 4294901760, %v7720_v27 }
 0x786   : > { %v4196_v29 = vsel %vm883_vm1, %v4193_v2, 0.0 }
 0x787   : > { %4197 = vadd.xlane.f32.xlu2 %v4196_v29  ;;  %v9061_v46 = vsub.f32 %v7720_v27, %v9053_v22  ;;  %4278 = vmatpush.msra.mxu2 %v9053_v22  ;;  %v4689_v29 = vsub.f32 %v9169_v52, %v4688_v58 }
 0x789   : > { %v4312_v59 = vand.u32 4294901760, %v9061_v46  ;;  %4280 = vmatpush.msra.mxu2 %v9063_v39 }
 0x78b   : > { %v4313_v40 = vsub.f32 %v9061_v46, %v4312_v59  ;;  %4282 = vmatpush.msra.mxu2 %v9076_v56 }
 0x78d   : > { %4347 = vmatpush.msrb.mxu2 %v9051_v51  ;;  %v4314_v21 = vand.u32 4294901760, %v4313_v40  ;;  %v7824_v40 = vld [vmem:[%s9838_s13] ss:$0 sm:$0xff] }
 0x78f   : > { %4350 = vmatpush.msrb.mxu2 %v9061_v46  ;;  %4315 = vmatpush.msra.mxu3 %v4314_v21  ;;  %v7825_v21 = vld [vmem:[%s9839_s14] ss:$0 sm:$0xff] }
 0x791   : > { %4353 = vmatpush.msrb.mxu2 %v9074_v49  ;;  %4321 = vmatpush.msra.mxu3 %v4320_v16 }
 0x793   : > { %4356 = vmatpush.msrb.mxu2 %v9093_v12  ;;  %4327 = vmatpush.msra.mxu3 %v4326_v6  ;;  %v4492_v6 = vsub.f32 %v9097_v31, %v4491_v26 }
 0x795   : > { %4376 = vmatpush.msrb.mxu3 %v9045_v47 }
 0x797   : > { %4378 = vmatpush.msrb.mxu3 %v9053_v22 }
 0x799   : > { %4380 = vmatpush.msrb.mxu3 %v9063_v39 }
 0x79b   : > { %4382 = vmatpush.msrb.mxu3 %v9076_v56 }
 0x7fa   : > { %v4198_v4 = vpop.xlane.xlu2 %4197 }
 0x7fb   : > { %v4199_v5 = vmul.f32 %v4198_v4, %v8708_v60  ;;  %v4684_v4 = vand.u32 4294901760, %v4683_v63 }
 0x7fd   : > { %v9037_v9 = vsub.f32 %v4193_v2, %v4199_v5  ;;  %v9178_v2 = vsub.f32 %v7726_v37, %v9166_v48  ;;  %4685 = vmatpush.msra.mxu1 %v4684_v4  ;;  %v7730_v4 = vld [vmem:[%s9856_s3 + $0xe0] sm:$0xff] }
 0x7ff   : > { %v4201_v13 = vmul.f32 %v9037_v9, %v9037_v9  ;;  %v4694_v5 = vand.u32 4294901760, %v9178_v2 }
 0x801   : > { %v4202_v43 = vsel %vm883_vm1, %v4201_v13, 0.0  ;;  %v4690_v13 = vand.u32 4294901760, %v4689_v29  ;;  %v4510_v29 = vsub.f32 %v9151_v15, %v4509_v54 }
 0x802   : > { %4203 = vadd.xlane.f32.xlu2 %v4202_v43  ;;  %v4695_v43 = vsub.f32 %v9178_v2, %v4694_v5 }
 0x803   : > { %4691 = vmatpush.msra.mxu1 %v4690_v13 }
 0x804   : > { %v4696_v33 = vand.u32 4294901760, %v4695_v43  ;;  %v9273_v43 = vand.u32 4294901760, %v7730_v4 }
 0x806   : > { %4697 = vmatpush.msra.mxu1 %v4696_v33 }
 0x875   : > { %v4204_v50 = vpop.xlane.xlu2 %4203 }
 0x876   : > { %v4205_v30 = vmul.f32 %v4204_v50, %v8708_v60  ;;  %v4497_v50 = vand.u32 4294901760, %v9115_v17 }
 0x878   : > { %v4206_v28 = vadd.f32 1e-05, %v4205_v30  ;;  %v4498_v37 = vsub.f32 %v9115_v17, %v4497_v50 }
 0x87a   : > { %7863 = vrsqrt.f32 %v4206_v28  ;;  %vm4213_vm15 = vweird.f32 %v4206_v28  ;;  %v4499_v63 = vand.u32 4294901760, %v4498_v37 }
 0x880   : > { %v7864_v20 = vpop.eup %7863 }
 0x881   : > { %v4208_v27 = vmul.f32 %v7864_v20, %v4206_v28  ;;  %vm4214_vm14 = vweird.f32 %v7864_v20  ;;  %v9231_v28 = vand.u32 4294901760, %v7733_v7 }
 0x882   : > { %vm4215_vm0 = vmor %vm4213_vm15, %vm4214_vm14 }
 0x883   : > { %v4209_v44 = vmul.f32 %v7864_v20, %v4208_v27 }
 0x885   : > { %v4210_v55 = vmul.f32 0.5, %v4209_v44 }
 0x887   : > { %v4211_v61 = vsub.f32 1.5, %v4210_v55 }
 0x889   : > { %v4212_v62 = vmul.f32 %v7864_v20, %v4211_v61 }
 0x88b   : > { %v4216_v8 = vsel %vm4215_vm0, %v7864_v20, %v4212_v62  ;;  %v7828_v62 = vld [vmem:[%s9858_s4 + $0x5] ss:$0 sm:$0xff] }
 0x88c   : > { %v4217_v34 = vmul.f32 %v4216_v8, %v9037_v9 }
 0x88e   : > { %v4221_v45 = vmul.f32 %v7824_v40, %v4217_v34 }
 0x890   : > { %v9196_v14 = vadd.f32 %v7825_v21, %v4221_v45 }
 0x892   : > { %v4261_v16 = vsel %vm883_vm1, %v9196_v14, 0 }
 0x893   : > { %v9200_v25 = vand.u32 4294901760, %v4261_v16 }
 0x895   : > { %v9204_v38 = vsub.f32 %v4261_v16, %v9200_v25  ;;  %4329 = vmatmul.f32.vlgmr.msra.gmra.mxu3 %v9200_v25 }
 0x896   : > { %4436 = vmatpush.msra.mxu3 %v9045_v47  ;;  %v4503_v47 = vand.u32 4294901760, %v9134_v41 }
 0x897   : > { %4544 = vmatmul.f32.vlgmr.msrb.gmra.mxu0 %v9204_v38  ;;  %v9211_v9 = vand.u32 4294901760, %v9204_v38 }
 0x898   : > { %4438 = vmatpush.msra.mxu3 %v9053_v22  ;;  %4775 = vmatpush.msrb.mxu0 %v4676_v3  ;;  %v4493_v3 = vand.u32 4294901760, %v4492_v6 }
 0x899   : > { %4571 = vmatmul.f32.vlgmr.msrb.gmra.mxu1 %v9211_v9  ;;  %v4286_v30 = vsub.f32 %v9204_v38, %v9211_v9 }
 0x89a   : > { %4440 = vmatpush.msra.mxu3 %v9063_v39  ;;  %4779 = vmatpush.msrb.mxu0 %v4682_v32  ;;  %v4504_v39 = vsub.f32 %v9134_v41, %v4503_v47  ;;  %v7731_v32 = vld [vmem:[%s9856_s3 + $0xe8] sm:$0xff]  ;;  %s7911_s3 = scalar_lea.hbm %s9842_s17, 16 }
 0x89b   : > { %v9228_v22 = vand.u32 4294901760, %v4286_v30  ;;  %4806 = vmatpush.msrb.mxu1 %v9119_v24 }
 0x89c   : > { %4442 = vmatpush.msra.mxu3 %v9076_v56  ;;  %4783 = vmatpush.msrb.mxu0 %v4688_v58  ;;  %v9249_v56 = vand.u32 4294901760, %v7732_v23  ;;  %v9253_v58 = vsub.f32 %v7733_v7, %v9231_v28  ;;  %v4505_v51 = vand.u32 4294901760, %v4504_v39 }
 0x89d   : > { %4288 = vmatmul.f32.vlgmr.msra.gmra.mxu2 %v9228_v22  ;;  %4386 = vmatmul.f32.vlgmr.msrb.gmra.mxu3 %v9211_v9 }
 0x89e   : > { %4808 = vmatpush.msrb.mxu1 %v9141_v10  ;;  %4405 = vmatpush.msra.mxu2 %v4306_v53  ;;  %v9264_v53 = vand.u32 4294901760, %v7731_v32  ;;  %v9271_v13 = vsub.f32 %v7732_v23, %v9249_v56  ;;  %v4861_v49 = vand.u32 4294901760, %v9253_v58 }
 0x89f   : > { %4658 = vmatmul.f32.vlgmr.msra.gmra.mxu0 %v9228_v22  ;;  %4494 = vmatpush.msrb.mxu3 %v4493_v3 }
 0x8a0   : > { %4787 = vmatpush.msrb.mxu0 %v4694_v5  ;;  %4810 = vmatpush.msrb.mxu1 %v9154_v19  ;;  %v4511_v5 = vand.u32 4294901760, %v4510_v29  ;;  %v9280_v46 = vsub.f32 %v7731_v32, %v9264_v53 }
 0x8a1   : > { %4699 = vmatmul.f32.vlgmr.msra.gmra.mxu1 %v9200_v25  ;;  %4409 = vmatpush.msra.mxu2 %v4312_v59  ;;  %v9288_v59 = vsub.f32 %v7730_v4, %v9273_v43 }
 0x8a2   : > { %4500 = vmatpush.msrb.mxu3 %v4499_v63  ;;  %4812 = vmatpush.msrb.mxu1 %v9166_v48  ;;  %v4873_v12 = vand.u32 4294901760, %v9280_v46  ;;  %v7829_v63 = vld [vmem:[%s9858_s4 + $0x7] ss:$0 sm:$0xff] }
 0x8a3   : > { %4902 = vmatpush.msra.mxu0 %v9253_v58  ;;  %4413 = vmatpush.msra.mxu2 %v4318_v1  ;;  %v4862_v1 = vsub.f32 %v9253_v58, %v4861_v49 }
 0x8a4   : > { %4506 = vmatpush.msrb.mxu3 %v4505_v51  ;;  %4931 = vmatpush.msra.mxu1 %v9231_v28  ;;  %v4874_v31 = vsub.f32 %v9280_v46, %v4873_v12 }
 0x8a5   : > { %4359 = vmatmul.f32.vlgmr.msrb.gmra.mxu2 %v9204_v38  ;;  %4444 = vmatmul.f32.vlgmr.msra.gmra.mxu3 %v9200_v25 }
 0x8a6   : > { %4905 = vmatpush.msra.mxu0 %v9271_v13  ;;  %4417 = vmatpush.msra.mxu2 %v4324_v11  ;;  %v4879_v11 = vand.u32 4294901760, %v9288_v59 }
 0x8a7   : > { %4789 = vmatmul.f32.vlgmr.msrb.gmra.mxu0 %v9200_v25  ;;  %4512 = vmatpush.msrb.mxu3 %v4511_v5 }
 0x8a8   : > { %4908 = vmatpush.msra.mxu0 %v9280_v46  ;;  %4933 = vmatpush.msra.mxu1 %v9249_v56  ;;  %v4880_v17 = vsub.f32 %v9288_v59, %v4879_v11 }
 0x8a9   : > { %4814 = vmatmul.f32.vlgmr.msrb.gmra.mxu1 %v9200_v25  ;;  %4461 = vmatpush.msrb.mxu2 %v9085_v0 }
 0x8aa   : > { %4621 = vmatpush.msra.mxu3 %v9085_v0  ;;  %4911 = vmatpush.msra.mxu0 %v9288_v59  ;;  %v4867_v0 = vand.u32 4294901760, %v9271_v13  ;;  %v4881_v41 = vand.u32 4294901760, %v4880_v17 }
 0x8ab   : > { %4935 = vmatpush.msra.mxu1 %v9264_v53  ;;  %4463 = vmatpush.msrb.mxu2 %v9102_v35 }
 0x8ac   : > { %4623 = vmatpush.msra.mxu3 %v9102_v35  ;;  %v4868_v35 = vsub.f32 %v9271_v13, %v4867_v0 }
 0x8ad   : > { %4419 = vmatmul.f32.vlgmr.msra.gmra.mxu2 %v9200_v25  ;;  %4514 = vmatmul.f32.vlgmr.msrb.gmra.mxu3 %v9200_v25 }
 0x8ae   : > { %4937 = vmatpush.msra.mxu1 %v9273_v43  ;;  %4465 = vmatpush.msrb.mxu2 %v9117_v18 }
 0x8af   : > { %4914 = vmatmul.f32.vlgmr.msra.gmra.mxu0 %v9204_v38  ;;  %4625 = vmatpush.msra.mxu3 %v9117_v18  ;;  %v4863_v18 = vand.u32 4294901760, %v4862_v1 }
 0x8b0   : > { %4467 = vmatpush.msrb.mxu2 %v9136_v42 }
 0x8b1   : > { %4941 = vmatmul.f32.vlgmr.msra.gmra.mxu1 %v9211_v9  ;;  %4627 = vmatpush.msra.mxu3 %v9136_v42  ;;  %v4875_v42 = vand.u32 4294901760, %v4874_v31 }
 0x8b2   : > { %4590 = vmatpush.msra.mxu2 %v4491_v26  ;;  %v7826_v26 = vld [vmem:[%s9858_s4 + $0x6] ss:$0 sm:$0xff] }
 0x8b3   : > { %4746 = vmatpush.msrb.mxu3 %v9119_v24  ;;  %v4869_v24 = vand.u32 4294901760, %v4868_v35 }
 0x8b4   : > { %4594 = vmatpush.msra.mxu2 %v4497_v50 }
 0x8b5   : > { %4748 = vmatpush.msrb.mxu3 %v9141_v10  ;;  %4473 = vmatmul.f32.vlgmr.msrb.gmra.mxu2 %v9228_v22 }
 0x8b6   : > { %4629 = vmatmul.f32.vlgmr.msra.gmra.mxu3 %v9200_v25  ;;  %4598 = vmatpush.msra.mxu2 %v4503_v47 }
 0x8b7   : > { %4750 = vmatpush.msrb.mxu3 %v9154_v19  ;;  %v7827_v19 = vld [vmem:[%s9858_s4 + $0x4] ss:$0 sm:$0xff]  ;;  %s539_s4 = scalar_lea.vmem [#allocation2], %s7716_s19 }
 0x8b8   : > { %4602 = vmatpush.msra.mxu2 %v4509_v54 }
 0x8b9   : > { %4752 = vmatpush.msrb.mxu3 %v9166_v48 }
 0x8ba   : > { %4717 = vmatpush.msrb.mxu2 %v9139_v57 }
 0x8bb   : > { %4864 = vmatpush.msra.mxu3 %v4863_v18 }
 0x8bc   : > { %4720 = vmatpush.msrb.mxu2 %v9158_v36 }
 0x8bd   : > { %4870 = vmatpush.msra.mxu3 %v4869_v24  ;;  %4604 = vmatmul.f32.vlgmr.msra.gmra.mxu2 %v9200_v25 }
 0x8be   : > { %4756 = vmatmul.f32.vlgmr.msrb.gmra.mxu3 %v9211_v9  ;;  %4723 = vmatpush.msrb.mxu2 %v9169_v52 }
 0x8bf   : > { %4876 = vmatpush.msra.mxu3 %v4875_v42 }
 0x8c0   : > { %4726 = vmatpush.msrb.mxu2 %v9178_v2 }
 0x8c1   : > { %4882 = vmatpush.msra.mxu3 %v4881_v41 }
 0x8c2   : > { %4831 = vmatpush.msra.mxu2 %v9231_v28 }
 0x8c3   : > { %4991 = vmatpush.msrb.mxu3 %v9231_v28 }
 0x8c4   : > { %4833 = vmatpush.msra.mxu2 %v9249_v56 }
 0x8c5   : > { %4993 = vmatpush.msrb.mxu3 %v9249_v56  ;;  %4729 = vmatmul.f32.vlgmr.msrb.gmra.mxu2 %v9204_v38 }
 0x8c6   : > { %4884 = vmatmul.f32.vlgmr.msra.gmra.mxu3 %v9200_v25  ;;  %4835 = vmatpush.msra.mxu2 %v9264_v53 }
 0x8c7   : > { %4995 = vmatpush.msrb.mxu3 %v9264_v53 }
 0x8c8   : > { %4837 = vmatpush.msra.mxu2 %v9273_v43 }
 0x8c9   : > { %4997 = vmatpush.msrb.mxu3 %v9273_v43 }
 0x8ca   : > { %4960 = vmatpush.msrb.mxu2 %v4861_v49 }
 0x8cc   : > { %4964 = vmatpush.msrb.mxu2 %v4867_v0 }
 0x8cd   : > { %4843 = vmatmul.f32.vlgmr.msra.gmra.mxu2 %v9228_v22 }
 0x8ce   : > { %4999 = vmatmul.f32.vlgmr.msrb.gmra.mxu3 %v9200_v25  ;;  %4968 = vmatpush.msrb.mxu2 %v4873_v12 }
 0x8d0   : > { %4972 = vmatpush.msrb.mxu2 %v4879_v11 }
 0x8d5   : > { %4974 = vmatmul.f32.vlgmr.msrb.gmra.mxu2 %v9200_v25 }
 0x914   : > { %v4545_v40 = vpop.f32.mrf.mxu0 }
 0x916   : > { %v4572_v8 = vpop.f32.mrf.mxu1 }
 0x918   : > { %v4330_v57 = vpop.f32.mrf.mxu3 }
 0x91c   : > { %v4659_v50 = vpop.f32.mrf.mxu0 }
 0x91d   : > { %v4660_v47 = vadd.f32 %v7826_v26, %v4659_v50 }
 0x91e   : > { %v4700_v7 = vpop.f32.mrf.mxu1 }
 0x91f   : > { %v4701_v22 = vadd.f32 %v4700_v7, %v4660_v47 }
 0x920   : > { %v4289_v10 = vpop.f32.mrf.mxu2  ;;  %v4387_v15 = vpop.f32.mrf.mxu3 }
 0x921   : > { %v4290_v36 = vadd.f32 %v7827_v19, %v4289_v10 }
 0x923   : > { %v4331_v2 = vadd.f32 %v4330_v57, %v4290_v36 }
 0x924   : > { %v4790_v23 = vpop.f32.mrf.mxu0 }
 0x926   : > { %v4815_v39 = vpop.f32.mrf.mxu1 }
 0x928   : > { %v4360_v48 = vpop.f32.mrf.mxu2  ;;  %v4445_v52 = vpop.f32.mrf.mxu3 }
 0x929   : > { %v4361_v20 = vadd.f32 %v4360_v48, %v4331_v2 }
 0x92b   : > { %v4388_v27 = vadd.f32 %v4387_v15, %v4361_v20 }
 0x92c   : > { %v4915_v53 = vpop.f32.mrf.mxu0 }
 0x92e   : > { %v4942_v43 = vpop.f32.mrf.mxu1 }
 0x930   : > { %v4420_v33 = vpop.f32.mrf.mxu2  ;;  %v4515_v55 = vpop.f32.mrf.mxu3 }
 0x931   : > { %v4421_v44 = vadd.f32 %v4420_v33, %v4388_v27 }
 0x933   : > { %v9353_v61 = vadd.f32 %v4445_v52, %v4421_v44 }
 0x935   : > { %5004 = vrot.lane.b32.xlu0 %v9353_v61, %s7955_s18  ;;  %v5006_v1 = vsel %vm1630_vm2, %v9353_v61, 0 }
 0x936   : > { %v5027_v12 = vand.u32 4294901760, %v5006_v1 }
 0x938   : > { %v4474_v21 = vpop.f32.mrf.mxu2  ;;  %v5028_v11 = vsub.f32 %v5006_v1, %v5027_v12 }
 0x939   : > { %v4475_v34 = vadd.f32 %v7828_v62, %v4474_v21  ;;  %v4630_v16 = vpop.f32.mrf.mxu3 }
 0x93a   : > { %v5029_v42 = vand.u32 4294901760, %v5028_v11 }
 0x93b   : > { %v4516_v45 = vadd.f32 %v4515_v55, %v4475_v34 }
 0x93c   : > { %v5030_v36 = vsub.f32 %v5028_v11, %v5029_v42 }
 0x93d   : > { %v4546_v25 = vadd.f32 %v4545_v40, %v4516_v45 }
 0x93e   : > { %v5031_v27 = vand.u32 4294901760, %v5030_v36 }
 0x93f   : > { %v4573_v38 = vadd.f32 %v4572_v8, %v4546_v25 }
 0x940   : > { %v4605_v9 = vpop.f32.mrf.mxu2 }
 0x941   : > { %v4606_v6 = vadd.f32 %v4605_v9, %v4573_v38  ;;  %v4757_v37 = vpop.f32.mrf.mxu3 }
 0x943   : > { %v9363_v30 = vadd.f32 %v4630_v16, %v4606_v6 }
 0x945   : > { %5157 = vrot.lane.b32.xlu2 %v9363_v30, %s7955_s18  ;;  %v5159_v24 = vsel %vm1630_vm2, %v9363_v30, 0 }
 0x946   : > { %v5180_v57 = vand.u32 4294901760, %v5159_v24 }
 0x948   : > { %v4730_v3 = vpop.f32.mrf.mxu2  ;;  %v5181_v2 = vsub.f32 %v5159_v24, %v5180_v57 }
 0x949   : > { %v4731_v28 = vadd.f32 %v4730_v3, %v4701_v22  ;;  %v4885_v58 = vpop.f32.mrf.mxu3 }
 0x94a   : > { %v5182_v44 = vand.u32 4294901760, %v5181_v2 }
 0x94b   : > { %v4758_v54 = vadd.f32 %v4757_v37, %v4731_v28 }
 0x94c   : > { %v5183_v40 = vsub.f32 %v5181_v2, %v5182_v44 }
 0x94d   : > { %v4791_v32 = vadd.f32 %v4790_v23, %v4758_v54 }
 0x94e   : > { %v5184_v21 = vand.u32 4294901760, %v5183_v40 }
 0x94f   : > { %v9370_v56 = vadd.f32 %v4815_v39, %v4791_v32 }
 0x950   : > { %v4844_v29 = vpop.f32.mrf.mxu2 }
 0x951   : > { %v4845_v4 = vadd.f32 %v7829_v63, %v4844_v29  ;;  %5310 = vrot.lane.b32.xlu1 %v9370_v56, %s7955_s18  ;;  %v5000_v49 = vpop.f32.mrf.mxu3  ;;  %v5312_v8 = vsel %vm1630_vm2, %v9370_v56, 0 }
 0x952   : > { %v5333_v34 = vand.u32 4294901760, %v5312_v8 }
 0x953   : > { %v4886_v51 = vadd.f32 %v4885_v58, %v4845_v4 }
 0x954   : > { %v5334_v45 = vsub.f32 %v5312_v8, %v5333_v34 }
 0x955   : > { %v4916_v13 = vadd.f32 %v4915_v53, %v4886_v51 }
 0x956   : > { %v5335_v16 = vand.u32 4294901760, %v5334_v45 }
 0x957   : > { %v4943_v5 = vadd.f32 %v4942_v43, %v4916_v13 }
 0x958   : > { %v4975_v46 = vpop.f32.mrf.mxu2  ;;  %v5336_v9 = vsub.f32 %v5334_v45, %v5335_v16 }
 0x959   : > { %v4976_v59 = vadd.f32 %v4975_v46, %v4943_v5 }
 0x95a   : > { %v5337_v37 = vand.u32 4294901760, %v5336_v9 }
 0x95b   : > { %v9374_v0 = vadd.f32 %v5000_v49, %v4976_v59 }
 0x95d   : > { %5463 = vrot.lane.b32.xlu0 %v9374_v0, %s7955_s18  ;;  %v5465_v25 = vsel %vm1630_vm2, %v9374_v0, 0  ;;  %s7770_s18 = sshll.u32 %s8069_s28, 3  ;;  %s7650_s28 = sshll.u32 %s539_s4, 4  ;;  %s7651_s28 = int_to_ptr.vmem [resolvable:$true] %s7650_s28 }
 0x95e   : > { %v5486_v38 = vand.u32 4294901760, %v5465_v25  ;;  %s7648_s22 = scalar_lea.hbm %s9842_s17, %s7770_s18 }
 0x960   : > { %v5487_v47 = vsub.f32 %v5465_v25, %v5486_v38 }
 0x962   : > { %v5488_v28 = vand.u32 4294901760, %v5487_v47 }
 0x964   : > { %v5489_v32 = vsub.f32 %v5487_v47, %v5488_v28 }
 0x966   : > { %v5490_v29 = vand.u32 4294901760, %v5489_v32 }
 0x99f   : > { %v5158_v35 = vpop.permute.xlu2 %5157 }
 0x9a0   : > { %v5161_v18 = vsel %vm1630_vm2, %v5158_v35, 0 }
 0x9a1   : > { %v5178_v31 = vand.u32 4294901760, %v5161_v18 }
 0x9a3   : > { %v5205_v17 = vsub.f32 %v5161_v18, %v5178_v31 }
 0x9a5   : > { %v5206_v41 = vand.u32 4294901760, %v5205_v17 }
 0x9a7   : > { %v5207_v10 = vsub.f32 %v5205_v17, %v5206_v41  ;;  %v5005_v15 = vpop.permute.xlu0 %5004 }
 0x9a8   : > { %v5008_v19 = vsel %vm1630_vm2, %v5005_v15, 0 }
 0x9a9   : > { %v5208_v48 = vand.u32 4294901760, %v5207_v10  ;;  %v5025_v52 = vand.u32 4294901760, %v5008_v19 }
 0x9ab   : > { %v5052_v20 = vsub.f32 %v5008_v19, %v5025_v52  ;;  %5026 = vmatpush.xpose.msrb.mxu0 %v5025_v52  ;;  %5102 = vmatpush.xpose.msra.mxu3 %v5025_v52 }
 0x9ad   : > { %v5053_v33 = vand.u32 4294901760, %v5052_v20  ;;  %5079 = vmatpush.xpose.msra.mxu2 %v5052_v20 }
 0x9ae   : > { %5032 = vmatmul.f32.vlgmr.msrb.gmra.mxu0 %v5031_v27  ;;  %5106 = vmatmul.f32.vlgmr.msra.gmra.mxu3 %v5029_v42 }
 0x9af   : > { %5209 = vmatpush.xpose.msrb.mxu3 %v5208_v48  ;;  %v5054_v55 = vsub.f32 %v5052_v20, %v5053_v33  ;;  %5128 = vmatpush.xpose.msra.mxu0 %v5053_v33 }
 0x9b0   : > { %5082 = vmatmul.f32.vlgmr.msra.gmra.mxu2 %v5028_v11 }
 0x9b1   : > { %5179 = vmatpush.xpose.msrb.mxu2 %v5178_v31  ;;  %v5055_v62 = vand.u32 4294901760, %v5054_v55 }
 0x9b3   : > { %5303 = vmatpush.xpose.msra.mxu3 %v5178_v31  ;;  %5232 = vmatpush.xpose.msrb.mxu0 %v5205_v17 }
 0x9b4   : > { %5056 = vmatpush.xpose.msrb.mxu1 %v5055_v62 }
 0x9b5   : > { %5281 = vmatpush.xpose.msra.mxu2 %v5206_v41 }
 0x9b6   : > { %5130 = vmatmul.f32.vlgmr.msra.gmra.mxu0 %v5027_v12  ;;  %5211 = vmatmul.f32.vlgmr.msrb.gmra.mxu3 %v5180_v57 }
 0x9b7   : > { %5058 = vmatmul.f32.vlgmr.msrb.gmra.mxu1 %v5027_v12 }
 0x9b8   : > { %5150 = vmatpush.xpose.msra.mxu1 %v5025_v52  ;;  %5185 = vmatmul.f32.vlgmr.msrb.gmra.mxu2 %v5184_v21 }
 0x9bc   : > { %5255 = vmatpush.xpose.msrb.mxu1 %v5178_v31 }
 0x9be   : > { %5235 = vmatmul.f32.vlgmr.msrb.gmra.mxu0 %v5181_v2  ;;  %5305 = vmatmul.f32.vlgmr.msra.gmra.mxu3 %v5180_v57 }
 0x9bf   : > { %5152 = vmatmul.f32.vlgmr.msra.gmra.mxu1 %v5027_v12 }
 0x9c0   : > { %5283 = vmatmul.f32.vlgmr.msra.gmra.mxu2 %v5180_v57 }
 0x9c3   : > { %v5311_v26 = vpop.permute.xlu1 %5310 }
 0x9c4   : > { %v5314_v50 = vsel %vm1630_vm2, %v5311_v26, 0 }
 0x9c5   : > { %v5331_v6 = vand.u32 4294901760, %v5314_v50 }
 0x9c7   : > { %5259 = vmatmul.f32.vlgmr.msrb.gmra.mxu1 %v5182_v44  ;;  %v5358_v7 = vsub.f32 %v5314_v50, %v5331_v6  ;;  %5332 = vmatpush.xpose.msra.mxu0 %v5331_v6 }
 0x9c8   : > { %5408 = vmatpush.xpose.msrb.mxu3 %v5331_v6 }
 0x9c9   : > { %v5359_v22 = vand.u32 4294901760, %v5358_v7  ;;  %5385 = vmatpush.xpose.msrb.mxu2 %v5358_v7 }
 0x9ca   : > { %5338 = vmatmul.f32.vlgmr.msra.gmra.mxu0 %v5337_v37 }
 0x9cb   : > { %5412 = vmatmul.f32.vlgmr.msrb.gmra.mxu3 %v5335_v16  ;;  %v5360_v3 = vsub.f32 %v5358_v7, %v5359_v22  ;;  %5434 = vmatpush.xpose.msrb.mxu0 %v5359_v22 }
 0x9cc   : > { %5388 = vmatmul.f32.vlgmr.msrb.gmra.mxu2 %v5334_v45 }
 0x9cd   : > { %v5361_v23 = vand.u32 4294901760, %v5360_v3 }
 0x9cf   : > { %v5464_v54 = vpop.permute.xlu0 %5463  ;;  %5362 = vmatpush.xpose.msra.mxu1 %v5361_v23 }
 0x9d0   : > { %v5467_v39 = vsel %vm1630_vm2, %v5464_v54, 0 }
 0x9d1   : > { %v5484_v63 = vand.u32 4294901760, %v5467_v39 }
 0x9d2   : > { %5364 = vmatmul.f32.vlgmr.msra.gmra.mxu1 %v5333_v34  ;;  %5436 = vmatmul.f32.vlgmr.msrb.gmra.mxu0 %v5333_v34 }
 0x9d3   : > { %5456 = vmatpush.xpose.msrb.mxu1 %v5331_v6  ;;  %v5511_v58 = vsub.f32 %v5467_v39, %v5484_v63  ;;  %5485 = vmatpush.xpose.msra.mxu2 %v5484_v63 }
 0x9d5   : > { %v5512_v4 = vand.u32 4294901760, %v5511_v58  ;;  %5538 = vmatpush.xpose.msra.mxu0 %v5511_v58 }
 0x9d6   : > { %5491 = vmatmul.f32.vlgmr.msra.gmra.mxu2 %v5490_v29 }
 0x9d7   : > { %5561 = vmatpush.xpose.msra.mxu1 %v5484_v63  ;;  %v5513_v51 = vsub.f32 %v5511_v58, %v5512_v4  ;;  %5587 = vmatpush.xpose.msrb.mxu2 %v5512_v4 }
 0x9d9   : > { %v5514_v53 = vand.u32 4294901760, %v5513_v51 }
 0x9da   : > { %5458 = vmatmul.f32.vlgmr.msrb.gmra.mxu1 %v5333_v34  ;;  %5541 = vmatmul.f32.vlgmr.msra.gmra.mxu0 %v5487_v47 }
 0x9db   : > { %5515 = vmatpush.xpose.msra.mxu3 %v5514_v53 }
 0x9de   : > { %5517 = vmatmul.f32.vlgmr.msra.gmra.mxu3 %v5486_v38  ;;  %5589 = vmatmul.f32.vlgmr.msrb.gmra.mxu2 %v5486_v38 }
 0x9df   : > { %5609 = vmatpush.xpose.msrb.mxu3 %v5484_v63 }
 0x9e2   : > { %5565 = vmatmul.f32.vlgmr.msra.gmra.mxu1 %v5488_v28 }
 0x9e6   : > { %5611 = vmatmul.f32.vlgmr.msrb.gmra.mxu3 %v5486_v38 }
 0xa2b   : > { %v5033_v13 = vpop.f32.mrf.mxu0 }
 0xa31   : > { %v5107_v43 = vpop.f32.mrf.mxu3 }
 0xa33   : > { %v5083_v46 = vpop.f32.mrf.mxu2  ;;  %v5131_v1 = vpop.f32.mrf.mxu0 }
 0xa34   : > { %v5059_v5 = vpop.f32.mrf.mxu1 }
 0xa35   : > { %v5060_v59 = vadd.f32 %v5059_v5, %v5033_v13 }
 0xa37   : > { %v5084_v49 = vadd.f32 %v5083_v46, %v5060_v59 }
 0xa39   : > { %v5108_v12 = vadd.f32 %v5107_v43, %v5084_v49  ;;  %v5212_v24 = vpop.f32.mrf.mxu3 }
 0xa3b   : > { %v5132_v35 = vadd.f32 %v5131_v1, %v5108_v12  ;;  %v5186_v18 = vpop.f32.mrf.mxu2  ;;  %v5236_v41 = vpop.f32.mrf.mxu0 }
 0xa3c   : > { %v5153_v11 = vpop.f32.mrf.mxu1  ;;  %v5213_v17 = vadd.f32 %v5212_v24, %v5186_v18 }
 0xa3d   : > { %v5154_v31 = vadd.f32 %v5153_v11, %v5132_v35 }
 0xa3e   : > { %v5237_v57 = vadd.f32 %v5236_v41, %v5213_v17 }
 0xa3f   : > { %v5615_v42 = vsel %vm1630_vm2, %v5154_v31, -inf }
 0xa40   : > { %5616 = vmax.xlane.f32.xlu2 %v5615_v42 }
 0xa41   : > { %v5306_v48 = vpop.f32.mrf.mxu3 }
 0xa43   : > { %v5284_v19 = vpop.f32.mrf.mxu2 }
 0xa44   : > { %v5260_v10 = vpop.f32.mrf.mxu1 }
 0xa45   : > { %v5261_v15 = vadd.f32 %v5260_v10, %v5237_v57 }
 0xa47   : > { %v5285_v36 = vadd.f32 %v5284_v19, %v5261_v15  ;;  %v5339_v20 = vpop.f32.mrf.mxu0 }
 0xa49   : > { %v5307_v52 = vadd.f32 %v5306_v48, %v5285_v36 }
 0xa4b   : > { %v5618_v2 = vsel %vm1630_vm2, %v5307_v52, -inf }
 0xa4c   : > { %5619 = vmax.xlane.f32.xlu0 %v5618_v2 }
 0xa4e   : > { %v5413_v62 = vpop.f32.mrf.mxu3 }
 0xa4f   : > { %v5365_v27 = vpop.f32.mrf.mxu1  ;;  %v5389_v44 = vpop.f32.mrf.mxu2 }
 0xa50   : > { %v5366_v33 = vadd.f32 %v5365_v27, %v5339_v20  ;;  %v5437_v8 = vpop.f32.mrf.mxu0 }
 0xa52   : > { %v5390_v55 = vadd.f32 %v5389_v44, %v5366_v33 }
 0xa54   : > { %v5414_v40 = vadd.f32 %v5413_v62, %v5390_v55 }
 0xa56   : > { %v5438_v21 = vadd.f32 %v5437_v8, %v5414_v40 }
 0xa57   : > { %v5459_v34 = vpop.f32.mrf.mxu1 }
 0xa58   : > { %v5460_v45 = vadd.f32 %v5459_v34, %v5438_v21  ;;  %v5542_v50 = vpop.f32.mrf.mxu0 }
 0xa59   : > { %v5492_v25 = vpop.f32.mrf.mxu2 }
 0xa5a   : > { %v5621_v16 = vsel %vm1630_vm2, %v5460_v45, -inf }
 0xa5b   : > { %5622 = vmax.xlane.f32.xlu1 %v5621_v16 }
 0xa5f   : > { %v5566_v6 = vpop.f32.mrf.mxu1 }
 0xa61   : > { %v5518_v26 = vpop.f32.mrf.mxu3  ;;  %v5590_v47 = vpop.f32.mrf.mxu2 }
 0xa62   : > { %v5519_v38 = vadd.f32 %v5518_v26, %v5492_v25 }
 0xa64   : > { %v5543_v9 = vadd.f32 %v5542_v50, %v5519_v38 }
 0xa66   : > { %v5567_v7 = vadd.f32 %v5566_v6, %v5543_v9 }
 0xa68   : > { %v5591_v37 = vadd.f32 %v5590_v47, %v5567_v7 }
 0xa69   : > { %v5612_v22 = vpop.f32.mrf.mxu3 }
 0xa6a   : > { %v5613_v3 = vadd.f32 %v5612_v22, %v5591_v37 }
 0xa6c   : > { %v5624_v28 = vsel %vm1630_vm2, %v5613_v3, -inf }
 0xa6d   : > { %5625 = vmax.xlane.f32.xlu2 %v5624_v28 }
 0xab3   : > { %v5617_v23 = vpop.xlane.xlu2 %5616 }
 0xab4   : > { %v5627_v54 = vsub.f32 %v5154_v31, %v5617_v23 }
 0xab6   : > { %v5631_v39 = vmul.f32 1.442695, %v5627_v54 }
 0xab8   : > { %7865 = vpow2.f32 %v5631_v39 }
 0xabe   : > { %v7866_v32 = vpop.eup %7865 }
 0xabf   : > { %v5620_v63 = vpop.xlane.xlu0 %5619  ;;  %v5639_v58 = vsel %vm1630_vm2, %v7866_v32, 0.0 }
 0xac0   : > { %v5628_v29 = vsub.f32 %v5307_v52, %v5620_v63  ;;  %5640 = vadd.xlane.f32.xlu0 %v5639_v58 }
 0xac2   : > { %v5633_v4 = vmul.f32 1.442695, %v5628_v29 }
 0xac4   : > { %7867 = vpow2.f32 %v5633_v4 }
 0xaca   : > { %v9395_v51 = vpop.eup %7867 }
 0xacb   : > { %v5642_v53 = vsel %vm1630_vm2, %v9395_v51, 0.0 }
 0xacc   : > { %5643 = vadd.xlane.f32.xlu2 %v5642_v53 }
 0xace   : > { %v5623_v13 = vpop.xlane.xlu1 %5622 }
 0xacf   : > { %v5629_v43 = vsub.f32 %v5460_v45, %v5623_v13 }
 0xad1   : > { %v5635_v5 = vmul.f32 1.442695, %v5629_v43 }
 0xad3   : > { %7869 = vpow2.f32 %v5635_v5 }
 0xad4   : > { %5711 = vrot.lane.b32.xlu0 %v9353_v61, %s7956_s23 }
 0xad9   : > { %v9401_v46 = vpop.eup %7869 }
 0xada   : > { %v5645_v59 = vsel %vm1630_vm2, %v9401_v46, 0.0 }
 0xadb   : > { %5646 = vadd.xlane.f32.xlu1 %v5645_v59 }
 0xadc   : > { %6167 = vrot.lane.b32.xlu0 %v9374_v0, %s7956_s23 }
 0xae0   : > { %v5626_v49 = vpop.xlane.xlu2 %5625 }
 0xae1   : > { %v5630_v1 = vsub.f32 %v5613_v3, %v5626_v49 }
 0xae3   : > { %v5637_v12 = vmul.f32 1.442695, %v5630_v1 }
 0xae4   : > { %5863 = vrot.lane.b32.xlu2 %v9363_v30, %s7956_s23 }
 0xae5   : > { %7871 = vpow2.f32 %v5637_v12 }
 0xaeb   : > { %v9409_v35 = vpop.eup %7871 }
 0xaec   : > { %v5648_v61 = vsel %vm1630_vm2, %v9409_v35, 0.0 }
 0xaed   : > { %5649 = vadd.xlane.f32.xlu1 %v5648_v61 }
 0xb06   : > { %6015 = vrot.lane.b32.xlu1 %v9370_v56, %s7956_s23  ;;  %s7638_s23 = scalar_lea.sflag [#allocation3], %s537_s26 }
 0xb33   : > { %v5641_v11 = vpop.xlane.xlu0 %5640 }
 0xb34   : > { %7873 = vrcp.f32 %v5641_v11  ;;  %v5662_v24 = vand.u32 2147483648, %v5641_v11  ;;  %v5660_v42 = vand.u32 2147483647, %v5641_v11  ;;  %vm5656_vm4 = vweird.f32 %v5641_v11 }
 0xb36   : > { %v5663_v57 = vor.u32 1.1754944e-38, %v5662_v24  ;;  %vm5661_vm6 = vcmp.eq.f32.partialorder %v5660_v42, 8.507059e+37 }
 0xb3a   : > { %v7874_v18 = vpop.eup %7873 }
 0xb3b   : > { %v5652_v0 = vmul.f32 %v7874_v18, %v5641_v11  ;;  %vm5657_vm3 = vweird.f32 %v7874_v18 }
 0xb3c   : > { %vm5658_vm5 = vmor %vm5656_vm4, %vm5657_vm3 }
 0xb3d   : > { %v5653_v31 = vsub.f32 1.0, %v5652_v0 }
 0xb3f   : > { %v5654_v17 = vmul.f32 %v7874_v18, %v5653_v31  ;;  %v5644_v30 = vpop.xlane.xlu2 %5643 }
 0xb40   : > { %7875 = vrcp.f32 %v5644_v30  ;;  %v5677_v62 = vand.u32 2147483648, %v5644_v30  ;;  %v5675_v34 = vand.u32 2147483647, %v5644_v30  ;;  %vm5671_vm8 = vweird.f32 %v5644_v30 }
 0xb41   : > { %v5655_v41 = vadd.f32 %v7874_v18, %v5654_v17 }
 0xb42   : > { %v5678_v50 = vor.u32 1.1754944e-38, %v5677_v62  ;;  %vm5676_vm10 = vcmp.eq.f32.partialorder %v5675_v34, 8.507059e+37 }
 0xb43   : > { %v5659_v10 = vsel %vm5658_vm5, %v7874_v18, %v5655_v41 }
 0xb44   : > { %v5664_v15 = vsel %vm5661_vm6, %v5663_v57, %v5659_v10 }
 0xb45   : > { %v5665_v19 = vmul.f32 %v7866_v32, %v5664_v15 }
 0xb46   : > { %v7876_v56 = vpop.eup %7875  ;;  %v5712_v36 = vpop.permute.xlu0 %5711 }
 0xb47   : > { %v5667_v48 = vmul.f32 %v7876_v56, %v5644_v30  ;;  %v5732_v52 = vand.u32 4294901760, %v5712_v36  ;;  %v5864_v2 = vpop.permute.xlu2 %5863  ;;  %v5715_v20 = vsel %vm1630_vm2, %v5665_v19, 0  ;;  %vm5672_vm7 = vweird.f32 %v7876_v56 }
 0xb48   : > { %v5884_v27 = vand.u32 4294901760, %v5864_v2  ;;  %v5734_v33 = vand.u32 4294901760, %v5715_v20  ;;  %vm5673_vm9 = vmor %vm5671_vm8, %vm5672_vm7 }
 0xb49   : > { %v5668_v44 = vsub.f32 1.0, %v5667_v48  ;;  %v5759_v55 = vsub.f32 %v5712_v36, %v5732_v52  ;;  %5733 = vmatpush.msrb.mxu0 %v5732_v52  ;;  %5809 = vmatpush.msra.mxu3 %v5732_v52 }
 0xb4a   : > { %v5911_v40 = vsub.f32 %v5864_v2, %v5884_v27  ;;  %v5735_v8 = vsub.f32 %v5715_v20, %v5734_v33 }
 0xb4b   : > { %v5669_v21 = vmul.f32 %v7876_v56, %v5668_v44  ;;  %v5760_v45 = vand.u32 4294901760, %v5759_v55  ;;  %5786 = vmatpush.msra.mxu2 %v5759_v55 }
 0xb4c   : > { %v5912_v16 = vand.u32 4294901760, %v5911_v40  ;;  %5789 = vmatmul.f32.vlgmr.msra.gmra.mxu2 %v5735_v8  ;;  %v5736_v25 = vand.u32 4294901760, %v5735_v8 }
 0xb4d   : > { %v5670_v26 = vadd.f32 %v7876_v56, %v5669_v21  ;;  %v5761_v38 = vsub.f32 %v5759_v55, %v5760_v45  ;;  %5885 = vmatpush.msrb.mxu2 %v5884_v27  ;;  %5835 = vmatpush.msra.mxu0 %v5760_v45 }
 0xb4e   : > { %v5913_v9 = vsub.f32 %v5911_v40, %v5912_v16  ;;  %5813 = vmatmul.f32.vlgmr.msra.gmra.mxu3 %v5736_v25  ;;  %v5737_v6 = vsub.f32 %v5735_v8, %v5736_v25  ;;  %v5647_v37 = vpop.xlane.xlu1 %5646  ;;  %v6168_v31 = vpop.permute.xlu0 %6167 }
 0xb4f   : > { %5987 = vmatpush.msra.mxu2 %v5912_v16  ;;  %v5674_v7 = vsel %vm5673_vm9, %v7876_v56, %v5670_v26  ;;  %v5762_v47 = vand.u32 4294901760, %v5761_v38  ;;  %7877 = vrcp.f32 %v5647_v37  ;;  %v5692_v13 = vand.u32 2147483648, %v5647_v37 }
 0xb50   : > { %v5679_v22 = vsel %vm5676_vm10, %v5678_v50, %v5674_v7  ;;  %v5914_v3 = vand.u32 4294901760, %v5913_v9  ;;  %v5738_v23 = vand.u32 4294901760, %v5737_v6  ;;  %v5690_v43 = vand.u32 2147483647, %v5647_v37  ;;  %v7738_v9 = vld [vmem:[%s9861_s5 + $0x20] sm:$0xff] }
 0xb51   : > { %v5680_v28 = vmul.f32 %v9395_v51, %v5679_v22  ;;  %5763 = vmatpush.msrb.mxu1 %v5762_v47  ;;  %vm5686_vm12 = vweird.f32 %v5647_v37  ;;  %v5693_v1 = vor.u32 1.1754944e-38, %v5692_v13  ;;  %v6188_v30 = vand.u32 4294901760, %v6168_v31 }
 0xb52   : > { %5765 = vmatmul.f32.vlgmr.msrb.gmra.mxu1 %v5734_v33  ;;  %5915 = vmatpush.msrb.mxu3 %v5914_v3  ;;  %vm5691_vm14 = vcmp.eq.f32.partialorder %v5690_v43, 8.507059e+37  ;;  %v6342_v6 = vand.u32 4294901760, %v7738_v9  ;;  %v7739_v3 = vld [vmem:[%s9861_s5 + $0x28] sm:$0xff] }
 0xb53   : > { %5857 = vmatpush.msra.mxu1 %v5732_v52  ;;  %v5867_v54 = vsel %vm1630_vm2, %v5680_v28, 0  ;;  %5739 = vmatmul.f32.vlgmr.msrb.gmra.mxu0 %v5738_v23  ;;  %v6215_v56 = vsub.f32 %v6168_v31, %v6188_v30  ;;  %v6491_v28 = vand.u32 4294901760, %v7739_v3 }
 0xb54   : > { %6009 = vmatpush.msra.mxu3 %v5884_v27  ;;  %v5886_v39 = vand.u32 4294901760, %v5867_v54  ;;  %5938 = vmatpush.msrb.mxu0 %v5911_v40  ;;  %v6369_v7 = vsub.f32 %v7738_v9, %v6342_v6 }
 0xb55   : > { %5961 = vmatpush.msrb.mxu1 %v5884_v27  ;;  %v7878_v32 = vpop.eup %7877  ;;  %v6216_v20 = vand.u32 4294901760, %v6215_v56  ;;  %v6518_v23 = vsub.f32 %v7739_v3, %v6491_v28 }
 0xb56   : > { %v5887_v63 = vsub.f32 %v5867_v54, %v5886_v39  ;;  %5917 = vmatmul.f32.vlgmr.msrb.gmra.mxu3 %v5886_v39  ;;  %v5682_v58 = vmul.f32 %v7878_v32, %v5647_v37  ;;  %vm5687_vm11 = vweird.f32 %v7878_v32  ;;  %v6370_v47 = vand.u32 4294901760, %v6369_v7 }
 0xb57   : > { %vm5688_vm13 = vmor %vm5686_vm12, %vm5687_vm11  ;;  %v6217_v55 = vsub.f32 %v6215_v56, %v6216_v20  ;;  %v6519_v54 = vand.u32 4294901760, %v6518_v23 }
 0xb58   : > { %v5888_v29 = vand.u32 4294901760, %v5887_v63  ;;  %v5683_v4 = vsub.f32 1.0, %v5682_v58  ;;  %v6371_v37 = vsub.f32 %v6369_v7, %v6370_v47 }
 0xb59   : > { %v6218_v34 = vand.u32 4294901760, %v6217_v55 }
 0xb5a   : > { %5859 = vmatmul.f32.vlgmr.msra.gmra.mxu1 %v5734_v33  ;;  %v5889_v51 = vsub.f32 %v5887_v63, %v5888_v29  ;;  %v5684_v53 = vmul.f32 %v7878_v32, %v5683_v4  ;;  %v6372_v22 = vand.u32 4294901760, %v6371_v37 }
 0xb5b   : > { %5837 = vmatmul.f32.vlgmr.msra.gmra.mxu0 %v5734_v33 }
 0xb5c   : > { %v5890_v5 = vand.u32 4294901760, %v5889_v51  ;;  %v5685_v59 = vadd.f32 %v7878_v32, %v5684_v53 }
 0xb5e   : > { %5891 = vmatmul.f32.vlgmr.msrb.gmra.mxu2 %v5890_v5  ;;  %6011 = vmatmul.f32.vlgmr.msra.gmra.mxu3 %v5886_v39  ;;  %v5689_v49 = vsel %vm5688_vm13, %v7878_v32, %v5685_v59  ;;  %v6520_v32 = vsub.f32 %v6518_v23, %v6519_v54 }
 0xb5f   : > { %v5694_v12 = vsel %vm5691_vm14, %v5693_v1, %v5689_v49 }
 0xb60   : > { %v5650_v61 = vpop.xlane.xlu1 %5649  ;;  %v5695_v11 = vmul.f32 %v9401_v46, %v5694_v12  ;;  %v6521_v58 = vand.u32 4294901760, %v6520_v32 }
 0xb61   : > { %7879 = vrcp.f32 %v5650_v61  ;;  %v5707_v41 = vand.u32 2147483648, %v5650_v61  ;;  %v5705_v10 = vand.u32 2147483647, %v5650_v61  ;;  %vm5701_vm0 = vweird.f32 %v5650_v61 }
 0xb62   : > { %5965 = vmatmul.f32.vlgmr.msrb.gmra.mxu1 %v5888_v29  ;;  %v6019_v0 = vsel %vm1630_vm2, %v5695_v11, 0 }
 0xb63   : > { %5941 = vmatmul.f32.vlgmr.msrb.gmra.mxu0 %v5887_v63  ;;  %v6038_v17 = vand.u32 4294901760, %v6019_v0  ;;  %v5708_v46 = vor.u32 1.1754944e-38, %v5707_v41  ;;  %vm5706_vm4 = vcmp.eq.f32.partialorder %v5705_v10, 8.507059e+37 }
 0xb65   : > { %v6039_v15 = vsub.f32 %v6019_v0, %v6038_v17 }
 0xb66   : > { %5989 = vmatmul.f32.vlgmr.msra.gmra.mxu2 %v5886_v39 }
 0xb67   : > { %v7880_v18 = vpop.eup %7879  ;;  %v6040_v2 = vand.u32 4294901760, %v6039_v15 }
 0xb68   : > { %v5697_v24 = vmul.f32 %v7880_v18, %v5650_v61  ;;  %vm5702_vm15 = vweird.f32 %v7880_v18 }
 0xb69   : > { %vm5703_vm3 = vmor %vm5701_vm0, %vm5702_vm15  ;;  %v6041_v44 = vsub.f32 %v6039_v15, %v6040_v2 }
 0xb6a   : > { %v5698_v42 = vsub.f32 1.0, %v5697_v24 }
 0xb6b   : > { %v6042_v21 = vand.u32 4294901760, %v6041_v44 }
 0xb6c   : > { %v5699_v57 = vmul.f32 %v7880_v18, %v5698_v42 }
 0xb6e   : > { %v5700_v19 = vadd.f32 %v7880_v18, %v5699_v57  ;;  %v7740_v57 = vld [vmem:[%s9861_s5 + $0x30] sm:$0xff] }
 0xb70   : > { %v5704_v36 = vsel %vm5703_vm3, %v7880_v18, %v5700_v19 }
 0xb71   : > { %v5709_v48 = vsel %vm5706_vm4, %v5708_v46, %v5704_v36 }
 0xb72   : > { %v5710_v52 = vmul.f32 %v9409_v35, %v5709_v48 }
 0xb74   : > { %v6171_v27 = vsel %vm1630_vm2, %v5710_v52, 0 }
 0xb75   : > { %v6190_v33 = vand.u32 4294901760, %v6171_v27 }
 0xb77   : > { %v6191_v40 = vsub.f32 %v6171_v27, %v6190_v33 }
 0xb78   : > { %v6016_v62 = vpop.permute.xlu1 %6015 }
 0xb79   : > { %v6036_v8 = vand.u32 4294901760, %v6016_v62  ;;  %v6192_v16 = vand.u32 4294901760, %v6191_v40 }
 0xb7b   : > { %v6063_v45 = vsub.f32 %v6016_v62, %v6036_v8  ;;  %6037 = vmatpush.msra.mxu0 %v6036_v8  ;;  %6113 = vmatpush.msrb.mxu3 %v6036_v8  ;;  %v6193_v26 = vsub.f32 %v6191_v40, %v6192_v16  ;;  %v7741_v62 = vld [vmem:[%s9861_s5 + $0x38] sm:$0xff]  ;;  %s7652_s5 = sshll.u32 %s7648_s22, 4  ;;  %s7653_s5 = int_to_ptr.hbm [resolvable:$true] %s7652_s5 }
 0xb7c   : > { %6043 = vmatmul.f32.vlgmr.msra.gmra.mxu0 %v6042_v21  ;;  %6117 = vmatmul.f32.vlgmr.msrb.gmra.mxu3 %v6040_v2  ;;  %s7905_s30 = sshra.s32 %s7653_s5, 4  ;;  %s7906_s30 = int_to_ptr.hbm [resolvable:$true] %s7905_s30 }
 0xb7d   : > { %v6064_v25 = vand.u32 4294901760, %v6063_v45  ;;  %6219 = vmatpush.msra.mxu3 %v6218_v34  ;;  %6090 = vmatpush.msrb.mxu2 %v6063_v45  ;;  %v6194_v50 = vand.u32 4294901760, %v6193_v26  ;;  %s7907_s18 = scalar_lea.hbm %s7906_s30, 8  ;;  %p7912_p0 = scmp.lt.s32.totalorder %s7906_s30, %s9842_s17 }
 0xb7e   : > { %6093 = vmatmul.f32.vlgmr.msrb.gmra.mxu2 %v6039_v15  ;;  %v6640_v15 = vand.u32 4294901760, %v7740_v57  ;;  %p7908_p11 = scmp.ne.s32.totalorder %s7906_s30, %s7907_s18  ;;  %p7913_p1 = scmp.lt.s32.totalorder %s7911_s3, %s7907_s18 }
 0xb7f   : > { %6313 = vmatpush.msrb.mxu3 %v6188_v30  ;;  %v6065_v35 = vsub.f32 %v6063_v45, %v6064_v25  ;;  %6189 = vmatpush.msra.mxu2 %v6188_v30 }
 0xb80   : > { %6139 = vmatpush.msrb.mxu0 %v6064_v25  ;;  %v6667_v46 = vsub.f32 %v7740_v57, %v6640_v15  ;;  %p7909_p12 = pnand %p7908_p11, %p8086_p5  ;;  %p7914_p2 = por %p7913_p1, %p7912_p0 }
 0xb81   : > { %6291 = vmatpush.msrb.mxu2 %v6216_v20  ;;  %v6066_v38 = vand.u32 4294901760, %v6065_v35 }
 0xb82   : > { %6242 = vmatpush.msra.mxu0 %v6215_v56  ;;  %v6668_v52 = vand.u32 4294901760, %v6667_v46  ;;  %p7910_p13 = pneg %p7909_p12 }
 0xb83   : > { %6067 = vmatpush.msra.mxu1 %v6066_v38 }
 0xb84   : > { %6069 = vmatmul.f32.vlgmr.msra.gmra.mxu1 %v6038_v17  ;;  %6141 = vmatmul.f32.vlgmr.msrb.gmra.mxu0 %v6038_v17  ;;  %v6669_v20 = vsub.f32 %v6667_v46, %v6668_v52  ;;  %p7915_p3 = pnand %p7914_p2, %p7910_p13 }
 0xb85   : > { %6161 = vmatpush.msrb.mxu1 %v6036_v8  ;;  %6221 = vmatmul.f32.vlgmr.msra.gmra.mxu3 %v6190_v33 }
 0xb86   : > { %6195 = vmatmul.f32.vlgmr.msra.gmra.mxu2 %v6194_v50  ;;  %6419 = vmatpush.msra.mxu3 %v6342_v6 }
 0xb87   : > { %6265 = vmatpush.msra.mxu1 %v6188_v30  ;;  %6343 = vmatpush.msrb.mxu0 %v6342_v6 }
 0xb88   : > { %6396 = vmatpush.msra.mxu2 %v6369_v7 }
 0xb8c   : > { %6163 = vmatmul.f32.vlgmr.msrb.gmra.mxu1 %v6038_v17  ;;  %6245 = vmatmul.f32.vlgmr.msra.gmra.mxu0 %v6191_v40  ;;  %v6789_v40 = vand.u32 4294901760, %v7741_v62 }
 0xb8d   : > { %6315 = vmatmul.f32.vlgmr.msrb.gmra.mxu3 %v6190_v33  ;;  %6445 = vmatpush.msra.mxu0 %v6370_v47 }
 0xb8e   : > { %6293 = vmatmul.f32.vlgmr.msrb.gmra.mxu2 %v6190_v33  ;;  %6373 = vmatpush.msrb.mxu1 %v6372_v22  ;;  %v6670_v33 = vand.u32 4294901760, %v6669_v20  ;;  %v6816_v21 = vsub.f32 %v7741_v62, %v6789_v40 }
 0xb8f   : > { %6492 = vmatpush.msrb.mxu2 %v6491_v28  ;;  %6522 = vmatpush.msrb.mxu3 %v6521_v58 }
 0xb90   : > { %v6817_v45 = vand.u32 4294901760, %v6816_v21 }
 0xb94   : > { %6269 = vmatmul.f32.vlgmr.msra.gmra.mxu1 %v6192_v16  ;;  %v6818_v16 = vsub.f32 %v6816_v21, %v6817_v45 }
 0xb95   : > { %6467 = vmatpush.msra.mxu1 %v6342_v6 }
 0xb96   : > { %v6819_v35 = vand.u32 4294901760, %v6818_v16 }
 0xbcf   : > { %v5766_v39 = vpop.f32.mrf.mxu1  ;;  %v5790_v4 = vpop.f32.mrf.mxu2 }
 0xbd0   : > { %v5740_v63 = vpop.f32.mrf.mxu0 }
 0xbd1   : > { %v5767_v29 = vadd.f32 %v5766_v39, %v5740_v63  ;;  %v5814_v53 = vpop.f32.mrf.mxu3 }
 0xbd3   : > { %v5791_v51 = vadd.f32 %v5790_v4, %v5767_v29 }
 0xbd5   : > { %v5815_v13 = vadd.f32 %v5814_v53, %v5791_v51 }
 0xbd7   : > { %v5860_v59 = vpop.f32.mrf.mxu1 }
 0xbd8   : > { %v5838_v43 = vpop.f32.mrf.mxu0 }
 0xbd9   : > { %v5839_v5 = vadd.f32 %v5838_v43, %v5815_v13  ;;  %v5918_v11 = vpop.f32.mrf.mxu3 }
 0xbdb   : > { %v5861_v49 = vadd.f32 %v5860_v59, %v5839_v5 }
 0xbdd   : > { %v6325_v1 = vsel %vm1630_vm2, %v5861_v49, 0 }
 0xbde   : > { %v6344_v12 = vand.u32 4294901760, %v6325_v1 }
 0xbdf   : > { %v5966_v41 = vpop.f32.mrf.mxu1 }
 0xbe0   : > { %v6345_v61 = vsub.f32 %v6325_v1, %v6344_v12  ;;  %6375 = vmatmul.f32.vlgmr.msrb.gmra.mxu1 %v6344_v12  ;;  %v5942_v24 = vpop.f32.mrf.mxu0 }
 0xbe1   : > { %v5892_v18 = vpop.f32.mrf.mxu2  ;;  %6568 = vmatpush.msrb.mxu1 %v6491_v28  ;;  %v6012_v36 = vpop.f32.mrf.mxu3 }
 0xbe2   : > { %v5919_v0 = vadd.f32 %v5918_v11, %v5892_v18  ;;  %v6346_v31 = vand.u32 4294901760, %v6345_v61  ;;  %6399 = vmatmul.f32.vlgmr.msra.gmra.mxu2 %v6345_v61 }
 0xbe3   : > { %6594 = vmatpush.msra.mxu2 %v6519_v54 }
 0xbe4   : > { %v5943_v17 = vadd.f32 %v5942_v24, %v5919_v0  ;;  %v6347_v42 = vsub.f32 %v6345_v61, %v6346_v31  ;;  %6423 = vmatmul.f32.vlgmr.msra.gmra.mxu3 %v6346_v31 }
 0xbe5   : > { %6616 = vmatpush.msra.mxu3 %v6491_v28 }
 0xbe6   : > { %v6348_v30 = vand.u32 4294901760, %v6347_v42  ;;  %v5967_v10 = vadd.f32 %v5966_v41, %v5943_v17 }
 0xbe8   : > { %6349 = vmatmul.f32.vlgmr.msrb.gmra.mxu0 %v6348_v30  ;;  %6469 = vmatmul.f32.vlgmr.msra.gmra.mxu1 %v6344_v12 }
 0xbe9   : > { %v5990_v19 = vpop.f32.mrf.mxu2  ;;  %6545 = vmatpush.msrb.mxu0 %v6518_v23  ;;  %6671 = vmatpush.msra.mxu1 %v6670_v33 }
 0xbea   : > { %v5991_v56 = vadd.f32 %v5990_v19, %v5967_v10 }
 0xbec   : > { %v6013_v48 = vadd.f32 %v6012_v36, %v5991_v56 }
 0xbee   : > { %v6474_v2 = vsel %vm1630_vm2, %v6013_v48, 0 }
 0xbef   : > { %v6493_v27 = vand.u32 4294901760, %v6474_v2 }
 0xbf0   : > { %6447 = vmatmul.f32.vlgmr.msra.gmra.mxu0 %v6344_v12 }
 0xbf1   : > { %v6494_v44 = vsub.f32 %v6474_v2, %v6493_v27  ;;  %6524 = vmatmul.f32.vlgmr.msrb.gmra.mxu3 %v6493_v27  ;;  %6641 = vmatpush.msra.mxu0 %v6640_v15 }
 0xbf2   : > { %6717 = vmatpush.msrb.mxu3 %v6640_v15 }
 0xbf3   : > { %v6495_v55 = vand.u32 4294901760, %v6494_v44 }
 0xbf5   : > { %v6496_v8 = vsub.f32 %v6494_v44, %v6495_v55  ;;  %6572 = vmatmul.f32.vlgmr.msrb.gmra.mxu1 %v6495_v55 }
 0xbf6   : > { %6765 = vmatpush.msrb.mxu1 %v6640_v15 }
 0xbf7   : > { %v6497_v34 = vand.u32 4294901760, %v6496_v8 }
 0xbf8   : > { %6548 = vmatmul.f32.vlgmr.msrb.gmra.mxu0 %v6494_v44 }
 0xbf9   : > { %6498 = vmatmul.f32.vlgmr.msrb.gmra.mxu2 %v6497_v34  ;;  %6618 = vmatmul.f32.vlgmr.msra.gmra.mxu3 %v6493_v27  ;;  %v6044_v25 = vpop.f32.mrf.mxu0 }
 0xbfa   : > { %6694 = vmatpush.msrb.mxu2 %v6667_v46  ;;  %6743 = vmatpush.msrb.mxu0 %v6668_v52 }
 0xbfb   : > { %6820 = vmatpush.msra.mxu3 %v6819_v35 }
 0xbff   : > { %v6118_v26 = vpop.f32.mrf.mxu3 }
 0xc01   : > { %6596 = vmatmul.f32.vlgmr.msra.gmra.mxu2 %v6493_v27  ;;  %v6070_v38 = vpop.f32.mrf.mxu1  ;;  %v6094_v50 = vpop.f32.mrf.mxu2 }
 0xc02   : > { %6790 = vmatpush.msra.mxu2 %v6789_v40  ;;  %v6071_v9 = vadd.f32 %v6070_v38, %v6044_v25  ;;  %v6142_v7 = vpop.f32.mrf.mxu0 }
 0xc04   : > { %v6095_v6 = vadd.f32 %v6094_v50, %v6071_v9 }
 0xc06   : > { %v6119_v47 = vadd.f32 %v6118_v26, %v6095_v6 }
 0xc08   : > { %v6143_v37 = vadd.f32 %v6142_v7, %v6119_v47  ;;  %v6222_v23 = vpop.f32.mrf.mxu3 }
 0xc09   : > { %v6164_v22 = vpop.f32.mrf.mxu1  ;;  %v6196_v3 = vpop.f32.mrf.mxu2 }
 0xc0a   : > { %v6165_v28 = vadd.f32 %v6164_v22, %v6143_v37  ;;  %v6223_v39 = vadd.f32 %v6222_v23, %v6196_v3  ;;  %v6246_v58 = vpop.f32.mrf.mxu0 }
 0xc0c   : > { %v6623_v54 = vsel %vm1630_vm2, %v6165_v28, 0  ;;  %v6247_v29 = vadd.f32 %v6246_v58, %v6223_v39 }
 0xc0d   : > { %v6642_v32 = vand.u32 4294901760, %v6623_v54 }
 0xc0f   : > { %v6643_v63 = vsub.f32 %v6623_v54, %v6642_v32  ;;  %6673 = vmatmul.f32.vlgmr.msra.gmra.mxu1 %v6642_v32 }
 0xc10   : > { %6866 = vmatpush.msra.mxu1 %v6789_v40  ;;  %v6316_v49 = vpop.f32.mrf.mxu3 }
 0xc11   : > { %v6644_v4 = vand.u32 4294901760, %v6643_v63  ;;  %v6270_v51 = vpop.f32.mrf.mxu1  ;;  %6697 = vmatmul.f32.vlgmr.msrb.gmra.mxu2 %v6643_v63  ;;  %v6294_v43 = vpop.f32.mrf.mxu2 }
 0xc12   : > { %v6271_v53 = vadd.f32 %v6270_v51, %v6247_v29  ;;  %6892 = vmatpush.msrb.mxu2 %v6817_v45 }
 0xc13   : > { %v6645_v13 = vsub.f32 %v6643_v63, %v6644_v4  ;;  %6721 = vmatmul.f32.vlgmr.msrb.gmra.mxu3 %v6644_v4 }
 0xc14   : > { %v6295_v5 = vadd.f32 %v6294_v43, %v6271_v53  ;;  %6914 = vmatpush.msrb.mxu3 %v6789_v40  ;;  %v7830_v53 = vld [vmem:[%s9831_s6 + $0x1] ss:$0 sm:$0xff] }
 0xc15   : > { %v6646_v59 = vand.u32 4294901760, %v6645_v13 }
 0xc16   : > { %v6317_v1 = vadd.f32 %v6316_v49, %v6295_v5 }
 0xc17   : > { %6647 = vmatmul.f32.vlgmr.msra.gmra.mxu0 %v6646_v59  ;;  %6767 = vmatmul.f32.vlgmr.msrb.gmra.mxu1 %v6642_v32 }
 0xc18   : > { %v6772_v12 = vsel %vm1630_vm2, %v6317_v1, 0  ;;  %6843 = vmatpush.msra.mxu0 %v6816_v21 }
 0xc19   : > { %v6791_v61 = vand.u32 4294901760, %v6772_v12 }
 0xc1b   : > { %v6792_v11 = vsub.f32 %v6772_v12, %v6791_v61  ;;  %6822 = vmatmul.f32.vlgmr.msra.gmra.mxu3 %v6791_v61 }
 0xc1d   : > { %v6793_v18 = vand.u32 4294901760, %v6792_v11 }
 0xc1f   : > { %v6794_v0 = vsub.f32 %v6792_v11, %v6793_v18  ;;  %6745 = vmatmul.f32.vlgmr.msrb.gmra.mxu0 %v6642_v32  ;;  %6870 = vmatmul.f32.vlgmr.msra.gmra.mxu1 %v6793_v18 }
 0xc21   : > { %v6795_v31 = vand.u32 4294901760, %v6794_v0  ;;  %v7748_v0 = vld [vmem:[%s9834_s9 + $0x38] sm:$0xff] }
 0xc23   : > { %6796 = vmatmul.f32.vlgmr.msra.gmra.mxu2 %v6795_v31  ;;  %6916 = vmatmul.f32.vlgmr.msrb.gmra.mxu3 %v6791_v61  ;;  %v6993_v31 = vand.u32 4294901760, %v7748_v0 }
 0xc25   : > { %7094 = vmatpush.msra.mxu3 %v6993_v31  ;;  %6994 = vmatpush.msrb.mxu0 %v6993_v31 }
 0xc27   : > { %6846 = vmatmul.f32.vlgmr.msra.gmra.mxu0 %v6792_v11 }
 0xc2b   : > { %6894 = vmatmul.f32.vlgmr.msrb.gmra.mxu2 %v6791_v61 }
 0xc5d   : > { %v6376_v17 = vpop.f32.mrf.mxu1 }
 0xc65   : > { %v6350_v24 = vpop.f32.mrf.mxu0  ;;  %v6400_v41 = vpop.f32.mrf.mxu2 }
 0xc66   : > { %v6470_v57 = vpop.f32.mrf.mxu1  ;;  %v6377_v27 = vadd.f32 %v6376_v17, %v6350_v24  ;;  %v7023_v24 = vsub.f32 %v7748_v0, %v6993_v31 }
 0xc67   : > { %v6424_v42 = vpop.f32.mrf.mxu3 }
 0xc68   : > { %v6401_v40 = vadd.f32 %v6400_v41, %v6377_v27  ;;  %7065 = vmatpush.msra.mxu2 %v7023_v24 }
 0xc6a   : > { %v6425_v45 = vadd.f32 %v6424_v42, %v6401_v40  ;;  %v7746_v42 = vld [vmem:[%s9834_s9 + $0x28] sm:$0xff] }
 0xc6d   : > { %v6448_v30 = vpop.f32.mrf.mxu0 }
 0xc6e   : > { %v6449_v38 = vadd.f32 %v6448_v30, %v6425_v45  ;;  %v7024_v30 = vand.u32 4294901760, %v7023_v24 }
 0xc70   : > { %v6471_v37 = vadd.f32 %v6470_v57, %v6449_v38  ;;  %v6997_v57 = vand.u32 4294901760, %v7746_v42  ;;  %v7831_v38 = vld [vmem:[%s9832_s7 + $0x1] ss:$0 sm:$0xff] }
 0xc72   : > { %v6573_v56 = vpop.f32.mrf.mxu1  ;;  %v6920_v39 = vsel %vm883_vm1, %v6471_v37, 0.0 }
 0xc74   : > { %v6525_v10 = vpop.f32.mrf.mxu3 }
 0xc75   : > { %v6549_v15 = vpop.f32.mrf.mxu0 }
 0xc7c   : > { %v6499_v19 = vpop.f32.mrf.mxu2  ;;  %v6619_v46 = vpop.f32.mrf.mxu3 }
 0xc7d   : > { %v6526_v2 = vadd.f32 %v6525_v10, %v6499_v19  ;;  %v7745_v10 = vld [vmem:[%s9834_s9 + $0x20] sm:$0xff] }
 0xc7f   : > { %v6550_v62 = vadd.f32 %v6549_v15, %v6526_v2  ;;  %v7025_v15 = vsub.f32 %v7023_v24, %v7024_v30 }
 0xc81   : > { %v6574_v34 = vadd.f32 %v6573_v56, %v6550_v62  ;;  %v7035_v56 = vsub.f32 %v7746_v42, %v6997_v57 }
 0xc84   : > { %v6597_v48 = vpop.f32.mrf.mxu2 }
 0xc85   : > { %v6598_v16 = vadd.f32 %v6597_v48, %v6574_v34 }
 0xc87   : > { %v6620_v7 = vadd.f32 %v6619_v46, %v6598_v16  ;;  %v6999_v46 = vand.u32 4294901760, %v7745_v10 }
 0xc89   : > { %v6921_v28 = vsel %vm883_vm1, %v6620_v7, 0.0  ;;  %v7041_v2 = vsub.f32 %v7745_v10, %v6999_v46 }
 0xc8a   : > { %v6922_v58 = vadd.f32 %v6921_v28, %v6920_v39  ;;  %v7765_v39 = vld [vmem:[%s9836_s11 + $0xf8] sm:$0xff] }
 0xc8c   : > { %v6674_v52 = vpop.f32.mrf.mxu1 }
 0xc94   : > { %v6648_v36 = vpop.f32.mrf.mxu0  ;;  %v6698_v44 = vpop.f32.mrf.mxu2 }
 0xc95   : > { %v6675_v33 = vadd.f32 %v6674_v52, %v6648_v36  ;;  %v6768_v21 = vpop.f32.mrf.mxu1  ;;  %v7026_v36 = vand.u32 4294901760, %v7025_v15  ;;  %v7036_v52 = vand.u32 4294901760, %v7035_v56 }
 0xc96   : > { %v6722_v20 = vpop.f32.mrf.mxu3 }
 0xc97   : > { %v6699_v8 = vadd.f32 %v6698_v44, %v6675_v33  ;;  %7027 = vmatpush.msrb.mxu1 %v7026_v36  ;;  %v7037_v27 = vsub.f32 %v7035_v56, %v7036_v52  ;;  %v7042_v33 = vand.u32 4294901760, %v7041_v2  ;;  %v7758_v36 = vld [vmem:[%s9836_s11 + $0xc0] sm:$0xff] }
 0xc99   : > { %v6723_v25 = vadd.f32 %v6722_v20, %v6699_v8  ;;  %v7038_v44 = vand.u32 4294901760, %v7037_v27 }
 0xc9c   : > { %v6746_v55 = vpop.f32.mrf.mxu0 }
 0xc9d   : > { %v6747_v50 = vadd.f32 %v6746_v55, %v6723_v25  ;;  %v6871_v3 = vpop.f32.mrf.mxu1  ;;  %v7043_v55 = vsub.f32 %v7041_v2, %v7042_v33 }
 0xc9e   : > { %v6823_v35 = vpop.f32.mrf.mxu3 }
 0xc9f   : > { %v6769_v22 = vadd.f32 %v6768_v21, %v6747_v50  ;;  %v7044_v40 = vand.u32 4294901760, %v7043_v55 }
 0xca1   : > { %v6923_v32 = vsel %vm883_vm1, %v6769_v22, 0.0 }
 0xca2   : > { %v6924_v51 = vadd.f32 %v6923_v32, %v6922_v58  ;;  %v9480_v32 = vand.u32 4294901760, %v7765_v39 }
 0xca4   : > { %v6847_v6 = vpop.f32.mrf.mxu0  ;;  %v9486_v58 = vsub.f32 %v7765_v39, %v9480_v32 }
 0xca6   : > { %v6797_v26 = vpop.f32.mrf.mxu2  ;;  %v6917_v29 = vpop.f32.mrf.mxu3 }
 0xca7   : > { %v6824_v9 = vadd.f32 %v6823_v35, %v6797_v26 }
 0xca9   : > { %v6848_v47 = vadd.f32 %v6847_v6, %v6824_v9  ;;  %v7832_v9 = vld [vmem:[%s9833_s8 + $0x1] ss:$0 sm:$0xff] }
 0xcab   : > { %v6872_v23 = vadd.f32 %v6871_v3, %v6848_v47 }
 0xcae   : > { %v6895_v54 = vpop.f32.mrf.mxu2 }
 0xcaf   : > { %v6896_v63 = vadd.f32 %v6895_v54, %v6872_v23 }
 0xcb1   : > { %v6918_v4 = vadd.f32 %v6917_v29, %v6896_v63  ;;  %v7764_v63 = vld [vmem:[%s9836_s11 + $0xf0] sm:$0xff] }
 0xcb2   : > { %v9488_v29 = vand.u32 4294901760, %v7764_v63 }
 0xcb3   : > { %v6925_v13 = vsel %vm883_vm1, %v6918_v4, 0.0  ;;  %v7763_v4 = vld [vmem:[%s9836_s11 + $0xe8] sm:$0xff] }
 0xcb4   : > { %v6926_v43 = vadd.f32 %v6925_v13, %v6924_v51  ;;  %v7271_v51 = vand.u32 4294901760, %v9486_v58  ;;  %v9499_v13 = vand.u32 4294901760, %v7763_v4 }
 0xcb6   : > { %v6932_v5 = vadd.f32 %v7830_v53, %v6926_v43  ;;  %v9497_v53 = vsub.f32 %v7764_v63, %v9488_v29  ;;  %v7762_v43 = vld [vmem:[%s9836_s11 + $0xe0] sm:$0xff]  ;;  %v7753_v63 = vld [vmem:[%s9836_s11 + $0x98] sm:$0xff] }
 0xcb8   : > { %v6933_v59 = vadd.f32 %v6932_v5, %v9196_v14  ;;  %v7747_v14 = vld [vmem:[%s9834_s9 + $0x30] sm:$0xff]  ;;  %v7272_v5 = vsub.f32 %v9486_v58, %v7271_v51 }
 0xcb9   : > { %v6995_v17 = vand.u32 4294901760, %v7747_v14 }
 0xcba   : > { %v6938_v49 = vsel %vm883_vm1, %v6933_v59, 0.0 }
 0xcbb   : > { %6939 = vadd.xlane.f32.xlu0 %v6938_v49  ;;  %v7029_v41 = vsub.f32 %v7747_v14, %v6995_v17  ;;  %7096 = vmatpush.msra.mxu3 %v6995_v17  ;;  %v9512_v49 = vsub.f32 %v7763_v4, %v9499_v13  ;;  %v7760_v14 = vld [vmem:[%s9836_s11 + $0xd0] sm:$0xff] }
 0xcbc   : > { %6996 = vmatpush.msrb.mxu0 %v6995_v17 }
 0xcbd   : > { %v7030_v19 = vand.u32 4294901760, %v7029_v41  ;;  %7068 = vmatpush.msra.mxu2 %v7029_v41  ;;  %7098 = vmatpush.msra.mxu3 %v6997_v57 }
 0xcbe   : > { %6998 = vmatpush.msrb.mxu0 %v6997_v57 }
 0xcbf   : > { %v7031_v48 = vsub.f32 %v7029_v41, %v7030_v19  ;;  %7071 = vmatpush.msra.mxu2 %v7035_v56  ;;  %7100 = vmatpush.msra.mxu3 %v6999_v46 }
 0xcc0   : > { %7000 = vmatpush.msrb.mxu0 %v6999_v46 }
 0xcc1   : > { %v7032_v20 = vand.u32 4294901760, %v7031_v48  ;;  %7074 = vmatpush.msra.mxu2 %v7041_v2 }
 0xcc2   : > { %7123 = vmatpush.msra.mxu0 %v7024_v30  ;;  %v9541_v30 = vand.u32 4294901760, %v7760_v14 }
 0xcc3   : > { %7033 = vmatpush.msrb.mxu1 %v7032_v20  ;;  %7229 = vmatpush.msrb.mxu2 %v9480_v32  ;;  %v9570_v20 = vand.u32 4294901760, %v7758_v36 }
 0xcc4   : > { %7127 = vmatpush.msra.mxu0 %v7030_v19  ;;  %v9556_v19 = vsub.f32 %v7760_v14, %v9541_v30 }
 0xcc5   : > { %7039 = vmatpush.msrb.mxu1 %v7038_v44  ;;  %7231 = vmatpush.msrb.mxu2 %v9488_v29 }
 0xcc6   : > { %7131 = vmatpush.msra.mxu0 %v7036_v52  ;;  %v7301_v52 = vand.u32 4294901760, %v9556_v19 }
 0xcc7   : > { %7045 = vmatpush.msrb.mxu1 %v7044_v40  ;;  %7233 = vmatpush.msrb.mxu2 %v9499_v13 }
 0xcc8   : > { %7135 = vmatpush.msra.mxu0 %v7042_v33  ;;  %v7757_v33 = vld [vmem:[%s9836_s11 + $0xb8] sm:$0xff]  ;;  %v7302_v44 = vsub.f32 %v9556_v19, %v7301_v52 }
 0xcc9   : > { %7154 = vmatpush.msra.mxu1 %v6993_v31  ;;  %v9588_v40 = vand.u32 4294901760, %v7757_v33 }
 0xccb   : > { %7156 = vmatpush.msra.mxu1 %v6995_v17 }
 0xccd   : > { %7158 = vmatpush.msra.mxu1 %v6997_v57  ;;  %v7759_v57 = vld [vmem:[%s9836_s11 + $0xc8] sm:$0xff] }
 0xcce   : > { %v9558_v56 = vand.u32 4294901760, %v7759_v57 }
 0xccf   : > { %7160 = vmatpush.msra.mxu1 %v6999_v46 }
 0xcd0   : > { %v9568_v2 = vsub.f32 %v7759_v57, %v9558_v56 }
 0xcd2   : > { %v7307_v55 = vand.u32 4294901760, %v9568_v2 }
 0xd2e   : > { %v6940_v1 = vpop.xlane.xlu0 %6939 }
 0xd2f   : > { %v6941_v12 = vmul.f32 %v6940_v1, %v8708_v60  ;;  %v9514_v1 = vand.u32 4294901760, %v7762_v43 }
 0xd31   : > { %v9448_v61 = vsub.f32 %v6933_v59, %v6941_v12  ;;  %v7277_v59 = vand.u32 4294901760, %v9497_v53  ;;  %v7761_v12 = vld [vmem:[%s9836_s11 + $0xd8] sm:$0xff]  ;;  %v9527_v0 = vsub.f32 %v7762_v43, %v9514_v1  ;;  %7235 = vmatpush.msrb.mxu2 %v9514_v1 }
 0xd32   : > { %v9531_v31 = vand.u32 4294901760, %v7761_v12 }
 0xd33   : > { %v6943_v11 = vmul.f32 %v9448_v61, %v9448_v61  ;;  %v7289_v42 = vand.u32 4294901760, %v9527_v0 }
 0xd34   : > { %v9545_v41 = vsub.f32 %v7761_v12, %v9531_v31  ;;  %7237 = vmatpush.msrb.mxu2 %v9531_v31 }
 0xd35   : > { %v6944_v18 = vsel %vm883_vm1, %v6943_v11, 0.0  ;;  %v7278_v11 = vsub.f32 %v9497_v53, %v7277_v59  ;;  %v7290_v15 = vsub.f32 %v9527_v0, %v7289_v42 }
 0xd36   : > { %6945 = vadd.xlane.f32.xlu2 %v6944_v18  ;;  %v7283_v18 = vand.u32 4294901760, %v9512_v49  ;;  %v7295_v46 = vand.u32 4294901760, %v9545_v41  ;;  %7239 = vmatpush.msrb.mxu2 %v9541_v30 }
 0xd37   : > { %v7279_v24 = vand.u32 4294901760, %v7278_v11  ;;  %v7291_v48 = vand.u32 4294901760, %v7290_v15  ;;  %v9647_v11 = vand.u32 4294901760, %v7753_v63 }
 0xd38   : > { %v7284_v17 = vsub.f32 %v9512_v49, %v7283_v18  ;;  %v7296_v27 = vsub.f32 %v9545_v41, %v7295_v46  ;;  %7241 = vmatpush.msrb.mxu2 %v9558_v56 }
 0xd39   : > { %v9663_v15 = vsub.f32 %v7753_v63, %v9647_v11 }
 0xd3a   : > { %v7285_v10 = vand.u32 4294901760, %v7284_v17  ;;  %7243 = vmatpush.msrb.mxu2 %v9570_v20  ;;  %v7752_v17 = vld [vmem:[%s9836_s11 + $0x90] sm:$0xff] }
 0xd3c   : > { %7245 = vmatpush.msrb.mxu2 %v9588_v40 }
 0xda9   : > { %v6946_v62 = vpop.xlane.xlu2 %6945 }
 0xdaa   : > { %v6947_v8 = vmul.f32 %v6946_v62, %v8708_v60  ;;  %v9586_v62 = vsub.f32 %v7758_v36, %v9570_v20  ;;  %v9665_v36 = vand.u32 4294901760, %v7752_v17 }
 0xdac   : > { %v6948_v21 = vadd.f32 1e-05, %v6947_v8  ;;  %v7297_v8 = vand.u32 4294901760, %v7296_v27 }
 0xdae   : > { %7881 = vrsqrt.f32 %v6948_v21  ;;  %vm6955_vm5 = vweird.f32 %v6948_v21 }
 0xdb4   : > { %v7882_v34 = vpop.eup %7881 }
 0xdb5   : > { %v6950_v45 = vmul.f32 %v7882_v34, %v6948_v21  ;;  %vm6956_vm2 = vweird.f32 %v7882_v34  ;;  %v7756_v21 = vld [vmem:[%s9836_s11 + $0xb0] sm:$0xff] }
 0xdb6   : > { %vm6957_vm6 = vmor %vm6955_vm5, %vm6956_vm2 }
 0xdb7   : > { %v6951_v16 = vmul.f32 %v7882_v34, %v6950_v45  ;;  %v7308_v45 = vsub.f32 %v9568_v2, %v7307_v55 }
 0xdb9   : > { %v6952_v25 = vmul.f32 0.5, %v6951_v16  ;;  %v7313_v16 = vand.u32 4294901760, %v9586_v62 }
 0xdbb   : > { %v6953_v35 = vsub.f32 1.5, %v6952_v25  ;;  %v9601_v25 = vsub.f32 %v7757_v33, %v9588_v40  ;;  %v7751_v33 = vld [vmem:[%s9836_s11 + $0x88] sm:$0xff] }
 0xdbd   : > { %v6954_v26 = vmul.f32 %v7882_v34, %v6953_v35  ;;  %v9604_v35 = vand.u32 4294901760, %v7756_v21 }
 0xdbf   : > { %v6958_v50 = vsel %vm6957_vm6, %v7882_v34, %v6954_v26  ;;  %v7303_v34 = vand.u32 4294901760, %v7302_v44  ;;  %v7755_v26 = vld [vmem:[%s9836_s11 + $0xa8] sm:$0xff]  ;;  %7247 = vmatpush.msrb.mxu2 %v9604_v35 }
 0xdc0   : > { %v6959_v6 = vmul.f32 %v6958_v50, %v9448_v61  ;;  %v7273_v61 = vand.u32 4294901760, %v7272_v5  ;;  %v7314_v50 = vsub.f32 %v9586_v62, %v7313_v16 }
 0xdc2   : > { %v6963_v7 = vmul.f32 %v7831_v38, %v6959_v6  ;;  %7274 = vmatpush.msrb.mxu3 %v7273_v61  ;;  %v7309_v38 = vand.u32 4294901760, %v7308_v45  ;;  %v9614_v6 = vand.u32 4294901760, %v7755_v26  ;;  %v9678_v45 = vsub.f32 %v7752_v17, %v9665_v36 }
 0xdc4   : > { %v9473_v47 = vadd.f32 %v7832_v9, %v6963_v7  ;;  %7280 = vmatpush.msrb.mxu3 %v7279_v24  ;;  %v7319_v9 = vand.u32 4294901760, %v9601_v25  ;;  %v7833_v7 = vld [vmem:[%s9835_s10 + $0x1] ss:$0 sm:$0xff]  ;;  %7249 = vmatpush.msrb.mxu2 %v9614_v6 }
 0xdc6   : > { %v6979_v37 = vsel %vm883_vm1, %v9473_v47, 0  ;;  %7286 = vmatpush.msrb.mxu3 %v7285_v10 }
 0xdc7   : > { %v7001_v22 = vand.u32 4294901760, %v6979_v37 }
 0xdc8   : > { %7292 = vmatpush.msrb.mxu3 %v7291_v48 }
 0xdc9   : > { %7047 = vmatmul.f32.vlgmr.msrb.gmra.mxu1 %v7001_v22  ;;  %v7002_v3 = vsub.f32 %v6979_v37, %v7001_v22  ;;  %v9622_v37 = vsub.f32 %v7756_v21, %v9604_v35 }
 0xdca   : > { %7425 = vmatpush.msrb.mxu1 %v9480_v32  ;;  %7298 = vmatpush.msrb.mxu3 %v7297_v8 }
 0xdcb   : > { %7077 = vmatmul.f32.vlgmr.msra.gmra.mxu2 %v7002_v3  ;;  %v7003_v28 = vand.u32 4294901760, %v7002_v3  ;;  %v7325_v39 = vand.u32 4294901760, %v9622_v37 }
 0xdcc   : > { %7427 = vmatpush.msrb.mxu1 %v9488_v29  ;;  %7304 = vmatpush.msrb.mxu3 %v7303_v34  ;;  %v7343_v34 = vand.u32 4294901760, %v9663_v15 }
 0xdcd   : > { %7104 = vmatmul.f32.vlgmr.msra.gmra.mxu3 %v7003_v28  ;;  %v7004_v23 = vsub.f32 %v7002_v3, %v7003_v28  ;;  %v7315_v3 = vand.u32 4294901760, %v7314_v50  ;;  %v7320_v28 = vsub.f32 %v9601_v25, %v7319_v9  ;;  %v7326_v24 = vsub.f32 %v9622_v37, %v7325_v39  ;;  %v7750_v50 = vld [vmem:[%s9836_s11 + $0x80] sm:$0xff] }
 0xdce   : > { %7429 = vmatpush.msrb.mxu1 %v9499_v13  ;;  %7310 = vmatpush.msrb.mxu3 %v7309_v38  ;;  %v9682_v38 = vand.u32 4294901760, %v7751_v33  ;;  %v9692_v63 = vand.u32 4294901760, %v7750_v50 }
 0xdcf   : > { %v7005_v54 = vand.u32 4294901760, %v7004_v23  ;;  %v9632_v23 = vsub.f32 %v7755_v26, %v9614_v6  ;;  %v7321_v5 = vand.u32 4294901760, %v7320_v28  ;;  %v7327_v27 = vand.u32 4294901760, %v7326_v24 }
 0xdd0   : > { %7431 = vmatpush.msrb.mxu1 %v9514_v1  ;;  %7316 = vmatpush.msrb.mxu3 %v7315_v3  ;;  %v7344_v3 = vsub.f32 %v9663_v15, %v7343_v34  ;;  %v7349_v28 = vand.u32 4294901760, %v9678_v45  ;;  %v9704_v17 = vsub.f32 %v7750_v50, %v9692_v63 }
 0xdd1   : > { %7006 = vmatmul.f32.vlgmr.msrb.gmra.mxu0 %v7005_v54  ;;  %7162 = vmatmul.f32.vlgmr.msra.gmra.mxu1 %v7001_v22  ;;  %v7331_v12 = vand.u32 4294901760, %v9632_v23 }
 0xdd2   : > { %7372 = vmatpush.msrb.mxu0 %v9486_v58  ;;  %7433 = vmatpush.msrb.mxu1 %v9531_v31  ;;  %v7350_v24 = vsub.f32 %v9678_v45, %v7349_v28 }
 0xdd3   : > { %v7332_v57 = vsub.f32 %v9632_v23, %v7331_v12  ;;  %7322 = vmatpush.msrb.mxu3 %v7321_v5 }
 0xdd4   : > { %7375 = vmatpush.msrb.mxu0 %v9497_v53  ;;  %7435 = vmatpush.msrb.mxu1 %v9541_v30 }
 0xdd5   : > { %v7333_v8 = vand.u32 4294901760, %v7332_v57  ;;  %7328 = vmatpush.msrb.mxu3 %v7327_v27 }
 0xdd6   : > { %7378 = vmatpush.msrb.mxu0 %v9512_v49  ;;  %7437 = vmatpush.msrb.mxu1 %v9558_v56 }
 0xdd7   : > { %7334 = vmatpush.msrb.mxu3 %v7333_v8 }
 0xdd8   : > { %7381 = vmatpush.msrb.mxu0 %v9527_v0  ;;  %7439 = vmatpush.msrb.mxu1 %v9570_v20 }
 0xdd9   : > { %7137 = vmatmul.f32.vlgmr.msra.gmra.mxu0 %v7001_v22  ;;  %v7754_v22 = vld [vmem:[%s9836_s11 + $0xa0] sm:$0xff] }
 0xdda   : > { %7384 = vmatpush.msrb.mxu0 %v9545_v41  ;;  %7441 = vmatpush.msrb.mxu1 %v9588_v40  ;;  %v9634_v54 = vand.u32 4294901760, %v7754_v22 }
 0xddc   : > { %7387 = vmatpush.msrb.mxu0 %v9556_v19  ;;  %7443 = vmatpush.msrb.mxu1 %v9604_v35  ;;  %v9645_v61 = vsub.f32 %v7754_v22, %v9634_v54 }
 0xddd   : > { %7251 = vmatpush.msrb.mxu2 %v9634_v54 }
 0xdde   : > { %7390 = vmatpush.msrb.mxu0 %v9568_v2  ;;  %7445 = vmatpush.msrb.mxu1 %v9614_v6  ;;  %v7337_v10 = vand.u32 4294901760, %v9645_v61 }
 0xddf   : > { %7253 = vmatpush.msrb.mxu2 %v9647_v11 }
 0xde0   : > { %7393 = vmatpush.msrb.mxu0 %v9586_v62  ;;  %7447 = vmatpush.msrb.mxu1 %v9634_v54  ;;  %v7338_v21 = vsub.f32 %v9645_v61, %v7337_v10 }
 0xde1   : > { %7255 = vmatpush.msrb.mxu2 %v9665_v36 }
 0xde2   : > { %7396 = vmatpush.msrb.mxu0 %v9601_v25  ;;  %7449 = vmatpush.msrb.mxu1 %v9647_v11  ;;  %v7339_v22 = vand.u32 4294901760, %v7338_v21 }
 0xde3   : > { %7257 = vmatpush.msrb.mxu2 %v9682_v38 }
 0xde4   : > { %7399 = vmatpush.msrb.mxu0 %v9622_v37  ;;  %7451 = vmatpush.msrb.mxu1 %v9665_v36 }
 0xde5   : > { %7340 = vmatpush.msrb.mxu3 %v7339_v22  ;;  %7259 = vmatpush.msrb.mxu2 %v9692_v63 }
 0xde6   : > { %7402 = vmatpush.msrb.mxu0 %v9632_v23  ;;  %7453 = vmatpush.msrb.mxu1 %v9682_v38 }
 0xde7   : > { %7466 = vmatpush.msra.mxu2 %v7271_v51 }
 0xde8   : > { %7405 = vmatpush.msrb.mxu0 %v9645_v61  ;;  %7455 = vmatpush.msrb.mxu1 %v9692_v63 }
 0xde9   : > { %7470 = vmatpush.msra.mxu2 %v7277_v59 }
 0xdea   : > { %7408 = vmatpush.msrb.mxu0 %v9663_v15 }
 0xdeb   : > { %7474 = vmatpush.msra.mxu2 %v7283_v18 }
 0xdec   : > { %7411 = vmatpush.msrb.mxu0 %v9678_v45 }
 0xded   : > { %7478 = vmatpush.msra.mxu2 %v7289_v42 }
 0xdef   : > { %7482 = vmatpush.msra.mxu2 %v7295_v46 }
 0xdf1   : > { %7486 = vmatpush.msra.mxu2 %v7301_v52 }
 0xdf3   : > { %7490 = vmatpush.msra.mxu2 %v7307_v55 }
 0xdf5   : > { %7494 = vmatpush.msra.mxu2 %v7313_v16 }
 0xdf7   : > { %7498 = vmatpush.msra.mxu2 %v7319_v9 }
 0xdf9   : > { %7502 = vmatpush.msra.mxu2 %v7325_v39 }
 0xdfb   : > { %7506 = vmatpush.msra.mxu2 %v7331_v12 }
 0xdfd   : > { %7510 = vmatpush.msra.mxu2 %v7337_v10 }
 0xdff   : > { %7514 = vmatpush.msra.mxu2 %v7343_v34 }
 0xe01   : > { %7518 = vmatpush.msra.mxu2 %v7349_v28 }
 0xe46   : > { %v7048_v4 = vpop.f32.mrf.mxu1 }
 0xe4e   : > { %v7007_v43 = vpop.f32.mrf.mxu0  ;;  %v7078_v44 = vpop.f32.mrf.mxu2 }
 0xe4f   : > { %v7008_v14 = vadd.f32 %v7833_v7, %v7007_v43  ;;  %v9697_v43 = vsub.f32 %v7751_v33, %v9682_v38  ;;  %v7163_v27 = vpop.f32.mrf.mxu1  ;;  %v7351_v33 = vand.u32 4294901760, %v7350_v24 }
 0xe50   : > { %v7105_v7 = vpop.f32.mrf.mxu3 }
 0xe51   : > { %v7049_v48 = vadd.f32 %v7048_v4, %v7008_v14  ;;  %v7345_v14 = vand.u32 4294901760, %v7344_v3  ;;  %7414 = vmatpush.msrb.mxu0 %v9697_v43 }
 0xe53   : > { %v7079_v26 = vadd.f32 %v7078_v44, %v7049_v48  ;;  %v7355_v48 = vand.u32 4294901760, %v9697_v43  ;;  %v7361_v44 = vand.u32 4294901760, %v9704_v17  ;;  %7346 = vmatpush.msrb.mxu3 %v7345_v14  ;;  %7417 = vmatpush.msrb.mxu0 %v9704_v17 }
 0xe55   : > { %v7106_v4 = vadd.f32 %v7105_v7, %v7079_v26  ;;  %v7356_v21 = vsub.f32 %v9697_v43, %v7355_v48  ;;  %v7362_v26 = vsub.f32 %v9704_v17, %v7361_v44  ;;  %7352 = vmatpush.msrb.mxu3 %v7351_v33  ;;  %7522 = vmatpush.msra.mxu2 %v7355_v48 }
 0xe56   : > { %v7138_v5 = vpop.f32.mrf.mxu0 }
 0xe57   : > { %v7139_v57 = vadd.f32 %v7138_v5, %v7106_v4  ;;  %v7357_v58 = vand.u32 4294901760, %v7356_v21  ;;  %v7363_v51 = vand.u32 4294901760, %v7362_v26  ;;  %7526 = vmatpush.msra.mxu2 %v7361_v44 }
 0xe59   : > { %v9714_v8 = vadd.f32 %v7163_v27, %v7139_v57  ;;  %7358 = vmatpush.msrb.mxu3 %v7357_v58 }
 0xe5b   : > { %v9723_v50 = vmul.f32 0.70710677, %v9714_v8  ;;  %7364 = vmatpush.msrb.mxu3 %v7363_v51  ;;  %v7166_v23 = vmul.f32 0.5, %v9714_v8 }
 0xe5d   : > { %v7168_v7 = vand.u32 2147483647, %v9723_v50  ;;  %7533 = vmatpush.msra.mxu3 %v9480_v32  ;;  %vm7201_vm11 = vcmp.ge.f32.partialorder %v9723_v50, 0.0 }
 0xe5f   : > { %v7169_v22 = vmul.f32 0.3275911, %v7168_v7  ;;  %7535 = vmatpush.msra.mxu3 %v9488_v29 }
 0xe61   : > { %v7170_v53 = vadd.f32 1.0, %v7169_v22  ;;  %7537 = vmatpush.msra.mxu3 %v9499_v13 }
 0xe63   : > { %7883 = vrcp.f32 %v7170_v53  ;;  %7539 = vmatpush.msra.mxu3 %v9514_v1  ;;  %v7182_v59 = vand.u32 2147483648, %v7170_v53  ;;  %v7180_v1 = vand.u32 2147483647, %v7170_v53  ;;  %vm7176_vm8 = vweird.f32 %v7170_v53 }
 0xe65   : > { %7541 = vmatpush.msra.mxu3 %v9531_v31  ;;  %v7183_v0 = vor.u32 1.1754944e-38, %v7182_v59  ;;  %vm7181_vm10 = vcmp.eq.f32.partialorder %v7180_v1, 8.507059e+37 }
 0xe67   : > { %7543 = vmatpush.msra.mxu3 %v9541_v30  ;;  %v7195_v30 = vsub.f32 0.0, %v7168_v7 }
 0xe69   : > { %v7884_v32 = vpop.eup %7883  ;;  %7545 = vmatpush.msra.mxu3 %v9558_v56  ;;  %v7196_v56 = vmul.f32 %v7195_v30, %v7168_v7 }
 0xe6a   : > { %v7172_v29 = vmul.f32 %v7884_v32, %v7170_v53  ;;  %vm7177_vm7 = vweird.f32 %v7884_v32 }
 0xe6b   : > { %7547 = vmatpush.msra.mxu3 %v9570_v20  ;;  %vm7178_vm9 = vmor %vm7176_vm8, %vm7177_vm7  ;;  %v7197_v2 = vmul.f32 1.442695, %v7196_v56 }
 0xe6c   : > { %v7173_v13 = vsub.f32 1.0, %v7172_v29  ;;  %v7835_v29 = vld [vmem:[%s9838_s13 + $0x1] ss:$0 sm:$0xff] }
 0xe6d   : > { %7549 = vmatpush.msra.mxu3 %v9588_v40  ;;  %7885 = vpow2.f32 %v7197_v2 }
 0xe6e   : > { %v7174_v49 = vmul.f32 %v7884_v32, %v7173_v13 }
 0xe6f   : > { %7551 = vmatpush.msra.mxu3 %v9604_v35 }
 0xe70   : > { %v7175_v18 = vadd.f32 %v7884_v32, %v7174_v49  ;;  %v7836_v49 = vld [vmem:[%s9839_s14 + $0x1] ss:$0 sm:$0xff] }
 0xe71   : > { %7553 = vmatpush.msra.mxu3 %v9614_v6 }
 0xe72   : > { %v7179_v31 = vsel %vm7178_vm9, %v7884_v32, %v7175_v18 }
 0xe73   : > { %v7184_v42 = vsel %vm7181_vm10, %v7183_v0, %v7179_v31  ;;  %7555 = vmatpush.msra.mxu3 %v9634_v54  ;;  %v7886_v25 = vpop.eup %7885 }
 0xe74   : > { %v7186_v41 = vmul.f32 1.0614054, %v7184_v42 }
 0xe75   : > { %7557 = vmatpush.msra.mxu3 %v9647_v11 }
 0xe76   : > { %v7187_v19 = vadd.f32 -1.4531521, %v7186_v41 }
 0xe77   : > { %7559 = vmatpush.msra.mxu3 %v9665_v36  ;;  %v7834_v36 = vld [vmem:[%s9837_s12 + $0x1] ss:$0 sm:$0xff] }
 0xe78   : > { %v7188_v46 = vmul.f32 %v7187_v19, %v7184_v42 }
 0xe79   : > { %7561 = vmatpush.msra.mxu3 %v9682_v38 }
 0xe7a   : > { %v7189_v52 = vadd.f32 1.4214138, %v7188_v46 }
 0xe7b   : > { %7563 = vmatpush.msra.mxu3 %v9692_v63 }
 0xe7c   : > { %v7190_v20 = vmul.f32 %v7189_v52, %v7184_v42 }
 0xe7e   : > { %v7191_v55 = vadd.f32 -0.28449672, %v7190_v20 }
 0xe80   : > { %v7192_v62 = vmul.f32 %v7191_v55, %v7184_v42 }
 0xe82   : > { %v7193_v40 = vadd.f32 0.2548296, %v7192_v62 }
 0xe84   : > { %v7194_v16 = vmul.f32 %v7193_v40, %v7184_v42 }
 0xe86   : > { %v7199_v35 = vmul.f32 %v7886_v25, %v7194_v16  ;;  %v7837_v25 = vld [vmem:[%s9840_s15] ss:$0 sm:$0xff] }
 0xe88   : > { %v7200_v9 = vsub.f32 1.0, %v7199_v35 }
 0xe8a   : > { %v7202_v6 = vsub.f32 0.0, %v7200_v9 }
 0xe8c   : > { %v7203_v37 = vsel %vm7201_vm11, %v7200_v9, %v7202_v6  ;;  %v7838_v9 = vld [vmem:[%s9841_s16] ss:$0 sm:$0xff] }
 0xe8d   : > { %v7204_v54 = vadd.f32 1.0, %v7203_v37 }
 0xe8f   : > { %v7205_v39 = vmul.f32 %v7204_v54, %v7166_v23 }
 0xe91   : > { %v7260_v12 = vand.u32 4294901760, %v7205_v39 }
 0xe93   : > { %v7261_v61 = vsub.f32 %v7205_v39, %v7260_v12  ;;  %7366 = vmatmul.f32.vlgmr.msrb.gmra.mxu3 %v7260_v12 }
 0xe95   : > { %7420 = vmatmul.f32.vlgmr.msrb.gmra.mxu0 %v7261_v61  ;;  %v7262_v11 = vand.u32 4294901760, %v7261_v61 }
 0xe97   : > { %7459 = vmatmul.f32.vlgmr.msrb.gmra.mxu1 %v7262_v11  ;;  %v7263_v10 = vsub.f32 %v7261_v61, %v7262_v11 }
 0xe99   : > { %v7264_v15 = vand.u32 4294901760, %v7263_v10 }
 0xe9b   : > { %7265 = vmatmul.f32.vlgmr.msrb.gmra.mxu2 %v7264_v15  ;;  %7565 = vmatmul.f32.vlgmr.msra.gmra.mxu3 %v7260_v12 }
 0xea3   : > { %7528 = vmatmul.f32.vlgmr.msra.gmra.mxu2 %v7260_v12 }
 0xf12   : > { %v7421_v28 = vpop.f32.mrf.mxu0 }
 0xf14   : > { %v7460_v4 = vpop.f32.mrf.mxu1 }
 0xf16   : > { %v7367_v34 = vpop.f32.mrf.mxu3 }
 0xf1e   : > { %v7266_v45 = vpop.f32.mrf.mxu2  ;;  %v7566_v24 = vpop.f32.mrf.mxu3 }
 0xf1f   : > { %v7267_v38 = vadd.f32 %v7834_v36, %v7266_v45 }
 0xf21   : > { %v7368_v3 = vadd.f32 %v7367_v34, %v7267_v38 }
 0xf23   : > { %v7422_v63 = vadd.f32 %v7421_v28, %v7368_v3 }
 0xf25   : > { %v7461_v43 = vadd.f32 %v7460_v4, %v7422_v63 }
 0xf26   : > { %v7529_v5 = vpop.f32.mrf.mxu2 }
 0xf27   : > { %v7530_v14 = vadd.f32 %v7529_v5, %v7461_v43 }
 0xf29   : > { %v7567_v17 = vadd.f32 %v7566_v24, %v7530_v14 }
 0xf2b   : > { %v7569_v57 = vadd.f32 %v7567_v17, %v9473_v47 }
 0xf2d   : > { %v7574_v48 = vsel %vm883_vm1, %v7569_v57, 0.0 }
 0xf2e   : > { %7575 = vadd.xlane.f32.xlu1 %v7574_v48 }
 0xfa1   : > { %v7576_v27 = vpop.xlane.xlu1 %7575 }
 0xfa2   : > { %v7577_v33 = vmul.f32 %v7576_v27, %v8708_v60 }
 0xfa4   : > { %v7578_v44 = vsub.f32 %v7569_v57, %v7577_v33 }
 0xfa6   : > { %v7579_v8 = vmul.f32 %v7578_v44, %v7578_v44 }
 0xfa8   : > { %v7580_v21 = vsel %vm883_vm1, %v7579_v8, 0.0 }
 0xfa9   : > { %7581 = vadd.xlane.f32.xlu2 %v7580_v21 }
0x101c   : > { %v7582_v26 = vpop.xlane.xlu2 %7581 }
0x101d   : > { %v7583_v50 = vmul.f32 %v7582_v26, %v8708_v60 }
0x101f   : > { %v7584_v58 = vadd.f32 1e-05, %v7583_v50 }
0x1021   : > { %7887 = vrsqrt.f32 %v7584_v58  ;;  %vm7591_vm13 = vweird.f32 %v7584_v58 }
0x1027   : > { %v7888_v51 = vpop.eup %7887 }
0x1028   : > { %v7586_v7 = vmul.f32 %v7888_v51, %v7584_v58  ;;  %vm7592_vm12 = vweird.f32 %v7888_v51 }
0x1029   : > { %vm7593_vm14 = vmor %vm7591_vm13, %vm7592_vm12 }
0x102a   : > { %v7587_v22 = vmul.f32 %v7888_v51, %v7586_v7 }
0x102c   : > { %v7588_v47 = vmul.f32 0.5, %v7587_v22 }
0x102e   : > { %v7589_v53 = vsub.f32 1.5, %v7588_v47 }
0x1030   : > { %v7590_v32 = vmul.f32 %v7888_v51, %v7589_v53 }
0x1032   : > { %v7594_v13 = vsel %vm7593_vm14, %v7888_v51, %v7590_v32 }
0x1033   : > { %v7595_v59 = vmul.f32 %v7594_v13, %v7578_v44 }
0x1035   : > { %v7599_v1 = vmul.f32 %v7835_v29, %v7595_v59 }
0x1037   : > { %v7603_v18 = vadd.f32 %v7836_v49, %v7599_v1 }
0x1039   : > { %v7606_v0 = vsel %vm883_vm1, %v7603_v18, 0.0 }
0x103a   : > { %7607 = vadd.xlane.f32.xlu0 %v7606_v0 }
0x10ad   : > { %v7608_v31 = vpop.xlane.xlu0 %7607 }
0x10ae   : > { %v7609_v42 = vmul.f32 %v7608_v31, %v8708_v60 }
0x10b0   : > { %v7610_v30 = vsub.f32 %v7603_v18, %v7609_v42 }
0x10b2   : > { %v7611_v41 = vmul.f32 %v7610_v30, %v7610_v30 }
0x10b4   : > { %v7612_v19 = vsel %vm883_vm1, %v7611_v41, 0.0 }
0x10b5   : > { %7613 = vadd.xlane.f32.xlu2 %v7612_v19 }
0x1128   : > { %v7614_v56 = vpop.xlane.xlu2 %7613 }
0x1129   : > { %v7615_v46 = vmul.f32 %v7614_v56, %v8708_v60 }
0x112b   : > { %v7616_v52 = vadd.f32 1e-05, %v7615_v46 }
0x112d   : > { %7889 = vrsqrt.f32 %v7616_v52  ;;  %vm7623_vm0 = vweird.f32 %v7616_v52 }
0x1133   : > { %v7890_v2 = vpop.eup %7889 }
0x1134   : > { %v7618_v20 = vmul.f32 %v7890_v2, %v7616_v52  ;;  %vm7624_vm15 = vweird.f32 %v7890_v2 }
0x1135   : > { %vm7625_vm3 = vmor %vm7623_vm0, %vm7624_vm15 }
0x1136   : > { %v7619_v55 = vmul.f32 %v7890_v2, %v7618_v20 }
0x1138   : > { %v7620_v62 = vmul.f32 0.5, %v7619_v55 }
0x113a   : > { %v7621_v40 = vsub.f32 1.5, %v7620_v62 }
0x113c   : > { %v7622_v16 = vmul.f32 %v7890_v2, %v7621_v40 }
0x113e   : > { %v7626_v60 = vsel %vm7625_vm3, %v7890_v2, %v7622_v16 }
0x113f   : > { %v7627_v35 = vmul.f32 %v7626_v60, %v7610_v30 }
0x1141   : > { %v7631_v6 = vmul.f32 %v7837_v25, %v7627_v35 }
0x1143   : > { %v7635_v37 = vadd.f32 %v7838_v9, %v7631_v6 }
0x1145   : > { %7636 = vst.msk [vmem:[%s539_s4] sm:$0xff] %vm883_vm1, %v7635_v37 }
0x1146   : > { %7918 = shalt.err (!%p7915_p3)
}
0x1147   : > { %7773 = dma.vmem_to_hbm [thread:$0]  (%p8086_p5), %s7651_s28, 128, %s7653_s5, %s7638_s23  }
0x1148 PF: > { %p7779_p4 = scmp.ge.s32.totalorder %s7953_s27, 2  ;;  %s7664_s4 = sand.u32 1, %s7941_s24  }
0x1149   : > { %s7665_s26 = scalar_lea.sflag [#allocation3], %s7664_s4 }
0x114a   : > { %p7776_p7 = pnand %p7779_p4, %p8090_p6 }
0x114c   : > { %p7777_p8 = pneg %p7776_p7 }
0x114e   : > { %7936 = dma.done.wait (%p7777_p8), %s7665_s26, 128  }
0x114f   : > { %7938 = vsyncadd (%p7777_p8), %s7665_s26, 4294967168  ;;  %s9862_s22 = sld [smem:[#allocation5_spill]]  ;;  %p27_p9 = scmp.ge.s32.totalorder %s8073_s0, 4  }
0x1150   : > { %s9863_s26 = sld [smem:[#allocation6_spill]]  ;;  %s9864_s24 = smov %s7945_s25 }
0x1151   : > { %s9866_s27 = smov %s8073_s0  ;;  %29 = sbr.rel (!%p27_p9) target bundleno = 10 (0xa), region = 135 }
0x1155   : > { %s9865_s25 = smov %s9862_s22 }
0x1156   :  { %7671 = vsyncpa [#allocation3], 1 }
0x1157   :  { %7673 = vsyncpa [#allocation3 + $0x1], 1 }

</bundles_post_ra>
